<compile_context>
chip_gen: v6e
topology: v6e:2x2x1
jax: 0.10.0
libtpu: 0.0.40
codegen_flags: <defaults>
</compile_context>

<pallas_src>
import numpy as np
import jax
import jax.numpy as jnp
from jax.experimental import pallas as pl
from jax.experimental.pallas import tpu as pltpu

# ----------------------------------------------------------------------------
# Cl(1,3) geometric-algebra tables (numpy, built once; metric signature (+,-,-,-))
# Basis order: 1 | e0..e3 | e01,e02,e03,e12,e13,e23 | e012,e013,e023,e123 | e0123
# ----------------------------------------------------------------------------
_METRIC = (1.0, -1.0, -1.0, -1.0)
_BLADES = [(), (0,), (1,), (2,), (3,),
           (0, 1), (0, 2), (0, 3), (1, 2), (1, 3), (2, 3),
           (0, 1, 2), (0, 1, 3), (0, 2, 3), (1, 2, 3),
           (0, 1, 2, 3)]
_BLADE_INDEX = {b: i for i, b in enumerate(_BLADES)}
GRADE_IDX = np.array([len(b) for b in _BLADES], dtype=np.int32)
IP_FACTORS = np.array([float(np.prod([_METRIC[i] for i in b])) if b else 1.0
                       for b in _BLADES], dtype=np.float32)


def _blade_mul(a, b):
    arr = list(a) + list(b)
    sign = 1.0
    n = len(arr)
    for i in range(n):
        for j in range(n - 1 - i):
            if arr[j] > arr[j + 1]:
                arr[j], arr[j + 1] = arr[j + 1], arr[j]
                sign = -sign
    out, i = [], 0
    while i < len(arr):
        if i + 1 < len(arr) and arr[i] == arr[i + 1]:
            sign *= _METRIC[arr[i]]
            i += 2
        else:
            out.append(arr[i])
            i += 1
    return tuple(out), sign


def _build_gp_table():
    t = np.zeros((16, 16, 16), dtype=np.float32)
    for i, a in enumerate(_BLADES):
        for j, b in enumerate(_BLADES):
            blade, sign = _blade_mul(a, b)
            t[i, j, _BLADE_INDEX[blade]] += sign
    return t


def _build_join_table(gp):
    dual = gp[:, 15, :]                                                  # dual(e_i) = e_i * e0123
    g = GRADE_IDX
    wedge = gp * (g[:, None, None] + g[None, :, None] == g[None, None, :])
    # join(x, y) = dual( dual(x) ^ dual(y) )
    # TODO(synk): lgatr's equi_join additionally rescales by the pseudoscalar component of a
    # reference multivector to restore full Pin(1,3) equivariance; omitted here.
    return np.einsum("im,jn,mnp,pk->ijk", dual, dual, wedge, dual).astype(np.float32)


_GP_NP = _build_gp_table()
_JOIN_NP = _build_join_table(_GP_NP)
GP_TABLE = jnp.asarray(_GP_NP)
JOIN_TABLE = jnp.asarray(_JOIN_NP)


def _round_up(x, m):
    return ((x + m - 1) // m) * m


# ----------------------------------------------------------------------------
# Host-side parameter packing: EquiLinear -> dense matmuls in kernel-native layouts.
# ----------------------------------------------------------------------------
def pack_equi_linear(p, in_mv, out_mv, in_s=0, out_s=0):
    """Standard channel-major pack: (in_mv*16 + in_s, out_mv*16 + out_s) matrix + bias."""
    d_in = in_mv * 16 + in_s
    d_out = out_mv * 16 + out_s
    W = np.zeros((d_in, d_out), dtype=np.float32)
    b = np.zeros((d_out,), dtype=np.float32)
    w_exp = np.asarray(p["w_mv"])[:, :, GRADE_IDX]          # (out_mv, in_mv, 16)
    for comp in range(16):
        W[comp:in_mv * 16:16, comp:out_mv * 16:16] = w_exp[:, :, comp].T
    b[np.arange(out_mv) * 16] = np.asarray(p["b_mv"])
    if in_s and "w_s2mv" in p:
        W[in_mv * 16:, np.arange(out_mv) * 16] = np.asarray(p["w_s2mv"])
    if out_s:
        W[np.arange(in_mv) * 16, out_mv * 16:] = np.asarray(p["w_mvs2s"])
        b[out_mv * 16:] = np.asarray(p["b_s"])
        if in_s and "w_s2s" in p:
            W[in_mv * 16:, out_mv * 16:] = np.asarray(p["w_s2s"])
    return W, b


def _pad_rows(W, n_rows):
    out = np.zeros((n_rows, W.shape[1]), np.float32)
    out[:W.shape[0]] = W
    return out


def _pad_cols(W, n_cols):
    out = np.zeros((W.shape[0], n_cols), np.float32)
    out[:, :W.shape[1]] = W
    return out


def _pad_vec(b, n):
    out = np.zeros((n,), np.float32)
    out[:b.shape[0]] = b
    return out


def _relayout_heads_cols(W, b, n_types, H, hm, hs, hwp, kinds):
    """Re-pack projection output columns into per-(type,head) 128-aligned blocks
    [mv ch0..hm-1 x16 | hs scalars | pad]; fold 1/sqrt(d) into q blocks and the
    Lorentz metric into k multivector columns."""
    scale = 1.0 / np.sqrt(hm * 16 + hs)
    Wn = np.zeros((W.shape[0], n_types * H * hwp), np.float32)
    bn = np.zeros((n_types * H * hwp,), np.float32)
    for t in range(n_types):
        for h in range(H):
            base = (t * H + h) * hwp
            fac_mv = np.ones(16, np.float32)
            fac_s = 1.0
            if kinds[t] == "q":
                fac_mv[:] = scale
                fac_s = scale
            elif kinds[t] == "k":
                fac_mv[:] = IP_FACTORS
            for m in range(hm):
                old = ((t * H + h) * hm + m) * 16
                Wn[:, base + m * 16:base + (m + 1) * 16] = W[:, old:old + 16] * fac_mv
                bn[base + m * 16:base + (m + 1) * 16] = b[old:old + 16] * fac_mv
            olds = n_types * H * hm * 16 + (t * H + h) * hs
            Wn[:, base + hm * 16:base + hm * 16 + hs] = W[:, olds:olds + hs] * fac_s
            bn[base + hm * 16:base + hm * 16 + hs] = b[olds:olds + hs] * fac_s
    return Wn, bn


def _split_out_proj_heads(W, H, hm, hs, hwp, Dp):
    """(H*hm*16 + H*hs, D) -> (H, hwp, Dp): per-head rows in the padded head-block layout."""
    D = W.shape[1]
    Wh = np.zeros((H, hwp, Dp), np.float32)
    for h in range(H):
        for m in range(hm):
            Wh[h, m * 16:(m + 1) * 16, :D] = W[(h * hm + m) * 16:(h * hm + m + 1) * 16, :]
        Wh[h, hm * 16:hm * 16 + hs, :D] = W[H * hm * 16 + h * hs:H * hm * 16 + (h + 1) * hs, :]
    return Wh


def _build_bilinear_fold(bh, Wbp):
    """Replication (S) and GP/JOIN structure-constant (M) fold matrices, block width Wbp."""
    n2 = 2 * bh
    Wb = n2 * 16
    Sm = np.zeros((Wb, 16 * Wbp), np.float32)
    Mm = np.zeros((Wb, 16 * Wbp), np.float32)
    for c in range(n2):
        tbl = _GP_NP if c < bh else _JOIN_NP
        for i in range(16):
            Sm[c * 16 + i, i * Wbp + c * 16:i * Wbp + (c + 1) * 16] = 1.0
            Mm[c * 16:(c + 1) * 16, i * Wbp + c * 16:i * Wbp + (c + 1) * 16] = tbl[i]
    return Sm, Mm


def _relayout_bo_cols(W, b, hid_mv, hid_s, mvwp, sbw):
    """Bilinear linear_out columns -> [comp-major mv (mvwp) | scalars (sbw) | comp-0 gate bcast (mvwp)]."""
    width = mvwp + sbw + mvwp
    Wn = np.zeros((W.shape[0], width), np.float32)
    bn = np.zeros((width,), np.float32)
    for m in range(hid_mv):
        for c in range(16):
            Wn[:, c * hid_mv + m] = W[:, m * 16 + c]
            bn[c * hid_mv + m] = b[m * 16 + c]
            Wn[:, mvwp + sbw + c * hid_mv + m] = W[:, m * 16]
            bn[mvwp + sbw + c * hid_mv + m] = b[m * 16]
    Wn[:, mvwp:mvwp + hid_s] = W[:, hid_mv * 16:]
    bn[mvwp:mvwp + hid_s] = b[hid_mv * 16:]
    return Wn, bn


def _relayout_mo_rows(W, hid_mv, hid_s, mvwp, sbw):
    """MLP linear_out rows -> comp-major gated-mv rows (mvwp) and padded scalar rows (sbw)."""
    Wmv = np.zeros((mvwp, W.shape[1]), np.float32)
    for m in range(hid_mv):
        for c in range(16):
            Wmv[c * hid_mv + m] = W[m * 16 + c]
    Ws = np.zeros((sbw, W.shape[1]), np.float32)
    Ws[:hid_s] = W[hid_mv * 16:]
    return Wmv, Ws


def pack_block_params(params, mv_channels, s_channels, cond_mv_channels, cond_s_channels):
    att, cro, mlp = params["attention"], params["crossattention"], params["mlp"]
    H, hm, hs = att["num_heads"], att["hid_mv"], att["hid_s"]
    assert (cro["num_heads"], cro["hid_mv"], cro["hid_s"]) == (H, hm, hs)
    C, S_ch, Cc, Sc_ch = mv_channels, s_channels, cond_mv_channels, cond_s_channels
    bh = np.asarray(mlp["bilinear"]["linear_left"]["w_mv"]).shape[0] // 2
    hid_mv = np.asarray(mlp["bilinear"]["linear_out"]["w_mv"]).shape[0]
    hid_s = np.asarray(mlp["bilinear"]["linear_out"]["w_mvs2s"]).shape[1]

    D, Dc = C * 16 + S_ch, Cc * 16 + Sc_ch
    Dp, Dcp = _round_up(D, 128), _round_up(Dc, 128)
    hwp = _round_up(hm * 16 + hs, 128)
    Wb = 2 * bh * 16
    Wbp = _round_up(Wb, 128)
    mvwp = _round_up(hid_mv * 16, 128)
    sbw = _round_up(max(hid_s, 1), 128)

    # -- self-attention: fused qkv projection (q-scale & k-metric folded), per-head out proj
    w, b = pack_equi_linear(att["in_linear"], C, 3 * H * hm, S_ch, 3 * H * hs)
    w_in, b_in = _relayout_heads_cols(w, b, 3, H, hm, hs, hwp, kinds=("q", "k", "v"))
    w_in = _pad_rows(w_in, Dp)
    w, b = pack_equi_linear(att["out_linear"], H * hm, C, H * hs, S_ch)
    w_ao, b_ao = _split_out_proj_heads(w, H, hm, hs, hwp, Dp), _pad_vec(b, Dp)

    # -- cross-attention: q (scale folded), kv (metric folded on k), per-head out proj
    w, b = pack_equi_linear(cro["q_linear"], C, H * hm, S_ch, H * hs)
    w_q, b_q = _relayout_heads_cols(w, b, 1, H, hm, hs, hwp, kinds=("q",))
    w_q = _pad_rows(w_q, Dp)
    w, b = pack_equi_linear(cro["kv_linear"], Cc, 2 * H * hm, Sc_ch, 2 * H * hs)
    w_kv, b_kv = _relayout_heads_cols(w, b, 2, H, hm, hs, hwp, kinds=("k", "v"))
    w_kv = _pad_rows(w_kv, Dcp)
    w, b = pack_equi_linear(cro["out_linear"], H * hm, C, H * hs, S_ch)
    w_co, b_co = _split_out_proj_heads(w, H, hm, hs, hwp, Dp), _pad_vec(b, Dp)

    # -- geometric MLP: GP/JOIN structure constants folded into left/right projections
    Sb, Mb = _build_bilinear_fold(bh, Wbp)
    wl, bl = pack_equi_linear(mlp["bilinear"]["linear_left"], C, 2 * bh, S_ch, 0)
    wr, br = pack_equi_linear(mlp["bilinear"]["linear_right"], C, 2 * bh, S_ch, 0)
    w_ls, b_ls = _pad_rows(wl @ Sb, Dp), bl @ Sb
    w_rm, b_rm = _pad_rows(wr @ Mb, Dp), br @ Mb
    w, b = pack_equi_linear(mlp["bilinear"]["linear_out"], 2 * bh, hid_mv, S_ch, hid_s)
    w, b_bo = _relayout_bo_cols(w, b, hid_mv, hid_s, mvwp, sbw)
    w_bh = _pad_rows(w[:Wb], Wbp)                      # hb rows (padded to Wbp)
    w_bs = np.zeros((Dp, w.shape[1]), np.float32)      # scalar rows, placed at slab lanes
    w_bs[C * 16:C * 16 + S_ch] = w[Wb:]
    w, b = pack_equi_linear(mlp["linear_out"], hid_mv, C, hid_s, S_ch)
    w_mo_mv, w_mo_s = _relayout_mo_rows(w, hid_mv, hid_s, mvwp, sbw)
    w_mo_mv, w_mo_s = _pad_cols(w_mo_mv, Dp), _pad_cols(w_mo_s, Dp)
    b_mo = _pad_vec(b, Dp)

    def Wf(a):   # matmul weights: bf16 operands (f32 accumulation in the kernel)
        return jnp.asarray(a, dtype=jnp.bfloat16)

    def Bv(a):   # biases stay f32, shaped (1, N) for lane-broadcast add
        return jnp.asarray(a, dtype=jnp.float32).reshape(1, -1)

    packed = dict(w_in=Wf(w_in), b_in=Bv(b_in), w_ao=Wf(w_ao), b_ao=Bv(b_ao),
                  w_q=Wf(w_q), b_q=Bv(b_q), w_kv=Wf(w_kv), b_kv=Bv(b_kv),
                  w_co=Wf(w_co), b_co=Bv(b_co),
                  w_ls=Wf(w_ls), b_ls=Bv(b_ls), w_rm=Wf(w_rm), b_rm=Bv(b_rm),
                  w_bh=Wf(w_bh), w_bs=Wf(w_bs), b_bo=Bv(b_bo),
                  w_mo_mv=Wf(w_mo_mv), w_mo_s=Wf(w_mo_s), b_mo=Bv(b_mo))
    dims = dict(C=C, S=S_ch, Cc=Cc, Sc=Sc_ch, H=H, hwp=hwp, Wbp=Wbp,
                mvwp=mvwp, sbw=sbw, Dp=Dp, Dcp=Dcp)
    return packed, dims


# ----------------------------------------------------------------------------
# The fused Pallas kernel (one pallas_call for the whole block; grid over batch groups)
# ----------------------------------------------------------------------------
def _erf_approx(x):
    # Abramowitz & Stegun 7.1.26 (|err| < 1.5e-7); uses only exp/select/div (Mosaic-safe).
    a1, a2, a3, a4, a5 = 0.254829592, -0.284496736, 1.421413741, -1.453152027, 1.061405429
    pp = 0.3275911
    sgn = jnp.where(x < 0.0, -1.0, 1.0)
    ax = jnp.abs(x)
    t = 1.0 / (1.0 + pp * ax)
    poly = ((((a5 * t + a4) * t + a3) * t + a2) * t + a1) * t
    return sgn * (1.0 - poly * jnp.exp(-ax * ax))


def _gelu(x):
    # TODO(synk): exact-erf GELU approximated with A&S 7.1.26 inside the kernel (<=1.5e-7 err).
    return 0.5 * x * (1.0 + _erf_approx(x * 0.7071067811865476))


def _build_block_kernel(dims):
    C, S = dims["C"], dims["S"]
    Cc, Sc = dims["Cc"], dims["Sc"]
    H, hwp = dims["H"], dims["hwp"]
    Wbp, mvwp, sbw = dims["Wbp"], dims["mvwp"], dims["sbw"]
    T, Tc, bb = dims["T"], dims["Tc"], dims["bb"]
    Dp, Dcp = dims["Dp"], dims["Dcp"]

    def norm(h, n_mv, n_s):
        # Mask-based EquiLayerNorm: no narrow lane slices; pad lanes map to 0.
        lane = jax.lax.broadcasted_iota(jnp.int32, h.shape, h.ndim - 1)
        m_mv = (lane < n_mv * 16).astype(jnp.float32)
        m_s = jnp.logical_and(lane >= n_mv * 16, lane < n_mv * 16 + n_s).astype(jnp.float32)
        hmv = h * m_mv
        msq = jnp.sum(hmv * hmv, axis=-1, keepdims=True) * (1.0 / n_mv)
        hs = h * m_s
        mu = jnp.sum(hs, axis=-1, keepdims=True) * (1.0 / n_s)
        d = (h - mu) * m_s
        var = jnp.sum(d * d, axis=-1, keepdims=True) * (1.0 / n_s)
        return hmv * jax.lax.rsqrt(msq + 0.01) + d * jax.lax.rsqrt(var + 1e-5)

    def mm(a, w_ref, b_ref=None):
        w = w_ref[...]
        out = jnp.dot(a.astype(w.dtype), w, preferred_element_type=jnp.float32)
        if b_ref is not None:
            out = out + b_ref[...]
        return out

    def head_attn(q16, k16, v16):
        # metric factors and 1/sqrt(d) already folded into the projection weights
        logits = jax.lax.dot_general(q16, k16, (((1,), (1,)), ((), ())),
                                     preferred_element_type=jnp.float32)
        m = jnp.max(logits, axis=-1, keepdims=True)
        p = jnp.exp(logits - m)
        p = p * pl.reciprocal(jnp.sum(p, axis=-1, keepdims=True), approx=True)
        return jnp.dot(p.astype(jnp.bfloat16), v16, preferred_element_type=jnp.float32)

    # TODO(synk): for long sequences tile the token axis with an online-softmax (flash) loop;
    # at these shapes one batch group fits comfortably in VMEM.
    def kernel(x_ref, c_ref,
               w_in_ref, b_in_ref, w_ao_ref, b_ao_ref,
               w_q_ref, b_q_ref, w_kv_ref, b_kv_ref, w_co_ref, b_co_ref,
               w_ls_ref, b_ls_ref, w_rm_ref, b_rm_ref,
               w_bh_ref, w_bs_ref, b_bo_ref, w_mv_ref, w_ms_ref, b_mo_ref,
               o_ref):
        x = x_ref[...].reshape(bb * T, Dp)     # f32 residual slab (pad lanes stay 0)
        cond = c_ref[...]                      # (bb, Tc, Dcp) f32

        # ---- LayerNorm -> geometric self-attention -> residual -------------------
        h = norm(x, C, S)
        qkv = mm(h, w_in_ref, b_in_ref).astype(jnp.bfloat16)      # (bb*T, 3*H*hwp)
        deltas = []
        for b0 in range(bb):
            r0 = b0 * T
            acc = jnp.zeros((T, Dp), jnp.float32)
            for hh in range(H):
                q = qkv[r0:r0 + T, (0 * H + hh) * hwp:(0 * H + hh + 1) * hwp]
                k = qkv[r0:r0 + T, (1 * H + hh) * hwp:(1 * H + hh + 1) * hwp]
                v = qkv[r0:r0 + T, (2 * H + hh) * hwp:(2 * H + hh + 1) * hwp]
                o = head_attn(q, k, v)
                acc = acc + jnp.dot(o.astype(jnp.bfloat16), w_ao_ref[hh],
                                    preferred_element_type=jnp.float32)
            deltas.append(acc)
        delta = deltas[0] if bb == 1 else jnp.concatenate(deltas, axis=0)
        x = x + delta + b_ao_ref[...]

        # ---- LayerNorm(x), LayerNorm(cond) -> cross-attention -> residual --------
        h = norm(x, C, S)
        hc = norm(cond, Cc, Sc)                                    # (bb, Tc, Dcp)
        qx = mm(h, w_q_ref, b_q_ref).astype(jnp.bfloat16)          # (bb*T, H*hwp)
        deltas = []
        for b0 in range(bb):
            r0 = b0 * T
            kv = mm(hc[b0], w_kv_ref, b_kv_ref).astype(jnp.bfloat16)   # (Tc, 2*H*hwp)
            acc = jnp.zeros((T, Dp), jnp.float32)
            for hh in range(H):
                q = qx[r0:r0 + T, hh * hwp:(hh + 1) * hwp]
                k = kv[:, (0 * H + hh) * hwp:(0 * H + hh + 1) * hwp]
                v = kv[:, (1 * H + hh) * hwp:(1 * H + hh + 1) * hwp]
                o = head_attn(q, k, v)
                acc = acc + jnp.dot(o.astype(jnp.bfloat16), w_co_ref[hh],
                                    preferred_element_type=jnp.float32)
            deltas.append(acc)
        delta = deltas[0] if bb == 1 else jnp.concatenate(deltas, axis=0)
        x = x + delta + b_co_ref[...]

        # ---- LayerNorm -> geometric MLP (GP/JOIN bilinear, gated GELU, linear) ---
        h = norm(x, C, S)
        h16 = h.astype(jnp.bfloat16)
        ls = mm(h16, w_ls_ref, b_ls_ref)        # (bb*T, 16*Wbp)  left, replicated per comp
        rm = mm(h16, w_rm_ref, b_rm_ref)        # (bb*T, 16*Wbp)  right, GP/JOIN-contracted
        hb = ls[:, 0:Wbp] * rm[:, 0:Wbp]
        for i in range(1, 16):
            hb = hb + ls[:, i * Wbp:(i + 1) * Wbp] * rm[:, i * Wbp:(i + 1) * Wbp]
        mid = (jnp.dot(hb.astype(jnp.bfloat16), w_bh_ref[...],
                       preferred_element_type=jnp.float32)
               + jnp.dot(h16, w_bs_ref[...], preferred_element_type=jnp.float32)
               + b_bo_ref[...])                 # [comp-major mv | scalars | comp-0 bcast]
        gate = _gelu(mid[:, mvwp + sbw:])       # dense gelu of the pre-broadcast gate block
        gated = gate * mid[:, 0:mvwp]
        s_act = _gelu(mid[:, mvwp:mvwp + sbw])
        out = (jnp.dot(gated.astype(jnp.bfloat16), w_mv_ref[...],
                       preferred_element_type=jnp.float32)
               + jnp.dot(s_act.astype(jnp.bfloat16), w_ms_ref[...],
                         preferred_element_type=jnp.float32)
               + b_mo_ref[...])
        x = x + out
        o_ref[...] = x.reshape(bb, T, Dp)

    return kernel


_WEIGHT_ORDER = ("w_in", "b_in", "w_ao", "b_ao", "w_q", "b_q", "w_kv", "b_kv",
                 "w_co", "b_co", "w_ls", "b_ls", "w_rm", "b_rm",
                 "w_bh", "w_bs", "b_bo", "w_mo_mv", "w_mo_s", "b_mo")


def conditional_lgatr_block(packed, dims, multivectors, multivectors_condition,
                            scalars, scalars_condition, batch_block=None):
    # TODO(synk): optional attention-bias masks (attn_kwargs / crossattn_kwargs) unsupported.
    B, T, C, _ = multivectors.shape
    Tc, Cc = multivectors_condition.shape[1], multivectors_condition.shape[2]
    S_ch, Sc_ch = scalars.shape[-1], scalars_condition.shape[-1]
    D, Dc = C * 16 + S_ch, Cc * 16 + Sc_ch
    Dp, Dcp = dims["Dp"], dims["Dcp"]
    bb = B if batch_block is None else batch_block
    assert B % bb == 0

    # Pack (mv, s) into one lane-dense (128-padded) token-major slab per stream.
    x = jnp.concatenate([multivectors.reshape(B, T, C * 16).astype(jnp.float32),
                         scalars.astype(jnp.float32),
                         jnp.zeros((B, T, Dp - D), jnp.float32)], axis=-1)
    cond = jnp.concatenate([multivectors_condition.reshape(B, Tc, Cc * 16).astype(jnp.float32),
                            scalars_condition.astype(jnp.float32),
                            jnp.zeros((B, Tc, Dcp - Dc), jnp.float32)], axis=-1)

    kdims = dict(dims, T=T, Tc=Tc, bb=bb)
    kernel = _build_block_kernel(kdims)
    ws = [packed[n] for n in _WEIGHT_ORDER]
    w_specs = [pl.BlockSpec(w.shape, lambda g, _nd=w.ndim: (0,) * _nd) for w in ws]

    out = pl.pallas_call(
        kernel,
        out_shape=jax.ShapeDtypeStruct((B, T, Dp), jnp.float32),
        grid=(B // bb,),
        in_specs=[pl.BlockSpec((bb, T, Dp), lambda g: (g, 0, 0)),
                  pl.BlockSpec((bb, Tc, Dcp), lambda g: (g, 0, 0))] + w_specs,
        out_specs=pl.BlockSpec((bb, T, Dp), lambda g: (g, 0, 0)),
        compiler_params=pltpu.CompilerParams(dimension_semantics=("parallel",)),
    )(x, cond, *ws)

    return out[..., :C * 16].reshape(B, T, C, 16), out[..., C * 16:C * 16 + S_ch]


# ----------------------------------------------------------------------------
# Deterministic synthetic parameter init (same structure as the PyTorch module)
# ----------------------------------------------------------------------------
def init_equi_linear(key, in_mv, out_mv, in_s=None, out_s=None, small=False):
    k0, k1, k2, k3 = jax.random.split(key, 4)
    mv_scale = 0.02 if small else 1.0 / np.sqrt(5.0 * in_mv)
    p = {"w_mv": mv_scale * jax.random.normal(k0, (out_mv, in_mv, 5), jnp.float32),
         "b_mv": jnp.zeros((out_mv,), jnp.float32)}
    if in_s is not None:
        p["w_s2mv"] = (0.02 if small else 1.0 / np.sqrt(in_s)) * \
            jax.random.normal(k1, (in_s, out_mv), jnp.float32)
    if out_s is not None:
        p["w_mvs2s"] = (0.02 if small else 1.0 / np.sqrt(in_mv)) * \
            jax.random.normal(k2, (in_mv, out_s), jnp.float32)
        p["b_s"] = jnp.zeros((out_s,), jnp.float32)
        if in_s is not None:
            p["w_s2s"] = (0.02 if small else 1.0 / np.sqrt(in_s)) * \
                jax.random.normal(k3, (in_s, out_s), jnp.float32)
    return p


def init_block_params(key, mv_channels, s_channels, cond_mv_channels, cond_s_channels,
                      num_heads=2, hid_mv=2, hid_s=4):
    ks = jax.random.split(key, 9)
    attention = {
        "num_heads": num_heads, "hid_mv": hid_mv, "hid_s": hid_s,
        "in_linear": init_equi_linear(ks[0], mv_channels, 3 * num_heads * hid_mv,
                                      s_channels, 3 * num_heads * hid_s),
        "out_linear": init_equi_linear(ks[1], num_heads * hid_mv, mv_channels,
                                       num_heads * hid_s, s_channels, small=True),
    }
    crossattention = {
        "num_heads": num_heads, "hid_mv": hid_mv, "hid_s": hid_s,
        "q_linear": init_equi_linear(ks[2], mv_channels, num_heads * hid_mv,
                                     s_channels, num_heads * hid_s),
        "kv_linear": init_equi_linear(ks[3], cond_mv_channels, 2 * num_heads * hid_mv,
                                      cond_s_channels, 2 * num_heads * hid_s),
        "out_linear": init_equi_linear(ks[4], num_heads * hid_mv, mv_channels,
                                       num_heads * hid_s, s_channels, small=True),
    }
    hidden_mv, hidden_s = 2 * mv_channels, 2 * s_channels          # mlp channels (c, 2c, c)
    bil_hidden = hidden_mv // 2
    mlp = {
        "bilinear": {
            "linear_left": init_equi_linear(ks[5], mv_channels, 2 * bil_hidden, s_channels, None),
            "linear_right": init_equi_linear(ks[6], mv_channels, 2 * bil_hidden, s_channels, None),
            "linear_out": init_equi_linear(ks[7], 2 * bil_hidden, hidden_mv, s_channels, hidden_s),
        },
        "linear_out": init_equi_linear(ks[8], hidden_mv, mv_channels, hidden_s, s_channels,
                                       small=True),
    }
    return {"attention": attention, "crossattention": crossattention, "mlp": mlp}


# ----------------------------------------------------------------------------
# Pure-JAX f32 reference (original unpacked formulation) for validation
# ----------------------------------------------------------------------------
def _ref_norm(mv, s):
    sq = jnp.mean(jnp.sum(mv * mv, axis=-1), axis=-1, keepdims=True)
    mv_n = mv / jnp.sqrt(sq + 0.01)[..., None]
    mu = jnp.mean(s, axis=-1, keepdims=True)
    var = jnp.mean((s - mu) ** 2, axis=-1, keepdims=True)
    return mv_n, (s - mu) / jnp.sqrt(var + 1e-5)


def _ref_equi_linear(p, mv, s):
    w16 = p["w_mv"][:, :, GRADE_IDX]
    out_mv = jnp.einsum('...ic,oic->...oc', mv, w16)
    comp0 = out_mv[..., 0] + p["b_mv"]
    if "w_s2mv" in p:
        comp0 = comp0 + s @ p["w_s2mv"]
    out_mv = out_mv.at[..., 0].set(comp0)
    out_s = None
    if "w_mvs2s" in p:
        out_s = mv[..., 0] @ p["w_mvs2s"] + p["b_s"]
        if "w_s2s" in p:
            out_s = out_s + s @ p["w_s2s"]
    return out_mv, out_s


def _ref_attention(q_mv, k_mv, v_mv, q_s, k_s, v_s):
    fac = jnp.asarray(IP_FACTORS)
    hm = q_mv.shape[-2]
    d = hm * 16 + q_s.shape[-1]

    def flat(mv, sc):
        return jnp.concatenate([mv.reshape(mv.shape[:3] + (-1,)), sc], axis=-1)

    q, k, v = flat(q_mv, q_s), flat(k_mv * fac, k_s), flat(v_mv, v_s)
    logits = jnp.einsum('bqhd,bkhd->bhqk', q, k) / np.sqrt(d)
    p = jax.nn.softmax(logits, axis=-1)
    o = jnp.einsum('bhqk,bkhd->bqhd', p, v)
    return o[..., :hm * 16].reshape(o.shape[:3] + (hm, 16)), o[..., hm * 16:]


def _ref_self_attention(p, mv, s):
    B, T = mv.shape[:2]
    H, hm, hs = p["num_heads"], p["hid_mv"], p["hid_s"]
    qkv_mv, qkv_s = _ref_equi_linear(p["in_linear"], mv, s)
    qkv_mv = qkv_mv.reshape(B, T, 3, H, hm, 16)
    qkv_s = qkv_s.reshape(B, T, 3, H, hs)
    o_mv, o_s = _ref_attention(qkv_mv[:, :, 0], qkv_mv[:, :, 1], qkv_mv[:, :, 2],
                               qkv_s[:, :, 0], qkv_s[:, :, 1], qkv_s[:, :, 2])
    return _ref_equi_linear(p["out_linear"], o_mv.reshape(B, T, H * hm, 16),
                            o_s.reshape(B, T, H * hs))


def _ref_cross_attention(p, mv_q, s_q, mv_kv, s_kv):
    B, Tq = mv_q.shape[:2]
    Tk = mv_kv.shape[1]
    H, hm, hs = p["num_heads"], p["hid_mv"], p["hid_s"]
    q_mv, q_s = _ref_equi_linear(p["q_linear"], mv_q, s_q)
    kv_mv, kv_s = _ref_equi_linear(p["kv_linear"], mv_kv, s_kv)
    q_mv = q_mv.reshape(B, Tq, H, hm, 16)
    q_s = q_s.reshape(B, Tq, H, hs)
    kv_mv = kv_mv.reshape(B, Tk, 2, H, hm, 16)
    kv_s = kv_s.reshape(B, Tk, 2, H, hs)
    o_mv, o_s = _ref_attention(q_mv, kv_mv[:, :, 0], kv_mv[:, :, 1],
                               q_s, kv_s[:, :, 0], kv_s[:, :, 1])
    return _ref_equi_linear(p["out_linear"], o_mv.reshape(B, Tq, H * hm, 16),
                            o_s.reshape(B, Tq, H * hs))


def _ref_geo_mlp(p, mv, s):
    pb = p["bilinear"]
    left, _ = _ref_equi_linear(pb["linear_left"], mv, s)
    right, _ = _ref_equi_linear(pb["linear_right"], mv, s)
    hid = left.shape[-2] // 2
    gp = jnp.einsum('...ci,...cj,ijk->...ck', left[..., :hid, :], right[..., :hid, :], GP_TABLE)
    jn = jnp.einsum('...ci,...cj,ijk->...ck', left[..., hid:, :], right[..., hid:, :], JOIN_TABLE)
    h_mv, h_s = _ref_equi_linear(pb["linear_out"], jnp.concatenate([gp, jn], axis=-2), s)
    h_mv = jax.nn.gelu(h_mv[..., 0:1], approximate=False) * h_mv
    h_s = jax.nn.gelu(h_s, approximate=False)
    return _ref_equi_linear(p["linear_out"], h_mv, h_s)


def _ref_block(params, mv, mv_c, s, s_c):
    h_mv, h_s = _ref_norm(mv, s)
    h_mv, h_s = _ref_self_attention(params["attention"], h_mv, h_s)
    mv = mv + h_mv
    s = s + h_s
    h_mv, h_s = _ref_norm(mv, s)
    c_mv, c_s = _ref_norm(mv_c, s_c)
    h_mv, h_s = _ref_cross_attention(params["crossattention"], h_mv, h_s, c_mv, c_s)
    out_mv = mv + h_mv
    out_s = s + h_s
    h_mv, h_s = _ref_norm(out_mv, out_s)
    h_mv, h_s = _ref_geo_mlp(params["mlp"], h_mv, h_s)
    return out_mv + h_mv, out_s + h_s


if __name__ == "__main__":
    key = jax.random.PRNGKey(0)
    kp, kx, ksx, kcx, kcs = jax.random.split(key, 5)

    batch, items, cond_items = 2, 8, 6
    mv_channels, s_channels = 4, 4
    cond_mv_channels, cond_s_channels = 4, 4

    multivectors = jax.random.normal(kx, (batch, items, mv_channels, 16), jnp.float32)
    scalars = jax.random.normal(ksx, (batch, items, s_channels), jnp.float32)
    multivectors_condition = jax.random.normal(
        kcx, (batch, cond_items, cond_mv_channels, 16), jnp.float32)
    scalars_condition = jax.random.normal(
        kcs, (batch, cond_items, cond_s_channels), jnp.float32)

    params = init_block_params(kp, mv_channels, s_channels, cond_mv_channels, cond_s_channels)
    packed, dims = pack_block_params(params, mv_channels, s_channels,
                                     cond_mv_channels, cond_s_channels)

    fwd = jax.jit(lambda mv, mv_c, s, s_c: conditional_lgatr_block(packed, dims,
                                                                   mv, mv_c, s, s_c))
    out_mv, out_s = fwd(multivectors, multivectors_condition, scalars, scalars_condition)
    jax.block_until_ready((out_mv, out_s))

    assert out_mv.shape == multivectors.shape
    assert out_s.shape == scalars.shape
    assert bool(jnp.all(jnp.isfinite(out_mv))) and bool(jnp.all(jnp.isfinite(out_s)))

    # Validate the fused bf16 kernel against the unpacked f32 reference.
    ref_mv, ref_s = _ref_block(params, multivectors, multivectors_condition,
                               scalars, scalars_condition)
    np.testing.assert_allclose(np.asarray(out_mv), np.asarray(ref_mv), rtol=5e-2, atol=5e-2)
    np.testing.assert_allclose(np.asarray(out_s), np.asarray(ref_s), rtol=5e-2, atol=5e-2)

    print("KERNEL_OK")
</pallas_src>

<mosaic_0001>
module attributes {stable_mosaic.version = 11 : i64} {
  func.func @kernel(%arg0: i32, %arg1: memref<2x8x128xf32, #tpu.memory_space<vmem>>, %arg2: memref<2x6x128xf32, #tpu.memory_space<vmem>>, %arg3: memref<128x768xbf16, #tpu.memory_space<vmem>>, %arg4: memref<1x768xf32, #tpu.memory_space<vmem>>, %arg5: memref<2x128x128xbf16, #tpu.memory_space<vmem>>, %arg6: memref<1x128xf32, #tpu.memory_space<vmem>>, %arg7: memref<128x256xbf16, #tpu.memory_space<vmem>>, %arg8: memref<1x256xf32, #tpu.memory_space<vmem>>, %arg9: memref<128x512xbf16, #tpu.memory_space<vmem>>, %arg10: memref<1x512xf32, #tpu.memory_space<vmem>>, %arg11: memref<2x128x128xbf16, #tpu.memory_space<vmem>>, %arg12: memref<1x128xf32, #tpu.memory_space<vmem>>, %arg13: memref<128x2048xbf16, #tpu.memory_space<vmem>>, %arg14: memref<1x2048xf32, #tpu.memory_space<vmem>>, %arg15: memref<128x2048xbf16, #tpu.memory_space<vmem>>, %arg16: memref<1x2048xf32, #tpu.memory_space<vmem>>, %arg17: memref<128x384xbf16, #tpu.memory_space<vmem>>, %arg18: memref<128x384xbf16, #tpu.memory_space<vmem>>, %arg19: memref<1x384xf32, #tpu.memory_space<vmem>>, %arg20: memref<128x128xbf16, #tpu.memory_space<vmem>>, %arg21: memref<128x128xbf16, #tpu.memory_space<vmem>>, %arg22: memref<1x128xf32, #tpu.memory_space<vmem>>, %arg23: memref<2x8x128xf32, #tpu.memory_space<vmem>>) attributes {dimension_semantics = [#tpu.dimension_semantics<parallel>], iteration_bounds = array<i64: 1>, scalar_prefetch = 0 : i64, scratch_operands = 0 : i64, tpu.core_type = #tpu.core_type<tc>, window_params = [{transform_indices = @transform_0, window_bounds = array<i64: 2, 8, 128>}, {transform_indices = @transform_1, window_bounds = array<i64: 2, 6, 128>}, {pipeline_mode = #tpu.pipeline_mode<synchronous>, transform_indices = @transform_2, window_bounds = array<i64: 128, 768>}, {pipeline_mode = #tpu.pipeline_mode<synchronous>, transform_indices = @transform_3, window_bounds = array<i64: 1, 768>}, {pipeline_mode = #tpu.pipeline_mode<synchronous>, transform_indices = @transform_4, window_bounds = array<i64: 2, 128, 128>}, {pipeline_mode = #tpu.pipeline_mode<synchronous>, transform_indices = @transform_5, window_bounds = array<i64: 1, 128>}, {pipeline_mode = #tpu.pipeline_mode<synchronous>, transform_indices = @transform_6, window_bounds = array<i64: 128, 256>}, {pipeline_mode = #tpu.pipeline_mode<synchronous>, transform_indices = @transform_7, window_bounds = array<i64: 1, 256>}, {pipeline_mode = #tpu.pipeline_mode<synchronous>, transform_indices = @transform_8, window_bounds = array<i64: 128, 512>}, {pipeline_mode = #tpu.pipeline_mode<synchronous>, transform_indices = @transform_9, window_bounds = array<i64: 1, 512>}, {pipeline_mode = #tpu.pipeline_mode<synchronous>, transform_indices = @transform_10, window_bounds = array<i64: 2, 128, 128>}, {pipeline_mode = #tpu.pipeline_mode<synchronous>, transform_indices = @transform_11, window_bounds = array<i64: 1, 128>}, {pipeline_mode = #tpu.pipeline_mode<synchronous>, transform_indices = @transform_12, window_bounds = array<i64: 128, 2048>}, {pipeline_mode = #tpu.pipeline_mode<synchronous>, transform_indices = @transform_13, window_bounds = array<i64: 1, 2048>}, {pipeline_mode = #tpu.pipeline_mode<synchronous>, transform_indices = @transform_14, window_bounds = array<i64: 128, 2048>}, {pipeline_mode = #tpu.pipeline_mode<synchronous>, transform_indices = @transform_15, window_bounds = array<i64: 1, 2048>}, {pipeline_mode = #tpu.pipeline_mode<synchronous>, transform_indices = @transform_16, window_bounds = array<i64: 128, 384>}, {pipeline_mode = #tpu.pipeline_mode<synchronous>, transform_indices = @transform_17, window_bounds = array<i64: 128, 384>}, {pipeline_mode = #tpu.pipeline_mode<synchronous>, transform_indices = @transform_18, window_bounds = array<i64: 1, 384>}, {pipeline_mode = #tpu.pipeline_mode<synchronous>, transform_indices = @transform_19, window_bounds = array<i64: 128, 128>}, {pipeline_mode = #tpu.pipeline_mode<synchronous>, transform_indices = @transform_20, window_bounds = array<i64: 128, 128>}, {pipeline_mode = #tpu.pipeline_mode<synchronous>, transform_indices = @transform_21, window_bounds = array<i64: 1, 128>}, {transform_indices = @transform_22, window_bounds = array<i64: 2, 8, 128>}]} {
    %c0 = arith.constant 0 : index
    %c0_0 = arith.constant 0 : index
    %c0_1 = arith.constant 0 : index
    %0 = vector.load %arg1[%c0, %c0_0, %c0_1] : memref<2x8x128xf32, #tpu.memory_space<vmem>>, vector<2x8x128xf32>
    %1 = vector.shape_cast %0 : vector<2x8x128xf32> to vector<16x128xf32>
    %c0_2 = arith.constant 0 : index
    %c0_3 = arith.constant 0 : index
    %c0_4 = arith.constant 0 : index
    %2 = vector.load %arg2[%c0_2, %c0_3, %c0_4] : memref<2x6x128xf32, #tpu.memory_space<vmem>>, vector<2x6x128xf32>
    %3 = tpu.iota {dimensions = array<i32: 1>} : vector<16x128xi32>
    %c64_i32 = arith.constant 64 : i32
    %4 = vector.broadcast %c64_i32 : i32 to vector<16x128xi32>
    %5 = arith.cmpi slt, %3, %4 : vector<16x128xi32>
    %6 = arith.extui %5 : vector<16x128xi1> to vector<16x128xi32>
    %7 = arith.sitofp %6 : vector<16x128xi32> to vector<16x128xf32>
    %c64_i32_5 = arith.constant 64 : i32
    %8 = vector.broadcast %c64_i32_5 : i32 to vector<16x128xi32>
    %9 = arith.cmpi sge, %3, %8 : vector<16x128xi32>
    %c68_i32 = arith.constant 68 : i32
    %10 = vector.broadcast %c68_i32 : i32 to vector<16x128xi32>
    %11 = arith.cmpi slt, %3, %10 : vector<16x128xi32>
    %12 = arith.andi %9, %11 : vector<16x128xi1>
    %13 = arith.extui %12 : vector<16x128xi1> to vector<16x128xi32>
    %14 = arith.sitofp %13 : vector<16x128xi32> to vector<16x128xf32>
    %15 = arith.mulf %1, %7 : vector<16x128xf32>
    %16 = arith.mulf %15, %15 : vector<16x128xf32>
    %cst = arith.constant dense<0.000000e+00> : vector<16xf32>
    %17 = vector.multi_reduction <add>, %16, %cst [1] : vector<16x128xf32> to vector<16xf32>
    %18 = vector.shape_cast %17 : vector<16xf32> to vector<16x1xf32>
    %cst_6 = arith.constant 2.500000e-01 : f32
    %19 = vector.broadcast %cst_6 : f32 to vector<16x1xf32>
    %20 = arith.mulf %18, %19 : vector<16x1xf32>
    %21 = arith.mulf %1, %14 : vector<16x128xf32>
    %cst_7 = arith.constant dense<0.000000e+00> : vector<16xf32>
    %22 = vector.multi_reduction <add>, %21, %cst_7 [1] : vector<16x128xf32> to vector<16xf32>
    %23 = vector.shape_cast %22 : vector<16xf32> to vector<16x1xf32>
    %cst_8 = arith.constant 2.500000e-01 : f32
    %24 = vector.broadcast %cst_8 : f32 to vector<16x1xf32>
    %25 = arith.mulf %23, %24 : vector<16x1xf32>
    %26 = vector.broadcast %25 : vector<16x1xf32> to vector<16x128xf32>
    %27 = arith.subf %1, %26 : vector<16x128xf32>
    %28 = arith.mulf %27, %14 : vector<16x128xf32>
    %29 = arith.mulf %28, %28 : vector<16x128xf32>
    %cst_9 = arith.constant dense<0.000000e+00> : vector<16xf32>
    %30 = vector.multi_reduction <add>, %29, %cst_9 [1] : vector<16x128xf32> to vector<16xf32>
    %31 = vector.shape_cast %30 : vector<16xf32> to vector<16x1xf32>
    %cst_10 = arith.constant 2.500000e-01 : f32
    %32 = vector.broadcast %cst_10 : f32 to vector<16x1xf32>
    %33 = arith.mulf %31, %32 : vector<16x1xf32>
    %cst_11 = arith.constant 0.00999999977 : f32
    %34 = vector.broadcast %cst_11 : f32 to vector<16x1xf32>
    %35 = arith.addf %20, %34 : vector<16x1xf32>
    %36 = math.rsqrt %35 : vector<16x1xf32>
    %37 = vector.broadcast %36 : vector<16x1xf32> to vector<16x128xf32>
    %38 = arith.mulf %15, %37 : vector<16x128xf32>
    %cst_12 = arith.constant 9.99999974E-6 : f32
    %39 = vector.broadcast %cst_12 : f32 to vector<16x1xf32>
    %40 = arith.addf %33, %39 : vector<16x1xf32>
    %41 = math.rsqrt %40 : vector<16x1xf32>
    %42 = vector.broadcast %41 : vector<16x1xf32> to vector<16x128xf32>
    %43 = arith.mulf %28, %42 : vector<16x128xf32>
    %44 = arith.addf %38, %43 : vector<16x128xf32>
    %c0_13 = arith.constant 0 : index
    %c0_14 = arith.constant 0 : index
    %45 = vector.load %arg3[%c0_13, %c0_14] : memref<128x768xbf16, #tpu.memory_space<vmem>>, vector<128x768xbf16>
    %46 = arith.truncf %44 : vector<16x128xf32> to vector<16x128xbf16>
    %cst_15 = arith.constant dense<0.000000e+00> : vector<16x768xf32>
    %47 = tpu.matmul %46, %45, %cst_15 {dimension_numbers = #tpu.dot_dimension_numbers<[1], [0], [0], [1], [0, 0, 1, 1], [], []>} : vector<16x128xbf16>, vector<128x768xbf16>, vector<16x768xf32> -> vector<16x768xf32>
    %c0_16 = arith.constant 0 : index
    %c0_17 = arith.constant 0 : index
    %48 = vector.load %arg4[%c0_16, %c0_17] : memref<1x768xf32, #tpu.memory_space<vmem>>, vector<1x768xf32>
    %49 = vector.broadcast %48 : vector<1x768xf32> to vector<16x768xf32>
    %50 = arith.addf %47, %49 : vector<16x768xf32>
    %51 = arith.truncf %50 : vector<16x768xf32> to vector<16x768xbf16>
    %cst_18 = arith.constant 0.000000e+00 : f32
    %52 = vector.broadcast %cst_18 : f32 to vector<8x128xf32>
    %53 = vector.extract_strided_slice %51 {offsets = [0, 0], sizes = [8, 128], strides = [1, 1]} : vector<16x768xbf16> to vector<8x128xbf16>
    %54 = vector.extract_strided_slice %51 {offsets = [0, 256], sizes = [8, 128], strides = [1, 1]} : vector<16x768xbf16> to vector<8x128xbf16>
    %55 = vector.extract_strided_slice %51 {offsets = [0, 512], sizes = [8, 128], strides = [1, 1]} : vector<16x768xbf16> to vector<8x128xbf16>
    %cst_19 = arith.constant dense<0.000000e+00> : vector<8x8xf32>
    %56 = tpu.matmul %53, %54, %cst_19 {dimension_numbers = #tpu.dot_dimension_numbers<[1], [1], [0], [0], [0, 0, 1, 0], [], []>} : vector<8x128xbf16>, vector<8x128xbf16>, vector<8x8xf32> -> vector<8x8xf32>
    %cst_20 = arith.constant dense<0xFF800000> : vector<8xf32>
    %57 = vector.multi_reduction <maximumf>, %56, %cst_20 [1] : vector<8x8xf32> to vector<8xf32>
    %58 = vector.shape_cast %57 : vector<8xf32> to vector<8x1xf32>
    %59 = vector.broadcast %58 : vector<8x1xf32> to vector<8x8xf32>
    %60 = arith.subf %56, %59 : vector<8x8xf32>
    %61 = math.exp %60 : vector<8x8xf32>
    %cst_21 = arith.constant dense<0.000000e+00> : vector<8xf32>
    %62 = vector.multi_reduction <add>, %61, %cst_21 [1] : vector<8x8xf32> to vector<8xf32>
    %63 = vector.shape_cast %62 : vector<8xf32> to vector<8x1xf32>
    %64 = tpu.reciprocal %63 {approx = true} : vector<8x1xf32> -> vector<8x1xf32>
    %65 = vector.broadcast %64 : vector<8x1xf32> to vector<8x8xf32>
    %66 = arith.mulf %61, %65 : vector<8x8xf32>
    %67 = arith.truncf %66 : vector<8x8xf32> to vector<8x8xbf16>
    %cst_22 = arith.constant dense<0.000000e+00> : vector<8x128xf32>
    %68 = tpu.matmul %67, %55, %cst_22 {dimension_numbers = #tpu.dot_dimension_numbers<[1], [0], [0], [1], [0, 0, 1, 1], [], []>} : vector<8x8xbf16>, vector<8x128xbf16>, vector<8x128xf32> -> vector<8x128xf32>
    %69 = arith.truncf %68 : vector<8x128xf32> to vector<8x128xbf16>
    %c0_23 = arith.constant 0 : index
    %c0_24 = arith.constant 0 : index
    %c0_25 = arith.constant 0 : index
    %70 = vector.load %arg5[%c0_23, %c0_24, %c0_25] : memref<2x128x128xbf16, #tpu.memory_space<vmem>>, vector<1x128x128xbf16>
    %71 = vector.shape_cast %70 : vector<1x128x128xbf16> to vector<128x128xbf16>
    %cst_26 = arith.constant dense<0.000000e+00> : vector<8x128xf32>
    %72 = tpu.matmul %69, %71, %cst_26 {dimension_numbers = #tpu.dot_dimension_numbers<[1], [0], [0], [1], [0, 0, 1, 1], [], []>} : vector<8x128xbf16>, vector<128x128xbf16>, vector<8x128xf32> -> vector<8x128xf32>
    %73 = arith.addf %52, %72 : vector<8x128xf32>
    %74 = vector.extract_strided_slice %51 {offsets = [0, 128], sizes = [8, 128], strides = [1, 1]} : vector<16x768xbf16> to vector<8x128xbf16>
    %75 = vector.extract_strided_slice %51 {offsets = [0, 384], sizes = [8, 128], strides = [1, 1]} : vector<16x768xbf16> to vector<8x128xbf16>
    %76 = vector.extract_strided_slice %51 {offsets = [0, 640], sizes = [8, 128], strides = [1, 1]} : vector<16x768xbf16> to vector<8x128xbf16>
    %cst_27 = arith.constant dense<0.000000e+00> : vector<8x8xf32>
    %77 = tpu.matmul %74, %75, %cst_27 {dimension_numbers = #tpu.dot_dimension_numbers<[1], [1], [0], [0], [0, 0, 1, 0], [], []>} : vector<8x128xbf16>, vector<8x128xbf16>, vector<8x8xf32> -> vector<8x8xf32>
    %cst_28 = arith.constant dense<0xFF800000> : vector<8xf32>
    %78 = vector.multi_reduction <maximumf>, %77, %cst_28 [1] : vector<8x8xf32> to vector<8xf32>
    %79 = vector.shape_cast %78 : vector<8xf32> to vector<8x1xf32>
    %80 = vector.broadcast %79 : vector<8x1xf32> to vector<8x8xf32>
    %81 = arith.subf %77, %80 : vector<8x8xf32>
    %82 = math.exp %81 : vector<8x8xf32>
    %cst_29 = arith.constant dense<0.000000e+00> : vector<8xf32>
    %83 = vector.multi_reduction <add>, %82, %cst_29 [1] : vector<8x8xf32> to vector<8xf32>
    %84 = vector.shape_cast %83 : vector<8xf32> to vector<8x1xf32>
    %85 = tpu.reciprocal %84 {approx = true} : vector<8x1xf32> -> vector<8x1xf32>
    %86 = vector.broadcast %85 : vector<8x1xf32> to vector<8x8xf32>
    %87 = arith.mulf %82, %86 : vector<8x8xf32>
    %88 = arith.truncf %87 : vector<8x8xf32> to vector<8x8xbf16>
    %cst_30 = arith.constant dense<0.000000e+00> : vector<8x128xf32>
    %89 = tpu.matmul %88, %76, %cst_30 {dimension_numbers = #tpu.dot_dimension_numbers<[1], [0], [0], [1], [0, 0, 1, 1], [], []>} : vector<8x8xbf16>, vector<8x128xbf16>, vector<8x128xf32> -> vector<8x128xf32>
    %90 = arith.truncf %89 : vector<8x128xf32> to vector<8x128xbf16>
    %c1 = arith.constant 1 : index
    %c0_31 = arith.constant 0 : index
    %c0_32 = arith.constant 0 : index
    %91 = vector.load %arg5[%c1, %c0_31, %c0_32] : memref<2x128x128xbf16, #tpu.memory_space<vmem>>, vector<1x128x128xbf16>
    %92 = vector.shape_cast %91 : vector<1x128x128xbf16> to vector<128x128xbf16>
    %cst_33 = arith.constant dense<0.000000e+00> : vector<8x128xf32>
    %93 = tpu.matmul %90, %92, %cst_33 {dimension_numbers = #tpu.dot_dimension_numbers<[1], [0], [0], [1], [0, 0, 1, 1], [], []>} : vector<8x128xbf16>, vector<128x128xbf16>, vector<8x128xf32> -> vector<8x128xf32>
    %94 = arith.addf %73, %93 : vector<8x128xf32>
    %cst_34 = arith.constant 0.000000e+00 : f32
    %95 = vector.broadcast %cst_34 : f32 to vector<8x128xf32>
    %96 = vector.extract_strided_slice %51 {offsets = [8, 0], sizes = [8, 128], strides = [1, 1]} : vector<16x768xbf16> to vector<8x128xbf16>
    %97 = vector.extract_strided_slice %51 {offsets = [8, 256], sizes = [8, 128], strides = [1, 1]} : vector<16x768xbf16> to vector<8x128xbf16>
    %98 = vector.extract_strided_slice %51 {offsets = [8, 512], sizes = [8, 128], strides = [1, 1]} : vector<16x768xbf16> to vector<8x128xbf16>
    %cst_35 = arith.constant dense<0.000000e+00> : vector<8x8xf32>
    %99 = tpu.matmul %96, %97, %cst_35 {dimension_numbers = #tpu.dot_dimension_numbers<[1], [1], [0], [0], [0, 0, 1, 0], [], []>} : vector<8x128xbf16>, vector<8x128xbf16>, vector<8x8xf32> -> vector<8x8xf32>
    %cst_36 = arith.constant dense<0xFF800000> : vector<8xf32>
    %100 = vector.multi_reduction <maximumf>, %99, %cst_36 [1] : vector<8x8xf32> to vector<8xf32>
    %101 = vector.shape_cast %100 : vector<8xf32> to vector<8x1xf32>
    %102 = vector.broadcast %101 : vector<8x1xf32> to vector<8x8xf32>
    %103 = arith.subf %99, %102 : vector<8x8xf32>
    %104 = math.exp %103 : vector<8x8xf32>
    %cst_37 = arith.constant dense<0.000000e+00> : vector<8xf32>
    %105 = vector.multi_reduction <add>, %104, %cst_37 [1] : vector<8x8xf32> to vector<8xf32>
    %106 = vector.shape_cast %105 : vector<8xf32> to vector<8x1xf32>
    %107 = tpu.reciprocal %106 {approx = true} : vector<8x1xf32> -> vector<8x1xf32>
    %108 = vector.broadcast %107 : vector<8x1xf32> to vector<8x8xf32>
    %109 = arith.mulf %104, %108 : vector<8x8xf32>
    %110 = arith.truncf %109 : vector<8x8xf32> to vector<8x8xbf16>
    %cst_38 = arith.constant dense<0.000000e+00> : vector<8x128xf32>
    %111 = tpu.matmul %110, %98, %cst_38 {dimension_numbers = #tpu.dot_dimension_numbers<[1], [0], [0], [1], [0, 0, 1, 1], [], []>} : vector<8x8xbf16>, vector<8x128xbf16>, vector<8x128xf32> -> vector<8x128xf32>
    %112 = arith.truncf %111 : vector<8x128xf32> to vector<8x128xbf16>
    %c0_39 = arith.constant 0 : index
    %c0_40 = arith.constant 0 : index
    %c0_41 = arith.constant 0 : index
    %113 = vector.load %arg5[%c0_39, %c0_40, %c0_41] : memref<2x128x128xbf16, #tpu.memory_space<vmem>>, vector<1x128x128xbf16>
    %114 = vector.shape_cast %113 : vector<1x128x128xbf16> to vector<128x128xbf16>
    %cst_42 = arith.constant dense<0.000000e+00> : vector<8x128xf32>
    %115 = tpu.matmul %112, %114, %cst_42 {dimension_numbers = #tpu.dot_dimension_numbers<[1], [0], [0], [1], [0, 0, 1, 1], [], []>} : vector<8x128xbf16>, vector<128x128xbf16>, vector<8x128xf32> -> vector<8x128xf32>
    %116 = arith.addf %95, %115 : vector<8x128xf32>
    %117 = vector.extract_strided_slice %51 {offsets = [8, 128], sizes = [8, 128], strides = [1, 1]} : vector<16x768xbf16> to vector<8x128xbf16>
    %118 = vector.extract_strided_slice %51 {offsets = [8, 384], sizes = [8, 128], strides = [1, 1]} : vector<16x768xbf16> to vector<8x128xbf16>
    %119 = vector.extract_strided_slice %51 {offsets = [8, 640], sizes = [8, 128], strides = [1, 1]} : vector<16x768xbf16> to vector<8x128xbf16>
    %cst_43 = arith.constant dense<0.000000e+00> : vector<8x8xf32>
    %120 = tpu.matmul %117, %118, %cst_43 {dimension_numbers = #tpu.dot_dimension_numbers<[1], [1], [0], [0], [0, 0, 1, 0], [], []>} : vector<8x128xbf16>, vector<8x128xbf16>, vector<8x8xf32> -> vector<8x8xf32>
    %cst_44 = arith.constant dense<0xFF800000> : vector<8xf32>
    %121 = vector.multi_reduction <maximumf>, %120, %cst_44 [1] : vector<8x8xf32> to vector<8xf32>
    %122 = vector.shape_cast %121 : vector<8xf32> to vector<8x1xf32>
    %123 = vector.broadcast %122 : vector<8x1xf32> to vector<8x8xf32>
    %124 = arith.subf %120, %123 : vector<8x8xf32>
    %125 = math.exp %124 : vector<8x8xf32>
    %cst_45 = arith.constant dense<0.000000e+00> : vector<8xf32>
    %126 = vector.multi_reduction <add>, %125, %cst_45 [1] : vector<8x8xf32> to vector<8xf32>
    %127 = vector.shape_cast %126 : vector<8xf32> to vector<8x1xf32>
    %128 = tpu.reciprocal %127 {approx = true} : vector<8x1xf32> -> vector<8x1xf32>
    %129 = vector.broadcast %128 : vector<8x1xf32> to vector<8x8xf32>
    %130 = arith.mulf %125, %129 : vector<8x8xf32>
    %131 = arith.truncf %130 : vector<8x8xf32> to vector<8x8xbf16>
    %cst_46 = arith.constant dense<0.000000e+00> : vector<8x128xf32>
    %132 = tpu.matmul %131, %119, %cst_46 {dimension_numbers = #tpu.dot_dimension_numbers<[1], [0], [0], [1], [0, 0, 1, 1], [], []>} : vector<8x8xbf16>, vector<8x128xbf16>, vector<8x128xf32> -> vector<8x128xf32>
    %133 = arith.truncf %132 : vector<8x128xf32> to vector<8x128xbf16>
    %c1_47 = arith.constant 1 : index
    %c0_48 = arith.constant 0 : index
    %c0_49 = arith.constant 0 : index
    %134 = vector.load %arg5[%c1_47, %c0_48, %c0_49] : memref<2x128x128xbf16, #tpu.memory_space<vmem>>, vector<1x128x128xbf16>
    %135 = vector.shape_cast %134 : vector<1x128x128xbf16> to vector<128x128xbf16>
    %cst_50 = arith.constant dense<0.000000e+00> : vector<8x128xf32>
    %136 = tpu.matmul %133, %135, %cst_50 {dimension_numbers = #tpu.dot_dimension_numbers<[1], [0], [0], [1], [0, 0, 1, 1], [], []>} : vector<8x128xbf16>, vector<128x128xbf16>, vector<8x128xf32> -> vector<8x128xf32>
    %137 = arith.addf %116, %136 : vector<8x128xf32>
    %138 = tpu.concatenate %94, %137 in 0 : vector<8x128xf32>, vector<8x128xf32> -> vector<16x128xf32>
    %139 = arith.addf %1, %138 : vector<16x128xf32>
    %c0_51 = arith.constant 0 : index
    %c0_52 = arith.constant 0 : index
    %140 = vector.load %arg6[%c0_51, %c0_52] : memref<1x128xf32, #tpu.memory_space<vmem>>, vector<1x128xf32>
    %141 = vector.broadcast %140 : vector<1x128xf32> to vector<16x128xf32>
    %142 = arith.addf %139, %141 : vector<16x128xf32>
    %143 = tpu.iota {dimensions = array<i32: 1>} : vector<16x128xi32>
    %c64_i32_53 = arith.constant 64 : i32
    %144 = vector.broadcast %c64_i32_53 : i32 to vector<16x128xi32>
    %145 = arith.cmpi slt, %143, %144 : vector<16x128xi32>
    %146 = arith.extui %145 : vector<16x128xi1> to vector<16x128xi32>
    %147 = arith.sitofp %146 : vector<16x128xi32> to vector<16x128xf32>
    %c64_i32_54 = arith.constant 64 : i32
    %148 = vector.broadcast %c64_i32_54 : i32 to vector<16x128xi32>
    %149 = arith.cmpi sge, %143, %148 : vector<16x128xi32>
    %c68_i32_55 = arith.constant 68 : i32
    %150 = vector.broadcast %c68_i32_55 : i32 to vector<16x128xi32>
    %151 = arith.cmpi slt, %143, %150 : vector<16x128xi32>
    %152 = arith.andi %149, %151 : vector<16x128xi1>
    %153 = arith.extui %152 : vector<16x128xi1> to vector<16x128xi32>
    %154 = arith.sitofp %153 : vector<16x128xi32> to vector<16x128xf32>
    %155 = arith.mulf %142, %147 : vector<16x128xf32>
    %156 = arith.mulf %155, %155 : vector<16x128xf32>
    %cst_56 = arith.constant dense<0.000000e+00> : vector<16xf32>
    %157 = vector.multi_reduction <add>, %156, %cst_56 [1] : vector<16x128xf32> to vector<16xf32>
    %158 = vector.shape_cast %157 : vector<16xf32> to vector<16x1xf32>
    %cst_57 = arith.constant 2.500000e-01 : f32
    %159 = vector.broadcast %cst_57 : f32 to vector<16x1xf32>
    %160 = arith.mulf %158, %159 : vector<16x1xf32>
    %161 = arith.mulf %142, %154 : vector<16x128xf32>
    %cst_58 = arith.constant dense<0.000000e+00> : vector<16xf32>
    %162 = vector.multi_reduction <add>, %161, %cst_58 [1] : vector<16x128xf32> to vector<16xf32>
    %163 = vector.shape_cast %162 : vector<16xf32> to vector<16x1xf32>
    %cst_59 = arith.constant 2.500000e-01 : f32
    %164 = vector.broadcast %cst_59 : f32 to vector<16x1xf32>
    %165 = arith.mulf %163, %164 : vector<16x1xf32>
    %166 = vector.broadcast %165 : vector<16x1xf32> to vector<16x128xf32>
    %167 = arith.subf %142, %166 : vector<16x128xf32>
    %168 = arith.mulf %167, %154 : vector<16x128xf32>
    %169 = arith.mulf %168, %168 : vector<16x128xf32>
    %cst_60 = arith.constant dense<0.000000e+00> : vector<16xf32>
    %170 = vector.multi_reduction <add>, %169, %cst_60 [1] : vector<16x128xf32> to vector<16xf32>
    %171 = vector.shape_cast %170 : vector<16xf32> to vector<16x1xf32>
    %cst_61 = arith.constant 2.500000e-01 : f32
    %172 = vector.broadcast %cst_61 : f32 to vector<16x1xf32>
    %173 = arith.mulf %171, %172 : vector<16x1xf32>
    %cst_62 = arith.constant 0.00999999977 : f32
    %174 = vector.broadcast %cst_62 : f32 to vector<16x1xf32>
    %175 = arith.addf %160, %174 : vector<16x1xf32>
    %176 = math.rsqrt %175 : vector<16x1xf32>
    %177 = vector.broadcast %176 : vector<16x1xf32> to vector<16x128xf32>
    %178 = arith.mulf %155, %177 : vector<16x128xf32>
    %cst_63 = arith.constant 9.99999974E-6 : f32
    %179 = vector.broadcast %cst_63 : f32 to vector<16x1xf32>
    %180 = arith.addf %173, %179 : vector<16x1xf32>
    %181 = math.rsqrt %180 : vector<16x1xf32>
    %182 = vector.broadcast %181 : vector<16x1xf32> to vector<16x128xf32>
    %183 = arith.mulf %168, %182 : vector<16x128xf32>
    %184 = arith.addf %178, %183 : vector<16x128xf32>
    %185 = tpu.iota {dimensions = array<i32: 2>} : vector<2x6x128xi32>
    %c64_i32_64 = arith.constant 64 : i32
    %186 = vector.broadcast %c64_i32_64 : i32 to vector<2x6x128xi32>
    %187 = arith.cmpi slt, %185, %186 : vector<2x6x128xi32>
    %188 = arith.extui %187 : vector<2x6x128xi1> to vector<2x6x128xi32>
    %189 = arith.sitofp %188 : vector<2x6x128xi32> to vector<2x6x128xf32>
    %c64_i32_65 = arith.constant 64 : i32
    %190 = vector.broadcast %c64_i32_65 : i32 to vector<2x6x128xi32>
    %191 = arith.cmpi sge, %185, %190 : vector<2x6x128xi32>
    %c68_i32_66 = arith.constant 68 : i32
    %192 = vector.broadcast %c68_i32_66 : i32 to vector<2x6x128xi32>
    %193 = arith.cmpi slt, %185, %192 : vector<2x6x128xi32>
    %194 = arith.andi %191, %193 : vector<2x6x128xi1>
    %195 = arith.extui %194 : vector<2x6x128xi1> to vector<2x6x128xi32>
    %196 = arith.sitofp %195 : vector<2x6x128xi32> to vector<2x6x128xf32>
    %197 = arith.mulf %2, %189 : vector<2x6x128xf32>
    %198 = arith.mulf %197, %197 : vector<2x6x128xf32>
    %cst_67 = arith.constant dense<0.000000e+00> : vector<2x6xf32>
    %199 = vector.multi_reduction <add>, %198, %cst_67 [2] : vector<2x6x128xf32> to vector<2x6xf32>
    %200 = vector.shape_cast %199 : vector<2x6xf32> to vector<2x6x1xf32>
    %cst_68 = arith.constant 2.500000e-01 : f32
    %201 = vector.broadcast %cst_68 : f32 to vector<2x6x1xf32>
    %202 = arith.mulf %200, %201 : vector<2x6x1xf32>
    %203 = arith.mulf %2, %196 : vector<2x6x128xf32>
    %cst_69 = arith.constant dense<0.000000e+00> : vector<2x6xf32>
    %204 = vector.multi_reduction <add>, %203, %cst_69 [2] : vector<2x6x128xf32> to vector<2x6xf32>
    %205 = vector.shape_cast %204 : vector<2x6xf32> to vector<2x6x1xf32>
    %cst_70 = arith.constant 2.500000e-01 : f32
    %206 = vector.broadcast %cst_70 : f32 to vector<2x6x1xf32>
    %207 = arith.mulf %205, %206 : vector<2x6x1xf32>
    %208 = vector.broadcast %207 : vector<2x6x1xf32> to vector<2x6x128xf32>
    %209 = arith.subf %2, %208 : vector<2x6x128xf32>
    %210 = arith.mulf %209, %196 : vector<2x6x128xf32>
    %211 = arith.mulf %210, %210 : vector<2x6x128xf32>
    %cst_71 = arith.constant dense<0.000000e+00> : vector<2x6xf32>
    %212 = vector.multi_reduction <add>, %211, %cst_71 [2] : vector<2x6x128xf32> to vector<2x6xf32>
    %213 = vector.shape_cast %212 : vector<2x6xf32> to vector<2x6x1xf32>
    %cst_72 = arith.constant 2.500000e-01 : f32
    %214 = vector.broadcast %cst_72 : f32 to vector<2x6x1xf32>
    %215 = arith.mulf %213, %214 : vector<2x6x1xf32>
    %cst_73 = arith.constant 0.00999999977 : f32
    %216 = vector.broadcast %cst_73 : f32 to vector<2x6x1xf32>
    %217 = arith.addf %202, %216 : vector<2x6x1xf32>
    %218 = math.rsqrt %217 : vector<2x6x1xf32>
    %219 = vector.broadcast %218 : vector<2x6x1xf32> to vector<2x6x128xf32>
    %220 = arith.mulf %197, %219 : vector<2x6x128xf32>
    %cst_74 = arith.constant 9.99999974E-6 : f32
    %221 = vector.broadcast %cst_74 : f32 to vector<2x6x1xf32>
    %222 = arith.addf %215, %221 : vector<2x6x1xf32>
    %223 = math.rsqrt %222 : vector<2x6x1xf32>
    %224 = vector.broadcast %223 : vector<2x6x1xf32> to vector<2x6x128xf32>
    %225 = arith.mulf %210, %224 : vector<2x6x128xf32>
    %226 = arith.addf %220, %225 : vector<2x6x128xf32>
    %c0_75 = arith.constant 0 : index
    %c0_76 = arith.constant 0 : index
    %227 = vector.load %arg7[%c0_75, %c0_76] : memref<128x256xbf16, #tpu.memory_space<vmem>>, vector<128x256xbf16>
    %228 = arith.truncf %184 : vector<16x128xf32> to vector<16x128xbf16>
    %cst_77 = arith.constant dense<0.000000e+00> : vector<16x256xf32>
    %229 = tpu.matmul %228, %227, %cst_77 {dimension_numbers = #tpu.dot_dimension_numbers<[1], [0], [0], [1], [0, 0, 1, 1], [], []>} : vector<16x128xbf16>, vector<128x256xbf16>, vector<16x256xf32> -> vector<16x256xf32>
    %c0_78 = arith.constant 0 : index
    %c0_79 = arith.constant 0 : index
    %230 = vector.load %arg8[%c0_78, %c0_79] : memref<1x256xf32, #tpu.memory_space<vmem>>, vector<1x256xf32>
    %231 = vector.broadcast %230 : vector<1x256xf32> to vector<16x256xf32>
    %232 = arith.addf %229, %231 : vector<16x256xf32>
    %233 = arith.truncf %232 : vector<16x256xf32> to vector<16x256xbf16>
    %234 = vector.extract_strided_slice %226 {offsets = [0, 0, 0], sizes = [1, 6, 128], strides = [1, 1, 1]} : vector<2x6x128xf32> to vector<1x6x128xf32>
    %235 = vector.shape_cast %234 : vector<1x6x128xf32> to vector<6x128xf32>
    %c0_80 = arith.constant 0 : index
    %c0_81 = arith.constant 0 : index
    %236 = vector.load %arg9[%c0_80, %c0_81] : memref<128x512xbf16, #tpu.memory_space<vmem>>, vector<128x512xbf16>
    %237 = arith.truncf %235 : vector<6x128xf32> to vector<6x128xbf16>
    %cst_82 = arith.constant dense<0.000000e+00> : vector<6x512xf32>
    %238 = tpu.matmul %237, %236, %cst_82 {dimension_numbers = #tpu.dot_dimension_numbers<[1], [0], [0], [1], [0, 0, 1, 1], [], []>} : vector<6x128xbf16>, vector<128x512xbf16>, vector<6x512xf32> -> vector<6x512xf32>
    %c0_83 = arith.constant 0 : index
    %c0_84 = arith.constant 0 : index
    %239 = vector.load %arg10[%c0_83, %c0_84] : memref<1x512xf32, #tpu.memory_space<vmem>>, vector<1x512xf32>
    %240 = vector.broadcast %239 : vector<1x512xf32> to vector<6x512xf32>
    %241 = arith.addf %238, %240 : vector<6x512xf32>
    %242 = arith.truncf %241 : vector<6x512xf32> to vector<6x512xbf16>
    %cst_85 = arith.constant 0.000000e+00 : f32
    %243 = vector.broadcast %cst_85 : f32 to vector<8x128xf32>
    %244 = vector.extract_strided_slice %233 {offsets = [0, 0], sizes = [8, 128], strides = [1, 1]} : vector<16x256xbf16> to vector<8x128xbf16>
    %245 = vector.extract_strided_slice %242 {offsets = [0, 0], sizes = [6, 128], strides = [1, 1]} : vector<6x512xbf16> to vector<6x128xbf16>
    %246 = vector.extract_strided_slice %242 {offsets = [0, 256], sizes = [6, 128], strides = [1, 1]} : vector<6x512xbf16> to vector<6x128xbf16>
    %cst_86 = arith.constant dense<0.000000e+00> : vector<8x6xf32>
    %247 = tpu.matmul %244, %245, %cst_86 {dimension_numbers = #tpu.dot_dimension_numbers<[1], [1], [0], [0], [0, 0, 1, 0], [], []>} : vector<8x128xbf16>, vector<6x128xbf16>, vector<8x6xf32> -> vector<8x6xf32>
    %cst_87 = arith.constant dense<0xFF800000> : vector<8xf32>
    %248 = vector.multi_reduction <maximumf>, %247, %cst_87 [1] : vector<8x6xf32> to vector<8xf32>
    %249 = vector.shape_cast %248 : vector<8xf32> to vector<8x1xf32>
    %250 = vector.broadcast %249 : vector<8x1xf32> to vector<8x6xf32>
    %251 = arith.subf %247, %250 : vector<8x6xf32>
    %252 = math.exp %251 : vector<8x6xf32>
    %cst_88 = arith.constant dense<0.000000e+00> : vector<8xf32>
    %253 = vector.multi_reduction <add>, %252, %cst_88 [1] : vector<8x6xf32> to vector<8xf32>
    %254 = vector.shape_cast %253 : vector<8xf32> to vector<8x1xf32>
    %255 = tpu.reciprocal %254 {approx = true} : vector<8x1xf32> -> vector<8x1xf32>
    %256 = vector.broadcast %255 : vector<8x1xf32> to vector<8x6xf32>
    %257 = arith.mulf %252, %256 : vector<8x6xf32>
    %258 = arith.truncf %257 : vector<8x6xf32> to vector<8x6xbf16>
    %cst_89 = arith.constant dense<0.000000e+00> : vector<8x128xf32>
    %259 = tpu.matmul %258, %246, %cst_89 {dimension_numbers = #tpu.dot_dimension_numbers<[1], [0], [0], [1], [0, 0, 1, 1], [], []>} : vector<8x6xbf16>, vector<6x128xbf16>, vector<8x128xf32> -> vector<8x128xf32>
    %260 = arith.truncf %259 : vector<8x128xf32> to vector<8x128xbf16>
    %c0_90 = arith.constant 0 : index
    %c0_91 = arith.constant 0 : index
    %c0_92 = arith.constant 0 : index
    %261 = vector.load %arg11[%c0_90, %c0_91, %c0_92] : memref<2x128x128xbf16, #tpu.memory_space<vmem>>, vector<1x128x128xbf16>
    %262 = vector.shape_cast %261 : vector<1x128x128xbf16> to vector<128x128xbf16>
    %cst_93 = arith.constant dense<0.000000e+00> : vector<8x128xf32>
    %263 = tpu.matmul %260, %262, %cst_93 {dimension_numbers = #tpu.dot_dimension_numbers<[1], [0], [0], [1], [0, 0, 1, 1], [], []>} : vector<8x128xbf16>, vector<128x128xbf16>, vector<8x128xf32> -> vector<8x128xf32>
    %264 = arith.addf %243, %263 : vector<8x128xf32>
    %265 = vector.extract_strided_slice %233 {offsets = [0, 128], sizes = [8, 128], strides = [1, 1]} : vector<16x256xbf16> to vector<8x128xbf16>
    %266 = vector.extract_strided_slice %242 {offsets = [0, 128], sizes = [6, 128], strides = [1, 1]} : vector<6x512xbf16> to vector<6x128xbf16>
    %267 = vector.extract_strided_slice %242 {offsets = [0, 384], sizes = [6, 128], strides = [1, 1]} : vector<6x512xbf16> to vector<6x128xbf16>
    %cst_94 = arith.constant dense<0.000000e+00> : vector<8x6xf32>
    %268 = tpu.matmul %265, %266, %cst_94 {dimension_numbers = #tpu.dot_dimension_numbers<[1], [1], [0], [0], [0, 0, 1, 0], [], []>} : vector<8x128xbf16>, vector<6x128xbf16>, vector<8x6xf32> -> vector<8x6xf32>
    %cst_95 = arith.constant dense<0xFF800000> : vector<8xf32>
    %269 = vector.multi_reduction <maximumf>, %268, %cst_95 [1] : vector<8x6xf32> to vector<8xf32>
    %270 = vector.shape_cast %269 : vector<8xf32> to vector<8x1xf32>
    %271 = vector.broadcast %270 : vector<8x1xf32> to vector<8x6xf32>
    %272 = arith.subf %268, %271 : vector<8x6xf32>
    %273 = math.exp %272 : vector<8x6xf32>
    %cst_96 = arith.constant dense<0.000000e+00> : vector<8xf32>
    %274 = vector.multi_reduction <add>, %273, %cst_96 [1] : vector<8x6xf32> to vector<8xf32>
    %275 = vector.shape_cast %274 : vector<8xf32> to vector<8x1xf32>
    %276 = tpu.reciprocal %275 {approx = true} : vector<8x1xf32> -> vector<8x1xf32>
    %277 = vector.broadcast %276 : vector<8x1xf32> to vector<8x6xf32>
    %278 = arith.mulf %273, %277 : vector<8x6xf32>
    %279 = arith.truncf %278 : vector<8x6xf32> to vector<8x6xbf16>
    %cst_97 = arith.constant dense<0.000000e+00> : vector<8x128xf32>
    %280 = tpu.matmul %279, %267, %cst_97 {dimension_numbers = #tpu.dot_dimension_numbers<[1], [0], [0], [1], [0, 0, 1, 1], [], []>} : vector<8x6xbf16>, vector<6x128xbf16>, vector<8x128xf32> -> vector<8x128xf32>
    %281 = arith.truncf %280 : vector<8x128xf32> to vector<8x128xbf16>
    %c1_98 = arith.constant 1 : index
    %c0_99 = arith.constant 0 : index
    %c0_100 = arith.constant 0 : index
    %282 = vector.load %arg11[%c1_98, %c0_99, %c0_100] : memref<2x128x128xbf16, #tpu.memory_space<vmem>>, vector<1x128x128xbf16>
    %283 = vector.shape_cast %282 : vector<1x128x128xbf16> to vector<128x128xbf16>
    %cst_101 = arith.constant dense<0.000000e+00> : vector<8x128xf32>
    %284 = tpu.matmul %281, %283, %cst_101 {dimension_numbers = #tpu.dot_dimension_numbers<[1], [0], [0], [1], [0, 0, 1, 1], [], []>} : vector<8x128xbf16>, vector<128x128xbf16>, vector<8x128xf32> -> vector<8x128xf32>
    %285 = arith.addf %264, %284 : vector<8x128xf32>
    %286 = vector.extract_strided_slice %226 {offsets = [1, 0, 0], sizes = [1, 6, 128], strides = [1, 1, 1]} : vector<2x6x128xf32> to vector<1x6x128xf32>
    %287 = vector.shape_cast %286 : vector<1x6x128xf32> to vector<6x128xf32>
    %c0_102 = arith.constant 0 : index
    %c0_103 = arith.constant 0 : index
    %288 = vector.load %arg9[%c0_102, %c0_103] : memref<128x512xbf16, #tpu.memory_space<vmem>>, vector<128x512xbf16>
    %289 = arith.truncf %287 : vector<6x128xf32> to vector<6x128xbf16>
    %cst_104 = arith.constant dense<0.000000e+00> : vector<6x512xf32>
    %290 = tpu.matmul %289, %288, %cst_104 {dimension_numbers = #tpu.dot_dimension_numbers<[1], [0], [0], [1], [0, 0, 1, 1], [], []>} : vector<6x128xbf16>, vector<128x512xbf16>, vector<6x512xf32> -> vector<6x512xf32>
    %c0_105 = arith.constant 0 : index
    %c0_106 = arith.constant 0 : index
    %291 = vector.load %arg10[%c0_105, %c0_106] : memref<1x512xf32, #tpu.memory_space<vmem>>, vector<1x512xf32>
    %292 = vector.broadcast %291 : vector<1x512xf32> to vector<6x512xf32>
    %293 = arith.addf %290, %292 : vector<6x512xf32>
    %294 = arith.truncf %293 : vector<6x512xf32> to vector<6x512xbf16>
    %cst_107 = arith.constant 0.000000e+00 : f32
    %295 = vector.broadcast %cst_107 : f32 to vector<8x128xf32>
    %296 = vector.extract_strided_slice %233 {offsets = [8, 0], sizes = [8, 128], strides = [1, 1]} : vector<16x256xbf16> to vector<8x128xbf16>
    %297 = vector.extract_strided_slice %294 {offsets = [0, 0], sizes = [6, 128], strides = [1, 1]} : vector<6x512xbf16> to vector<6x128xbf16>
    %298 = vector.extract_strided_slice %294 {offsets = [0, 256], sizes = [6, 128], strides = [1, 1]} : vector<6x512xbf16> to vector<6x128xbf16>
    %cst_108 = arith.constant dense<0.000000e+00> : vector<8x6xf32>
    %299 = tpu.matmul %296, %297, %cst_108 {dimension_numbers = #tpu.dot_dimension_numbers<[1], [1], [0], [0], [0, 0, 1, 0], [], []>} : vector<8x128xbf16>, vector<6x128xbf16>, vector<8x6xf32> -> vector<8x6xf32>
    %cst_109 = arith.constant dense<0xFF800000> : vector<8xf32>
    %300 = vector.multi_reduction <maximumf>, %299, %cst_109 [1] : vector<8x6xf32> to vector<8xf32>
    %301 = vector.shape_cast %300 : vector<8xf32> to vector<8x1xf32>
    %302 = vector.broadcast %301 : vector<8x1xf32> to vector<8x6xf32>
    %303 = arith.subf %299, %302 : vector<8x6xf32>
    %304 = math.exp %303 : vector<8x6xf32>
    %cst_110 = arith.constant dense<0.000000e+00> : vector<8xf32>
    %305 = vector.multi_reduction <add>, %304, %cst_110 [1] : vector<8x6xf32> to vector<8xf32>
    %306 = vector.shape_cast %305 : vector<8xf32> to vector<8x1xf32>
    %307 = tpu.reciprocal %306 {approx = true} : vector<8x1xf32> -> vector<8x1xf32>
    %308 = vector.broadcast %307 : vector<8x1xf32> to vector<8x6xf32>
    %309 = arith.mulf %304, %308 : vector<8x6xf32>
    %310 = arith.truncf %309 : vector<8x6xf32> to vector<8x6xbf16>
    %cst_111 = arith.constant dense<0.000000e+00> : vector<8x128xf32>
    %311 = tpu.matmul %310, %298, %cst_111 {dimension_numbers = #tpu.dot_dimension_numbers<[1], [0], [0], [1], [0, 0, 1, 1], [], []>} : vector<8x6xbf16>, vector<6x128xbf16>, vector<8x128xf32> -> vector<8x128xf32>
    %312 = arith.truncf %311 : vector<8x128xf32> to vector<8x128xbf16>
    %c0_112 = arith.constant 0 : index
    %c0_113 = arith.constant 0 : index
    %c0_114 = arith.constant 0 : index
    %313 = vector.load %arg11[%c0_112, %c0_113, %c0_114] : memref<2x128x128xbf16, #tpu.memory_space<vmem>>, vector<1x128x128xbf16>
    %314 = vector.shape_cast %313 : vector<1x128x128xbf16> to vector<128x128xbf16>
    %cst_115 = arith.constant dense<0.000000e+00> : vector<8x128xf32>
    %315 = tpu.matmul %312, %314, %cst_115 {dimension_numbers = #tpu.dot_dimension_numbers<[1], [0], [0], [1], [0, 0, 1, 1], [], []>} : vector<8x128xbf16>, vector<128x128xbf16>, vector<8x128xf32> -> vector<8x128xf32>
    %316 = arith.addf %295, %315 : vector<8x128xf32>
    %317 = vector.extract_strided_slice %233 {offsets = [8, 128], sizes = [8, 128], strides = [1, 1]} : vector<16x256xbf16> to vector<8x128xbf16>
    %318 = vector.extract_strided_slice %294 {offsets = [0, 128], sizes = [6, 128], strides = [1, 1]} : vector<6x512xbf16> to vector<6x128xbf16>
    %319 = vector.extract_strided_slice %294 {offsets = [0, 384], sizes = [6, 128], strides = [1, 1]} : vector<6x512xbf16> to vector<6x128xbf16>
    %cst_116 = arith.constant dense<0.000000e+00> : vector<8x6xf32>
    %320 = tpu.matmul %317, %318, %cst_116 {dimension_numbers = #tpu.dot_dimension_numbers<[1], [1], [0], [0], [0, 0, 1, 0], [], []>} : vector<8x128xbf16>, vector<6x128xbf16>, vector<8x6xf32> -> vector<8x6xf32>
    %cst_117 = arith.constant dense<0xFF800000> : vector<8xf32>
    %321 = vector.multi_reduction <maximumf>, %320, %cst_117 [1] : vector<8x6xf32> to vector<8xf32>
    %322 = vector.shape_cast %321 : vector<8xf32> to vector<8x1xf32>
    %323 = vector.broadcast %322 : vector<8x1xf32> to vector<8x6xf32>
    %324 = arith.subf %320, %323 : vector<8x6xf32>
    %325 = math.exp %324 : vector<8x6xf32>
    %cst_118 = arith.constant dense<0.000000e+00> : vector<8xf32>
    %326 = vector.multi_reduction <add>, %325, %cst_118 [1] : vector<8x6xf32> to vector<8xf32>
    %327 = vector.shape_cast %326 : vector<8xf32> to vector<8x1xf32>
    %328 = tpu.reciprocal %327 {approx = true} : vector<8x1xf32> -> vector<8x1xf32>
    %329 = vector.broadcast %328 : vector<8x1xf32> to vector<8x6xf32>
    %330 = arith.mulf %325, %329 : vector<8x6xf32>
    %331 = arith.truncf %330 : vector<8x6xf32> to vector<8x6xbf16>
    %cst_119 = arith.constant dense<0.000000e+00> : vector<8x128xf32>
    %332 = tpu.matmul %331, %319, %cst_119 {dimension_numbers = #tpu.dot_dimension_numbers<[1], [0], [0], [1], [0, 0, 1, 1], [], []>} : vector<8x6xbf16>, vector<6x128xbf16>, vector<8x128xf32> -> vector<8x128xf32>
    %333 = arith.truncf %332 : vector<8x128xf32> to vector<8x128xbf16>
    %c1_120 = arith.constant 1 : index
    %c0_121 = arith.constant 0 : index
    %c0_122 = arith.constant 0 : index
    %334 = vector.load %arg11[%c1_120, %c0_121, %c0_122] : memref<2x128x128xbf16, #tpu.memory_space<vmem>>, vector<1x128x128xbf16>
    %335 = vector.shape_cast %334 : vector<1x128x128xbf16> to vector<128x128xbf16>
    %cst_123 = arith.constant dense<0.000000e+00> : vector<8x128xf32>
    %336 = tpu.matmul %333, %335, %cst_123 {dimension_numbers = #tpu.dot_dimension_numbers<[1], [0], [0], [1], [0, 0, 1, 1], [], []>} : vector<8x128xbf16>, vector<128x128xbf16>, vector<8x128xf32> -> vector<8x128xf32>
    %337 = arith.addf %316, %336 : vector<8x128xf32>
    %338 = tpu.concatenate %285, %337 in 0 : vector<8x128xf32>, vector<8x128xf32> -> vector<16x128xf32>
    %339 = arith.addf %142, %338 : vector<16x128xf32>
    %c0_124 = arith.constant 0 : index
    %c0_125 = arith.constant 0 : index
    %340 = vector.load %arg12[%c0_124, %c0_125] : memref<1x128xf32, #tpu.memory_space<vmem>>, vector<1x128xf32>
    %341 = vector.broadcast %340 : vector<1x128xf32> to vector<16x128xf32>
    %342 = arith.addf %339, %341 : vector<16x128xf32>
    %343 = tpu.iota {dimensions = array<i32: 1>} : vector<16x128xi32>
    %c64_i32_126 = arith.constant 64 : i32
    %344 = vector.broadcast %c64_i32_126 : i32 to vector<16x128xi32>
    %345 = arith.cmpi slt, %343, %344 : vector<16x128xi32>
    %346 = arith.extui %345 : vector<16x128xi1> to vector<16x128xi32>
    %347 = arith.sitofp %346 : vector<16x128xi32> to vector<16x128xf32>
    %c64_i32_127 = arith.constant 64 : i32
    %348 = vector.broadcast %c64_i32_127 : i32 to vector<16x128xi32>
    %349 = arith.cmpi sge, %343, %348 : vector<16x128xi32>
    %c68_i32_128 = arith.constant 68 : i32
    %350 = vector.broadcast %c68_i32_128 : i32 to vector<16x128xi32>
    %351 = arith.cmpi slt, %343, %350 : vector<16x128xi32>
    %352 = arith.andi %349, %351 : vector<16x128xi1>
    %353 = arith.extui %352 : vector<16x128xi1> to vector<16x128xi32>
    %354 = arith.sitofp %353 : vector<16x128xi32> to vector<16x128xf32>
    %355 = arith.mulf %342, %347 : vector<16x128xf32>
    %356 = arith.mulf %355, %355 : vector<16x128xf32>
    %cst_129 = arith.constant dense<0.000000e+00> : vector<16xf32>
    %357 = vector.multi_reduction <add>, %356, %cst_129 [1] : vector<16x128xf32> to vector<16xf32>
    %358 = vector.shape_cast %357 : vector<16xf32> to vector<16x1xf32>
    %cst_130 = arith.constant 2.500000e-01 : f32
    %359 = vector.broadcast %cst_130 : f32 to vector<16x1xf32>
    %360 = arith.mulf %358, %359 : vector<16x1xf32>
    %361 = arith.mulf %342, %354 : vector<16x128xf32>
    %cst_131 = arith.constant dense<0.000000e+00> : vector<16xf32>
    %362 = vector.multi_reduction <add>, %361, %cst_131 [1] : vector<16x128xf32> to vector<16xf32>
    %363 = vector.shape_cast %362 : vector<16xf32> to vector<16x1xf32>
    %cst_132 = arith.constant 2.500000e-01 : f32
    %364 = vector.broadcast %cst_132 : f32 to vector<16x1xf32>
    %365 = arith.mulf %363, %364 : vector<16x1xf32>
    %366 = vector.broadcast %365 : vector<16x1xf32> to vector<16x128xf32>
    %367 = arith.subf %342, %366 : vector<16x128xf32>
    %368 = arith.mulf %367, %354 : vector<16x128xf32>
    %369 = arith.mulf %368, %368 : vector<16x128xf32>
    %cst_133 = arith.constant dense<0.000000e+00> : vector<16xf32>
    %370 = vector.multi_reduction <add>, %369, %cst_133 [1] : vector<16x128xf32> to vector<16xf32>
    %371 = vector.shape_cast %370 : vector<16xf32> to vector<16x1xf32>
    %cst_134 = arith.constant 2.500000e-01 : f32
    %372 = vector.broadcast %cst_134 : f32 to vector<16x1xf32>
    %373 = arith.mulf %371, %372 : vector<16x1xf32>
    %cst_135 = arith.constant 0.00999999977 : f32
    %374 = vector.broadcast %cst_135 : f32 to vector<16x1xf32>
    %375 = arith.addf %360, %374 : vector<16x1xf32>
    %376 = math.rsqrt %375 : vector<16x1xf32>
    %377 = vector.broadcast %376 : vector<16x1xf32> to vector<16x128xf32>
    %378 = arith.mulf %355, %377 : vector<16x128xf32>
    %cst_136 = arith.constant 9.99999974E-6 : f32
    %379 = vector.broadcast %cst_136 : f32 to vector<16x1xf32>
    %380 = arith.addf %373, %379 : vector<16x1xf32>
    %381 = math.rsqrt %380 : vector<16x1xf32>
    %382 = vector.broadcast %381 : vector<16x1xf32> to vector<16x128xf32>
    %383 = arith.mulf %368, %382 : vector<16x128xf32>
    %384 = arith.addf %378, %383 : vector<16x128xf32>
    %385 = arith.truncf %384 : vector<16x128xf32> to vector<16x128xbf16>
    %c0_137 = arith.constant 0 : index
    %c0_138 = arith.constant 0 : index
    %386 = vector.load %arg13[%c0_137, %c0_138] : memref<128x2048xbf16, #tpu.memory_space<vmem>>, vector<128x2048xbf16>
    %cst_139 = arith.constant dense<0.000000e+00> : vector<16x2048xf32>
    %387 = tpu.matmul %385, %386, %cst_139 {dimension_numbers = #tpu.dot_dimension_numbers<[1], [0], [0], [1], [0, 0, 1, 1], [], []>} : vector<16x128xbf16>, vector<128x2048xbf16>, vector<16x2048xf32> -> vector<16x2048xf32>
    %c0_140 = arith.constant 0 : index
    %c0_141 = arith.constant 0 : index
    %388 = vector.load %arg14[%c0_140, %c0_141] : memref<1x2048xf32, #tpu.memory_space<vmem>>, vector<1x2048xf32>
    %389 = vector.broadcast %388 : vector<1x2048xf32> to vector<16x2048xf32>
    %390 = arith.addf %387, %389 : vector<16x2048xf32>
    %c0_142 = arith.constant 0 : index
    %c0_143 = arith.constant 0 : index
    %391 = vector.load %arg15[%c0_142, %c0_143] : memref<128x2048xbf16, #tpu.memory_space<vmem>>, vector<128x2048xbf16>
    %cst_144 = arith.constant dense<0.000000e+00> : vector<16x2048xf32>
    %392 = tpu.matmul %385, %391, %cst_144 {dimension_numbers = #tpu.dot_dimension_numbers<[1], [0], [0], [1], [0, 0, 1, 1], [], []>} : vector<16x128xbf16>, vector<128x2048xbf16>, vector<16x2048xf32> -> vector<16x2048xf32>
    %c0_145 = arith.constant 0 : index
    %c0_146 = arith.constant 0 : index
    %393 = vector.load %arg16[%c0_145, %c0_146] : memref<1x2048xf32, #tpu.memory_space<vmem>>, vector<1x2048xf32>
    %394 = vector.broadcast %393 : vector<1x2048xf32> to vector<16x2048xf32>
    %395 = arith.addf %392, %394 : vector<16x2048xf32>
    %396 = vector.extract_strided_slice %390 {offsets = [0, 0], sizes = [16, 128], strides = [1, 1]} : vector<16x2048xf32> to vector<16x128xf32>
    %397 = vector.extract_strided_slice %395 {offsets = [0, 0], sizes = [16, 128], strides = [1, 1]} : vector<16x2048xf32> to vector<16x128xf32>
    %398 = arith.mulf %396, %397 : vector<16x128xf32>
    %399 = vector.extract_strided_slice %390 {offsets = [0, 128], sizes = [16, 128], strides = [1, 1]} : vector<16x2048xf32> to vector<16x128xf32>
    %400 = vector.extract_strided_slice %395 {offsets = [0, 128], sizes = [16, 128], strides = [1, 1]} : vector<16x2048xf32> to vector<16x128xf32>
    %401 = arith.mulf %399, %400 : vector<16x128xf32>
    %402 = arith.addf %398, %401 : vector<16x128xf32>
    %403 = vector.extract_strided_slice %390 {offsets = [0, 256], sizes = [16, 128], strides = [1, 1]} : vector<16x2048xf32> to vector<16x128xf32>
    %404 = vector.extract_strided_slice %395 {offsets = [0, 256], sizes = [16, 128], strides = [1, 1]} : vector<16x2048xf32> to vector<16x128xf32>
    %405 = arith.mulf %403, %404 : vector<16x128xf32>
    %406 = arith.addf %402, %405 : vector<16x128xf32>
    %407 = vector.extract_strided_slice %390 {offsets = [0, 384], sizes = [16, 128], strides = [1, 1]} : vector<16x2048xf32> to vector<16x128xf32>
    %408 = vector.extract_strided_slice %395 {offsets = [0, 384], sizes = [16, 128], strides = [1, 1]} : vector<16x2048xf32> to vector<16x128xf32>
    %409 = arith.mulf %407, %408 : vector<16x128xf32>
    %410 = arith.addf %406, %409 : vector<16x128xf32>
    %411 = vector.extract_strided_slice %390 {offsets = [0, 512], sizes = [16, 128], strides = [1, 1]} : vector<16x2048xf32> to vector<16x128xf32>
    %412 = vector.extract_strided_slice %395 {offsets = [0, 512], sizes = [16, 128], strides = [1, 1]} : vector<16x2048xf32> to vector<16x128xf32>
    %413 = arith.mulf %411, %412 : vector<16x128xf32>
    %414 = arith.addf %410, %413 : vector<16x128xf32>
    %415 = vector.extract_strided_slice %390 {offsets = [0, 640], sizes = [16, 128], strides = [1, 1]} : vector<16x2048xf32> to vector<16x128xf32>
    %416 = vector.extract_strided_slice %395 {offsets = [0, 640], sizes = [16, 128], strides = [1, 1]} : vector<16x2048xf32> to vector<16x128xf32>
    %417 = arith.mulf %415, %416 : vector<16x128xf32>
    %418 = arith.addf %414, %417 : vector<16x128xf32>
    %419 = vector.extract_strided_slice %390 {offsets = [0, 768], sizes = [16, 128], strides = [1, 1]} : vector<16x2048xf32> to vector<16x128xf32>
    %420 = vector.extract_strided_slice %395 {offsets = [0, 768], sizes = [16, 128], strides = [1, 1]} : vector<16x2048xf32> to vector<16x128xf32>
    %421 = arith.mulf %419, %420 : vector<16x128xf32>
    %422 = arith.addf %418, %421 : vector<16x128xf32>
    %423 = vector.extract_strided_slice %390 {offsets = [0, 896], sizes = [16, 128], strides = [1, 1]} : vector<16x2048xf32> to vector<16x128xf32>
    %424 = vector.extract_strided_slice %395 {offsets = [0, 896], sizes = [16, 128], strides = [1, 1]} : vector<16x2048xf32> to vector<16x128xf32>
    %425 = arith.mulf %423, %424 : vector<16x128xf32>
    %426 = arith.addf %422, %425 : vector<16x128xf32>
    %427 = vector.extract_strided_slice %390 {offsets = [0, 1024], sizes = [16, 128], strides = [1, 1]} : vector<16x2048xf32> to vector<16x128xf32>
    %428 = vector.extract_strided_slice %395 {offsets = [0, 1024], sizes = [16, 128], strides = [1, 1]} : vector<16x2048xf32> to vector<16x128xf32>
    %429 = arith.mulf %427, %428 : vector<16x128xf32>
    %430 = arith.addf %426, %429 : vector<16x128xf32>
    %431 = vector.extract_strided_slice %390 {offsets = [0, 1152], sizes = [16, 128], strides = [1, 1]} : vector<16x2048xf32> to vector<16x128xf32>
    %432 = vector.extract_strided_slice %395 {offsets = [0, 1152], sizes = [16, 128], strides = [1, 1]} : vector<16x2048xf32> to vector<16x128xf32>
    %433 = arith.mulf %431, %432 : vector<16x128xf32>
    %434 = arith.addf %430, %433 : vector<16x128xf32>
    %435 = vector.extract_strided_slice %390 {offsets = [0, 1280], sizes = [16, 128], strides = [1, 1]} : vector<16x2048xf32> to vector<16x128xf32>
    %436 = vector.extract_strided_slice %395 {offsets = [0, 1280], sizes = [16, 128], strides = [1, 1]} : vector<16x2048xf32> to vector<16x128xf32>
    %437 = arith.mulf %435, %436 : vector<16x128xf32>
    %438 = arith.addf %434, %437 : vector<16x128xf32>
    %439 = vector.extract_strided_slice %390 {offsets = [0, 1408], sizes = [16, 128], strides = [1, 1]} : vector<16x2048xf32> to vector<16x128xf32>
    %440 = vector.extract_strided_slice %395 {offsets = [0, 1408], sizes = [16, 128], strides = [1, 1]} : vector<16x2048xf32> to vector<16x128xf32>
    %441 = arith.mulf %439, %440 : vector<16x128xf32>
    %442 = arith.addf %438, %441 : vector<16x128xf32>
    %443 = vector.extract_strided_slice %390 {offsets = [0, 1536], sizes = [16, 128], strides = [1, 1]} : vector<16x2048xf32> to vector<16x128xf32>
    %444 = vector.extract_strided_slice %395 {offsets = [0, 1536], sizes = [16, 128], strides = [1, 1]} : vector<16x2048xf32> to vector<16x128xf32>
    %445 = arith.mulf %443, %444 : vector<16x128xf32>
    %446 = arith.addf %442, %445 : vector<16x128xf32>
    %447 = vector.extract_strided_slice %390 {offsets = [0, 1664], sizes = [16, 128], strides = [1, 1]} : vector<16x2048xf32> to vector<16x128xf32>
    %448 = vector.extract_strided_slice %395 {offsets = [0, 1664], sizes = [16, 128], strides = [1, 1]} : vector<16x2048xf32> to vector<16x128xf32>
    %449 = arith.mulf %447, %448 : vector<16x128xf32>
    %450 = arith.addf %446, %449 : vector<16x128xf32>
    %451 = vector.extract_strided_slice %390 {offsets = [0, 1792], sizes = [16, 128], strides = [1, 1]} : vector<16x2048xf32> to vector<16x128xf32>
    %452 = vector.extract_strided_slice %395 {offsets = [0, 1792], sizes = [16, 128], strides = [1, 1]} : vector<16x2048xf32> to vector<16x128xf32>
    %453 = arith.mulf %451, %452 : vector<16x128xf32>
    %454 = arith.addf %450, %453 : vector<16x128xf32>
    %455 = vector.extract_strided_slice %390 {offsets = [0, 1920], sizes = [16, 128], strides = [1, 1]} : vector<16x2048xf32> to vector<16x128xf32>
    %456 = vector.extract_strided_slice %395 {offsets = [0, 1920], sizes = [16, 128], strides = [1, 1]} : vector<16x2048xf32> to vector<16x128xf32>
    %457 = arith.mulf %455, %456 : vector<16x128xf32>
    %458 = arith.addf %454, %457 : vector<16x128xf32>
    %459 = arith.truncf %458 : vector<16x128xf32> to vector<16x128xbf16>
    %c0_147 = arith.constant 0 : index
    %c0_148 = arith.constant 0 : index
    %460 = vector.load %arg17[%c0_147, %c0_148] : memref<128x384xbf16, #tpu.memory_space<vmem>>, vector<128x384xbf16>
    %cst_149 = arith.constant dense<0.000000e+00> : vector<16x384xf32>
    %461 = tpu.matmul %459, %460, %cst_149 {dimension_numbers = #tpu.dot_dimension_numbers<[1], [0], [0], [1], [0, 0, 1, 1], [], []>} : vector<16x128xbf16>, vector<128x384xbf16>, vector<16x384xf32> -> vector<16x384xf32>
    %c0_150 = arith.constant 0 : index
    %c0_151 = arith.constant 0 : index
    %462 = vector.load %arg18[%c0_150, %c0_151] : memref<128x384xbf16, #tpu.memory_space<vmem>>, vector<128x384xbf16>
    %cst_152 = arith.constant dense<0.000000e+00> : vector<16x384xf32>
    %463 = tpu.matmul %385, %462, %cst_152 {dimension_numbers = #tpu.dot_dimension_numbers<[1], [0], [0], [1], [0, 0, 1, 1], [], []>} : vector<16x128xbf16>, vector<128x384xbf16>, vector<16x384xf32> -> vector<16x384xf32>
    %464 = arith.addf %461, %463 : vector<16x384xf32>
    %c0_153 = arith.constant 0 : index
    %c0_154 = arith.constant 0 : index
    %465 = vector.load %arg19[%c0_153, %c0_154] : memref<1x384xf32, #tpu.memory_space<vmem>>, vector<1x384xf32>
    %466 = vector.broadcast %465 : vector<1x384xf32> to vector<16x384xf32>
    %467 = arith.addf %464, %466 : vector<16x384xf32>
    %468 = vector.extract_strided_slice %467 {offsets = [0, 256], sizes = [16, 128], strides = [1, 1]} : vector<16x384xf32> to vector<16x128xf32>
    %cst_155 = arith.constant 5.000000e-01 : f32
    %469 = vector.broadcast %cst_155 : f32 to vector<16x128xf32>
    %470 = arith.mulf %469, %468 : vector<16x128xf32>
    %cst_156 = arith.constant 0.707106769 : f32
    %471 = vector.broadcast %cst_156 : f32 to vector<16x128xf32>
    %472 = arith.mulf %468, %471 : vector<16x128xf32>
    %cst_157 = arith.constant 0.000000e+00 : f32
    %473 = vector.broadcast %cst_157 : f32 to vector<16x128xf32>
    %474 = arith.cmpf olt, %472, %473 : vector<16x128xf32>
    %cst_158 = arith.constant -1.000000e+00 : f32
    %cst_159 = arith.constant 1.000000e+00 : f32
    %475 = vector.broadcast %cst_158 : f32 to vector<16x128xf32>
    %476 = vector.broadcast %cst_159 : f32 to vector<16x128xf32>
    %477 = arith.select %474, %475, %476 : vector<16x128xi1>, vector<16x128xf32>
    %478 = math.absf %472 : vector<16x128xf32>
    %cst_160 = arith.constant 0.327591091 : f32
    %479 = vector.broadcast %cst_160 : f32 to vector<16x128xf32>
    %480 = arith.mulf %479, %478 : vector<16x128xf32>
    %cst_161 = arith.constant 1.000000e+00 : f32
    %481 = vector.broadcast %cst_161 : f32 to vector<16x128xf32>
    %482 = arith.addf %481, %480 : vector<16x128xf32>
    %cst_162 = arith.constant 1.000000e+00 : f32
    %483 = vector.broadcast %cst_162 : f32 to vector<16x128xf32>
    %484 = arith.divf %483, %482 : vector<16x128xf32>
    %cst_163 = arith.constant 1.06140542 : f32
    %485 = vector.broadcast %cst_163 : f32 to vector<16x128xf32>
    %486 = arith.mulf %485, %484 : vector<16x128xf32>
    %cst_164 = arith.constant -1.45315206 : f32
    %487 = vector.broadcast %cst_164 : f32 to vector<16x128xf32>
    %488 = arith.addf %486, %487 : vector<16x128xf32>
    %489 = arith.mulf %488, %484 : vector<16x128xf32>
    %cst_165 = arith.constant 1.42141378 : f32
    %490 = vector.broadcast %cst_165 : f32 to vector<16x128xf32>
    %491 = arith.addf %489, %490 : vector<16x128xf32>
    %492 = arith.mulf %491, %484 : vector<16x128xf32>
    %cst_166 = arith.constant -0.284496725 : f32
    %493 = vector.broadcast %cst_166 : f32 to vector<16x128xf32>
    %494 = arith.addf %492, %493 : vector<16x128xf32>
    %495 = arith.mulf %494, %484 : vector<16x128xf32>
    %cst_167 = arith.constant 0.254829586 : f32
    %496 = vector.broadcast %cst_167 : f32 to vector<16x128xf32>
    %497 = arith.addf %495, %496 : vector<16x128xf32>
    %498 = arith.mulf %497, %484 : vector<16x128xf32>
    %cst_168 = arith.constant 0.000000e+00 : f32
    %499 = vector.broadcast %cst_168 : f32 to vector<16x128xf32>
    %500 = arith.subf %499, %478 : vector<16x128xf32>
    %501 = arith.mulf %500, %478 : vector<16x128xf32>
    %502 = math.exp %501 : vector<16x128xf32>
    %503 = arith.mulf %498, %502 : vector<16x128xf32>
    %cst_169 = arith.constant 1.000000e+00 : f32
    %504 = vector.broadcast %cst_169 : f32 to vector<16x128xf32>
    %505 = arith.subf %504, %503 : vector<16x128xf32>
    %506 = arith.mulf %477, %505 : vector<16x128xf32>
    %cst_170 = arith.constant 1.000000e+00 : f32
    %507 = vector.broadcast %cst_170 : f32 to vector<16x128xf32>
    %508 = arith.addf %507, %506 : vector<16x128xf32>
    %509 = arith.mulf %470, %508 : vector<16x128xf32>
    %510 = vector.extract_strided_slice %467 {offsets = [0, 0], sizes = [16, 128], strides = [1, 1]} : vector<16x384xf32> to vector<16x128xf32>
    %511 = arith.mulf %509, %510 : vector<16x128xf32>
    %512 = vector.extract_strided_slice %467 {offsets = [0, 128], sizes = [16, 128], strides = [1, 1]} : vector<16x384xf32> to vector<16x128xf32>
    %cst_171 = arith.constant 5.000000e-01 : f32
    %513 = vector.broadcast %cst_171 : f32 to vector<16x128xf32>
    %514 = arith.mulf %513, %512 : vector<16x128xf32>
    %cst_172 = arith.constant 0.707106769 : f32
    %515 = vector.broadcast %cst_172 : f32 to vector<16x128xf32>
    %516 = arith.mulf %512, %515 : vector<16x128xf32>
    %cst_173 = arith.constant 0.000000e+00 : f32
    %517 = vector.broadcast %cst_173 : f32 to vector<16x128xf32>
    %518 = arith.cmpf olt, %516, %517 : vector<16x128xf32>
    %cst_174 = arith.constant -1.000000e+00 : f32
    %cst_175 = arith.constant 1.000000e+00 : f32
    %519 = vector.broadcast %cst_174 : f32 to vector<16x128xf32>
    %520 = vector.broadcast %cst_175 : f32 to vector<16x128xf32>
    %521 = arith.select %518, %519, %520 : vector<16x128xi1>, vector<16x128xf32>
    %522 = math.absf %516 : vector<16x128xf32>
    %cst_176 = arith.constant 0.327591091 : f32
    %523 = vector.broadcast %cst_176 : f32 to vector<16x128xf32>
    %524 = arith.mulf %523, %522 : vector<16x128xf32>
    %cst_177 = arith.constant 1.000000e+00 : f32
    %525 = vector.broadcast %cst_177 : f32 to vector<16x128xf32>
    %526 = arith.addf %525, %524 : vector<16x128xf32>
    %cst_178 = arith.constant 1.000000e+00 : f32
    %527 = vector.broadcast %cst_178 : f32 to vector<16x128xf32>
    %528 = arith.divf %527, %526 : vector<16x128xf32>
    %cst_179 = arith.constant 1.06140542 : f32
    %529 = vector.broadcast %cst_179 : f32 to vector<16x128xf32>
    %530 = arith.mulf %529, %528 : vector<16x128xf32>
    %cst_180 = arith.constant -1.45315206 : f32
    %531 = vector.broadcast %cst_180 : f32 to vector<16x128xf32>
    %532 = arith.addf %530, %531 : vector<16x128xf32>
    %533 = arith.mulf %532, %528 : vector<16x128xf32>
    %cst_181 = arith.constant 1.42141378 : f32
    %534 = vector.broadcast %cst_181 : f32 to vector<16x128xf32>
    %535 = arith.addf %533, %534 : vector<16x128xf32>
    %536 = arith.mulf %535, %528 : vector<16x128xf32>
    %cst_182 = arith.constant -0.284496725 : f32
    %537 = vector.broadcast %cst_182 : f32 to vector<16x128xf32>
    %538 = arith.addf %536, %537 : vector<16x128xf32>
    %539 = arith.mulf %538, %528 : vector<16x128xf32>
    %cst_183 = arith.constant 0.254829586 : f32
    %540 = vector.broadcast %cst_183 : f32 to vector<16x128xf32>
    %541 = arith.addf %539, %540 : vector<16x128xf32>
    %542 = arith.mulf %541, %528 : vector<16x128xf32>
    %cst_184 = arith.constant 0.000000e+00 : f32
    %543 = vector.broadcast %cst_184 : f32 to vector<16x128xf32>
    %544 = arith.subf %543, %522 : vector<16x128xf32>
    %545 = arith.mulf %544, %522 : vector<16x128xf32>
    %546 = math.exp %545 : vector<16x128xf32>
    %547 = arith.mulf %542, %546 : vector<16x128xf32>
    %cst_185 = arith.constant 1.000000e+00 : f32
    %548 = vector.broadcast %cst_185 : f32 to vector<16x128xf32>
    %549 = arith.subf %548, %547 : vector<16x128xf32>
    %550 = arith.mulf %521, %549 : vector<16x128xf32>
    %cst_186 = arith.constant 1.000000e+00 : f32
    %551 = vector.broadcast %cst_186 : f32 to vector<16x128xf32>
    %552 = arith.addf %551, %550 : vector<16x128xf32>
    %553 = arith.mulf %514, %552 : vector<16x128xf32>
    %554 = arith.truncf %511 : vector<16x128xf32> to vector<16x128xbf16>
    %c0_187 = arith.constant 0 : index
    %c0_188 = arith.constant 0 : index
    %555 = vector.load %arg20[%c0_187, %c0_188] : memref<128x128xbf16, #tpu.memory_space<vmem>>, vector<128x128xbf16>
    %cst_189 = arith.constant dense<0.000000e+00> : vector<16x128xf32>
    %556 = tpu.matmul %554, %555, %cst_189 {dimension_numbers = #tpu.dot_dimension_numbers<[1], [0], [0], [1], [0, 0, 1, 1], [], []>} : vector<16x128xbf16>, vector<128x128xbf16>, vector<16x128xf32> -> vector<16x128xf32>
    %557 = arith.truncf %553 : vector<16x128xf32> to vector<16x128xbf16>
    %c0_190 = arith.constant 0 : index
    %c0_191 = arith.constant 0 : index
    %558 = vector.load %arg21[%c0_190, %c0_191] : memref<128x128xbf16, #tpu.memory_space<vmem>>, vector<128x128xbf16>
    %cst_192 = arith.constant dense<0.000000e+00> : vector<16x128xf32>
    %559 = tpu.matmul %557, %558, %cst_192 {dimension_numbers = #tpu.dot_dimension_numbers<[1], [0], [0], [1], [0, 0, 1, 1], [], []>} : vector<16x128xbf16>, vector<128x128xbf16>, vector<16x128xf32> -> vector<16x128xf32>
    %560 = arith.addf %556, %559 : vector<16x128xf32>
    %c0_193 = arith.constant 0 : index
    %c0_194 = arith.constant 0 : index
    %561 = vector.load %arg22[%c0_193, %c0_194] : memref<1x128xf32, #tpu.memory_space<vmem>>, vector<1x128xf32>
    %562 = vector.broadcast %561 : vector<1x128xf32> to vector<16x128xf32>
    %563 = arith.addf %560, %562 : vector<16x128xf32>
    %564 = arith.addf %342, %563 : vector<16x128xf32>
    %565 = vector.shape_cast %564 : vector<16x128xf32> to vector<2x8x128xf32>
    %c0_195 = arith.constant 0 : index
    %c0_196 = arith.constant 0 : index
    %c0_197 = arith.constant 0 : index
    %566 = vector.load %arg23[%c0_195, %c0_196, %c0_197] : memref<2x8x128xf32, #tpu.memory_space<vmem>>, vector<2x8x128xf32>
    tpu.vector_store %arg23[%c0_195, %c0_196, %c0_197], %565 {strides = array<i32>} : memref<2x8x128xf32, #tpu.memory_space<vmem>>, vector<2x8x128xf32>,
    return
  }
  func.func @transform_0(%arg0: i32) -> (i32, i32, i32) {
    %c0_i32 = arith.constant 0 : i32
    %c0_i32_0 = arith.constant 0 : i32
    %c0_i32_1 = arith.constant 0 : i32
    return %arg0, %c0_i32, %c0_i32_0 : i32, i32, i32
  }
  func.func @transform_1(%arg0: i32) -> (i32, i32, i32) {
    %c0_i32 = arith.constant 0 : i32
    %c0_i32_0 = arith.constant 0 : i32
    %c0_i32_1 = arith.constant 0 : i32
    return %arg0, %c0_i32, %c0_i32_0 : i32, i32, i32
  }
  func.func @transform_2(%arg0: i32) -> (i32, i32) {
    %c0_i32 = arith.constant 0 : i32
    %c0_i32_0 = arith.constant 0 : i32
    %c0_i32_1 = arith.constant 0 : i32
    return %c0_i32, %c0_i32_0 : i32, i32
  }
  func.func @transform_3(%arg0: i32) -> (i32, i32) {
    %c0_i32 = arith.constant 0 : i32
    %c0_i32_0 = arith.constant 0 : i32
    %c0_i32_1 = arith.constant 0 : i32
    return %c0_i32, %c0_i32_0 : i32, i32
  }
  func.func @transform_4(%arg0: i32) -> (i32, i32, i32) {
    %c0_i32 = arith.constant 0 : i32
    %c0_i32_0 = arith.constant 0 : i32
    %c0_i32_1 = arith.constant 0 : i32
    %c0_i32_2 = arith.constant 0 : i32
    return %c0_i32, %c0_i32_0, %c0_i32_1 : i32, i32, i32
  }
  func.func @transform_5(%arg0: i32) -> (i32, i32) {
    %c0_i32 = arith.constant 0 : i32
    %c0_i32_0 = arith.constant 0 : i32
    %c0_i32_1 = arith.constant 0 : i32
    return %c0_i32, %c0_i32_0 : i32, i32
  }
  func.func @transform_6(%arg0: i32) -> (i32, i32) {
    %c0_i32 = arith.constant 0 : i32
    %c0_i32_0 = arith.constant 0 : i32
    %c0_i32_1 = arith.constant 0 : i32
    return %c0_i32, %c0_i32_0 : i32, i32
  }
  func.func @transform_7(%arg0: i32) -> (i32, i32) {
    %c0_i32 = arith.constant 0 : i32
    %c0_i32_0 = arith.constant 0 : i32
    %c0_i32_1 = arith.constant 0 : i32
    return %c0_i32, %c0_i32_0 : i32, i32
  }
  func.func @transform_8(%arg0: i32) -> (i32, i32) {
    %c0_i32 = arith.constant 0 : i32
    %c0_i32_0 = arith.constant 0 : i32
    %c0_i32_1 = arith.constant 0 : i32
    return %c0_i32, %c0_i32_0 : i32, i32
  }
  func.func @transform_9(%arg0: i32) -> (i32, i32) {
    %c0_i32 = arith.constant 0 : i32
    %c0_i32_0 = arith.constant 0 : i32
    %c0_i32_1 = arith.constant 0 : i32
    return %c0_i32, %c0_i32_0 : i32, i32
  }
  func.func @transform_10(%arg0: i32) -> (i32, i32, i32) {
    %c0_i32 = arith.constant 0 : i32
    %c0_i32_0 = arith.constant 0 : i32
    %c0_i32_1 = arith.constant 0 : i32
    %c0_i32_2 = arith.constant 0 : i32
    return %c0_i32, %c0_i32_0, %c0_i32_1 : i32, i32, i32
  }
  func.func @transform_11(%arg0: i32) -> (i32, i32) {
    %c0_i32 = arith.constant 0 : i32
    %c0_i32_0 = arith.constant 0 : i32
    %c0_i32_1 = arith.constant 0 : i32
    return %c0_i32, %c0_i32_0 : i32, i32
  }
  func.func @transform_12(%arg0: i32) -> (i32, i32) {
    %c0_i32 = arith.constant 0 : i32
    %c0_i32_0 = arith.constant 0 : i32
    %c0_i32_1 = arith.constant 0 : i32
    return %c0_i32, %c0_i32_0 : i32, i32
  }
  func.func @transform_13(%arg0: i32) -> (i32, i32) {
    %c0_i32 = arith.constant 0 : i32
    %c0_i32_0 = arith.constant 0 : i32
    %c0_i32_1 = arith.constant 0 : i32
    return %c0_i32, %c0_i32_0 : i32, i32
  }
  func.func @transform_14(%arg0: i32) -> (i32, i32) {
    %c0_i32 = arith.constant 0 : i32
    %c0_i32_0 = arith.constant 0 : i32
    %c0_i32_1 = arith.constant 0 : i32
    return %c0_i32, %c0_i32_0 : i32, i32
  }
  func.func @transform_15(%arg0: i32) -> (i32, i32) {
    %c0_i32 = arith.constant 0 : i32
    %c0_i32_0 = arith.constant 0 : i32
    %c0_i32_1 = arith.constant 0 : i32
    return %c0_i32, %c0_i32_0 : i32, i32
  }
  func.func @transform_16(%arg0: i32) -> (i32, i32) {
    %c0_i32 = arith.constant 0 : i32
    %c0_i32_0 = arith.constant 0 : i32
    %c0_i32_1 = arith.constant 0 : i32
    return %c0_i32, %c0_i32_0 : i32, i32
  }
  func.func @transform_17(%arg0: i32) -> (i32, i32) {
    %c0_i32 = arith.constant 0 : i32
    %c0_i32_0 = arith.constant 0 : i32
    %c0_i32_1 = arith.constant 0 : i32
    return %c0_i32, %c0_i32_0 : i32, i32
  }
  func.func @transform_18(%arg0: i32) -> (i32, i32) {
    %c0_i32 = arith.constant 0 : i32
    %c0_i32_0 = arith.constant 0 : i32
    %c0_i32_1 = arith.constant 0 : i32
    return %c0_i32, %c0_i32_0 : i32, i32
  }
  func.func @transform_19(%arg0: i32) -> (i32, i32) {
    %c0_i32 = arith.constant 0 : i32
    %c0_i32_0 = arith.constant 0 : i32
    %c0_i32_1 = arith.constant 0 : i32
    return %c0_i32, %c0_i32_0 : i32, i32
  }
  func.func @transform_20(%arg0: i32) -> (i32, i32) {
    %c0_i32 = arith.constant 0 : i32
    %c0_i32_0 = arith.constant 0 : i32
    %c0_i32_1 = arith.constant 0 : i32
    return %c0_i32, %c0_i32_0 : i32, i32
  }
  func.func @transform_21(%arg0: i32) -> (i32, i32) {
    %c0_i32 = arith.constant 0 : i32
    %c0_i32_0 = arith.constant 0 : i32
    %c0_i32_1 = arith.constant 0 : i32
    return %c0_i32, %c0_i32_0 : i32, i32
  }
  func.func @transform_22(%arg0: i32) -> (i32, i32, i32) {
    %c0_i32 = arith.constant 0 : i32
    %c0_i32_0 = arith.constant 0 : i32
    %c0_i32_1 = arith.constant 0 : i32
    return %arg0, %c0_i32, %c0_i32_0 : i32, i32, i32
  }
}

</mosaic_0001>

<bundles_post_ra>
// kernel: _lambda_.1
= control target key start
LH: loop header
LB: loop body
LE: loop exit
PB: predicated region body
PF: predicated region fallthrough
CT: control target
= control target key end

     0   :  { %s8936_s0 = inlined_call_operand.vmem [shape: f32[2,8,128], index: 0, kind: input, shape index: {}]   ;;  %s8937_s1 = inlined_call_operand.vmem [shape: f32[2,6,128], index: 1, kind: input, shape index: {}]   ;;  %s8938_s2 = inlined_call_operand.hbm [shape: bf16[128,768], index: 2, kind: input, shape index: {}]   ;;  %s8939_s3 = inlined_call_operand.vmem [shape: f32[1,768], index: 3, kind: input, shape index: {}]   ;;  %s8940_s4 = inlined_call_operand.hbm [shape: bf16[2,128,128], index: 4, kind: input, shape index: {}]   ;;  %s8941_s5 = inlined_call_operand.vmem [shape: f32[1,128], index: 5, kind: input, shape index: {}, may-alias: {5,11,21}]   ;;  %s8942_s6 = inlined_call_operand.hbm [shape: bf16[128,256], index: 6, kind: input, shape index: {}]   ;;  %s8943_s7 = inlined_call_operand.vmem [shape: f32[1,256], index: 7, kind: input, shape index: {}]   ;;  %s8944_s8 = inlined_call_operand.vmem [shape: bf16[128,512], index: 8, kind: input, shape index: {}]   ;;  %s8945_s9 = inlined_call_operand.vmem [shape: f32[1,512], index: 9, kind: input, shape index: {}]   ;;  %s8946_s10 = inlined_call_operand.hbm [shape: bf16[2,128,128], index: 10, kind: input, shape index: {}]   ;;  %s8947_s11 = inlined_call_operand.vmem [shape: f32[1,128], index: 11, kind: input, shape index: {}, may-alias: {5,11,21}]   ;;  %s8948_s12 = inlined_call_operand.hbm [shape: bf16[128,2048], index: 12, kind: input, shape index: {}]   ;;  %s8949_s13 = inlined_call_operand.vmem [shape: f32[1,2048], index: 13, kind: input, shape index: {}, may-alias: {13,15}]   ;;  %s8950_s14 = inlined_call_operand.hbm [shape: bf16[128,2048], index: 14, kind: input, shape index: {}]   ;;  %s8951_s15 = inlined_call_operand.vmem [shape: f32[1,2048], index: 15, kind: input, shape index: {}, may-alias: {13,15}]   ;;  %s8952_s16 = inlined_call_operand.hbm [shape: bf16[128,384], index: 16, kind: input, shape index: {}]   ;;  %s8953_s17 = inlined_call_operand.hbm [shape: bf16[128,384], index: 17, kind: input, shape index: {}]   ;;  %s8954_s18 = inlined_call_operand.vmem [shape: f32[1,384], index: 18, kind: input, shape index: {}]   ;;  %s8955_s19 = inlined_call_operand.hbm [shape: bf16[128,128], index: 19, kind: input, shape index: {}]   ;;  %s8956_s20 = inlined_call_operand.vmem [shape: bf16[128,128], index: 20, kind: input, shape index: {}]   ;;  %s8957_s21 = inlined_call_operand.vmem [shape: f32[1,128], index: 21, kind: input, shape index: {}, may-alias: {5,11,21}]   ;;  %s8958_s22 = inlined_call_operand.vmem [shape: f32[2,8,128], index: 22, kind: output, shape index: {}]  }
   0x1   :  { %8990 = sst [smem:[#allocation34_spill]] %s8936_s0 }
   0x2   :  { %8991 = sst [smem:[#allocation35_spill]] %s8937_s1 }
   0x3   :  { %8992 = sst [smem:[#allocation36_spill]] %s8938_s2 }
   0x4   :  { %8993 = sst [smem:[#allocation37_spill]] %s8939_s3 }
   0x5   :  { %8994 = sst [smem:[#allocation38_spill]] %s8940_s4 }
   0x6   :  { %8995 = sst [smem:[#allocation39_spill]] %s8941_s5 }
   0x7   :  { %8996 = sst [smem:[#allocation40_spill]] %s8942_s6 }
   0x8   :  { %27 = vsyncpa [#allocation3], 0 }
   0x9   :  { %28 = vsyncpa [#allocation5], 0 }
   0xa   :  { %29 = vsyncpa [#allocation8], 0 }
   0xb   :  { %30 = vsyncpa [#allocation11], 0 }
   0xc   :  { %31 = vsyncpa [#allocation14], 0  ;;  %s7605_s3 = smov [#allocation4]  }
   0xd   :  { %s55_s28 = sshll.u32 %s7605_s3, 4  ;;  %s56_s28 = int_to_ptr.vmem [resolvable:$true] %s55_s28 }
   0xe   :  { %s7423_s29 = scalar_lea.vmem %s56_s28, 2048  ;;  %p7428_p1 = scmp.lt.s32.totalorder %s56_s28, %s56_s28 }
   0xf   :  { %p7424_p0 = scmp.ne.s32.totalorder %s56_s28, %s7423_s29  ;;  %p7429_p2 = scmp.lt.s32.totalorder %s7423_s29, %s7423_s29 }
  0x11   :  { %p7430_p3 = por %p7429_p2, %p7428_p1 }
  0x13   :  { %p7431_p4 = pnand %p7430_p3, %p7424_p0 }
  0x15   :  { %7434 = shalt.err (!%p7431_p4)
}
  0x16   :  { %s7606_s30 = smov 64   ;;  %s8961_s4 = smov 4  }
  0x17   :  { %s8997_s1 = sld [smem:[#allocation38_spill]]  ;;  %s7608_s5 = smov [#allocation7]  }
  0x18   :  { %s87_s24 = sshll.u32 %s7608_s5, 4  ;;  %s88_s24 = int_to_ptr.vmem [resolvable:$true] %s87_s24 }
  0x19   :  { %s7443_s6 = scalar_lea.vmem %s88_s24, 2048  ;;  %p7448_p6 = scmp.lt.s32.totalorder %s88_s24, %s88_s24 }
  0x1a   :  { %p7444_p5 = scmp.ne.s32.totalorder %s88_s24, %s7443_s6  ;;  %p7449_p7 = scmp.lt.s32.totalorder %s7443_s6, %s7443_s6 }
  0x1c   :  { %p7450_p8 = por %p7449_p7, %p7448_p6 }
  0x1d   :  { %61 = dma.hbm_to_vmem [thread:$0]  %s8997_s1, 2048, %s56_s28, [#allocation5], %s7606_s30, %s7606_s30, %s8961_s4  }
  0x1e   :  { %p7451_p9 = pnand %p7450_p8, %p7444_p5 }
  0x20   :  { %7454 = shalt.err (!%p7451_p9)
}
  0x21   :  { %93 = dma.hbm_to_vmem [thread:$0]  %s8946_s10, 2048, %s88_s24, [#allocation8], %s7606_s30, %s7606_s30, %s8961_s4  }
  0x22   :  { %s7609_s2 = smov [#allocation10]  }
  0x23   :  { %s115_s27 = sshll.u32 %s7609_s2, 4  ;;  %s116_s27 = int_to_ptr.vmem [resolvable:$true] %s115_s27 }
  0x24   :  { %s7463_s3 = scalar_lea.vmem %s116_s27, 16384  ;;  %p7468_p11 = scmp.lt.s32.totalorder %s116_s27, %s116_s27 }
  0x25   :  { %p7464_p10 = scmp.ne.s32.totalorder %s116_s27, %s7463_s3  ;;  %p7469_p12 = scmp.lt.s32.totalorder %s7463_s3, %s7463_s3 }
  0x27   :  { %p7470_p13 = por %p7469_p12, %p7468_p11 }
  0x29   :  { %p7471_p0 = pnand %p7470_p13, %p7464_p10 }
  0x2b   :  { %7474 = shalt.err (!%p7471_p0)
}
  0x2c   :  { %s7610_s28 = smov 1024   ;;  %s7611_s23 = smov [#allocation13]  }
  0x2d   :  { %121 = dma.hbm_to_vmem [thread:$0]  %s8950_s14, 16384, %s116_s27, [#allocation11], %s7610_s28, %s7610_s28, %s7606_s30  }
  0x2e   :  { %s141_s10 = sshll.u32 %s7611_s23, 4  ;;  %s7612_s1 = smov [#allocation2]   ;;  %s142_s10 = int_to_ptr.vmem [resolvable:$true] %s141_s10 }
  0x2f   :  { %s41_s5 = sshll.u32 %s7612_s1, 4  ;;  %s7483_s24 = scalar_lea.vmem %s142_s10, 3072  ;;  %s42_s5 = int_to_ptr.vmem [resolvable:$true] %s41_s5 }
  0x30   :  { %p7484_p1 = scmp.ne.s32.totalorder %s142_s10, %s7483_s24  ;;  %p7488_p2 = scmp.lt.s32.totalorder %s142_s10, %s142_s10 }
  0x31   :  { %p7489_p3 = scmp.lt.s32.totalorder %s7483_s24, %s7483_s24 }
  0x33   :  { %p7490_p4 = por %p7489_p3, %p7488_p2 }
  0x35   :  { %p7491_p5 = pnand %p7490_p4, %p7484_p1 }
  0x37   :  { %7494 = shalt.err (!%p7491_p5)
}
  0x38   :  { %s8962_s6 = smov 192   ;;  %s8963_s25 = smov 12  }
  0x39   :  { %147 = dma.hbm_to_vmem [thread:$0]  %s8953_s17, 3072, %s142_s10, [#allocation14], %s8962_s6, %s8962_s6, %s8963_s25  }
  0x3a   :  { %s7503_s2 = scalar_lea.vmem %s42_s5, 6144  ;;  %p7508_p7 = scmp.lt.s32.totalorder %s42_s5, %s42_s5 }
  0x3b   :  { %p7504_p6 = scmp.ne.s32.totalorder %s42_s5, %s7503_s2  ;;  %p7509_p8 = scmp.lt.s32.totalorder %s7503_s2, %s7503_s2 }
  0x3d   :  { %p7510_p9 = por %p7509_p8, %p7508_p7 }
  0x3f   :  { %p7511_p10 = pnand %p7510_p9, %p7504_p6 }
  0x41   :  { %7514 = shalt.err (!%p7511_p10)
}
  0x42   :  { %s7615_s27 = smov 384   ;;  %s7616_s3 = smov 24  }
  0x43   :  { %s8998_s23 = sld [smem:[#allocation36_spill]]  ;;  %s7617_s1 = smov [#allocation6]  }
  0x44   :  { %s69_s24 = sshll.u32 %s7617_s1, 4  ;;  %s70_s24 = int_to_ptr.vmem [resolvable:$true] %s69_s24 }
  0x45   :  { %s7523_s4 = scalar_lea.vmem %s70_s24, 2048  ;;  %p7528_p12 = scmp.lt.s32.totalorder %s70_s24, %s70_s24 }
  0x46   :  { %p7524_p11 = scmp.ne.s32.totalorder %s70_s24, %s7523_s4  ;;  %p7529_p13 = scmp.lt.s32.totalorder %s7523_s4, %s7523_s4 }
  0x48   :  { %p7530_p0 = por %p7529_p13, %p7528_p12 }
  0x49   :  { %47 = dma.hbm_to_vmem [thread:$0]  %s8998_s23, 6144, %s42_s5, [#allocation3], %s7615_s27, %s7615_s27, %s7616_s3  }
  0x4a   :  { %p7531_p1 = pnand %p7530_p0, %p7524_p11 }
  0x4c   :  { %7534 = shalt.err (!%p7531_p1)
}
  0x4d   :  { %s7618_s17 = smov 128   ;;  %s7619_s10 = smov 8  }
  0x4e   :  { %s8999_s2 = sld [smem:[#allocation40_spill]]  ;;  %s7620_s6 = smov [#allocation9]  }
  0x4f   :  { %s101_s25 = sshll.u32 %s7620_s6, 4  ;;  %s7621_s5 = smov [#allocation12]   ;;  %s102_s25 = int_to_ptr.vmem [resolvable:$true] %s101_s25 }
  0x50   :  { %s129_s27 = sshll.u32 %s7621_s5, 4  ;;  %s7543_s3 = scalar_lea.vmem %s102_s25, 16384  ;;  %s130_s27 = int_to_ptr.vmem [resolvable:$true] %s129_s27 }
  0x51   :  { %p7544_p2 = scmp.ne.s32.totalorder %s102_s25, %s7543_s3  ;;  %p7548_p3 = scmp.lt.s32.totalorder %s102_s25, %s102_s25 }
  0x52   :  { %p7549_p4 = scmp.lt.s32.totalorder %s7543_s3, %s7543_s3 }
  0x54   :  { %75 = dma.hbm_to_vmem [thread:$0]  %s8999_s2, 2048, %s70_s24, [#allocation5], %s7618_s17, %s7618_s17, %s7619_s10  }
  0x55   :  { %p7550_p5 = por %p7549_p4, %p7548_p3 }
  0x57   :  { %p7551_p6 = pnand %p7550_p5, %p7544_p2 }
  0x59   :  { %7554 = shalt.err (!%p7551_p6)
}
  0x5a   :  { %107 = dma.hbm_to_vmem [thread:$0]  %s8948_s12, 16384, %s102_s25, [#allocation8], %s7610_s28, %s7610_s28, %s7606_s30  }
  0x5b   :  { %s7563_s0 = scalar_lea.vmem %s130_s27, 3072  ;;  %p7568_p8 = scmp.lt.s32.totalorder %s130_s27, %s130_s27 }
  0x5c   :  { %p7564_p7 = scmp.ne.s32.totalorder %s130_s27, %s7563_s0  ;;  %p7569_p9 = scmp.lt.s32.totalorder %s7563_s0, %s7563_s0 }
  0x5e   :  { %p7570_p10 = por %p7569_p9, %p7568_p8 }
  0x60   :  { %p7571_p11 = pnand %p7570_p10, %p7564_p7 }
  0x62   :  { %7574 = shalt.err (!%p7571_p11)
}
  0x63   :  { %s9000_s6 = smov 12   ;;  %s9001_s23 = smov 192  }
  0x64   :  { %135 = dma.hbm_to_vmem [thread:$0]  %s8952_s16, 3072, %s130_s27, [#allocation11], %s9001_s23, %s9001_s23, %s9000_s6  }
  0x65   :  { %s7622_s17 = smov [#allocation15]  }
  0x66   :  { %s155_s10 = sshll.u32 %s7622_s17, 4  ;;  %s156_s10 = int_to_ptr.vmem [resolvable:$true] %s155_s10 }
  0x67   :  { %s7583_s26 = scalar_lea.vmem %s156_s10, 1024  ;;  %p7588_p13 = scmp.lt.s32.totalorder %s156_s10, %s156_s10 }
  0x68   :  { %p7584_p12 = scmp.ne.s32.totalorder %s156_s10, %s7583_s26  ;;  %p7589_p0 = scmp.lt.s32.totalorder %s7583_s26, %s7583_s26 }
  0x6a   :  { %p7590_p1 = por %p7589_p0, %p7588_p13 }
  0x6c   :  { %p7591_p2 = pnand %p7590_p1, %p7584_p12 }
  0x6e   :  { %7594 = shalt.err (!%p7591_p2)
}
  0x6f   :  { %s9002_s12 = smov 4  }
  0x70   :  { %161 = dma.hbm_to_vmem [thread:$0]  %s8955_s19, 1024, %s156_s10, [#allocation14], %s7606_s30, %s7606_s30, %s9002_s12  }
  0x71   :  { %7595 = dma.done.wait [#allocation3], 6144  }
  0x72   :  { %7596 = vsyncadd [#allocation3], 4294961152 }
  0x73   :  { %7597 = dma.done.wait [#allocation5], 4096  }
  0x74   :  { %7598 = vsyncadd [#allocation5], 4294963200 }
  0x75   :  { %7599 = dma.done.wait [#allocation8], 18432  }
  0x76   :  { %7600 = vsyncadd [#allocation8], 4294948864 }
  0x77   :  { %7601 = dma.done.wait [#allocation11], 19456  }
  0x78   :  { %7602 = vsyncadd [#allocation11], 4294947840 }
  0x79   :  { %7603 = dma.done.wait [#allocation14], 4096  }
  0x7a   :  { %7604 = vsyncadd [#allocation14], 4294963200  ;;  %v198_v0 = vlaneseq  ;;  %v8966_v2 = vmov 0.0   ;;  %s9003_s30 = sld [smem:[#allocation34_spill]]  ;;  %v7077_v13 = vld [vmem:[#allocation2 + $0x154] ss:$24 sps:$4 sm:$0xff]  }
  0x7b   :  { %573 = vmatprep.subr.bf16.mxu0 %v7077_v13  ;;  %v7079_v14 = vld [vmem:[#allocation2 + $0x150] ss:$24 sps:$4 sm:$0xff]   ;;  %v7080_v15 = vld [vmem:[#allocation2 + $0x15c] ss:$24 sps:$4 sm:$0xff]   ;;  %v7085_v28 = vld [vmem:[#allocation2 + $0x120] ss:$24 sps:$4 sm:$0xff]  }
  0x7c   :  { %v199_v1 = vand.u32 127, %v198_v0  ;;  %v7082_v16 = vld [vmem:[#allocation2 + $0x158] ss:$24 sps:$4 sm:$0xff]   ;;  %v7083_v17 = vld [vmem:[#allocation2 + $0x124] ss:$24 sps:$4 sm:$0xff]   ;;  %574 = vmatpush1.bf16.msra.mxu0 %v7079_v14  ;;  %616 = vmatprep.subr.bf16.mxu1 %v7080_v15  ;;  %v8964_v49 = vmov 0  }
  0x7d   :  { %617 = vmatpush1.bf16.msra.mxu1 %v7082_v16  ;;  %575 = vmatprep.subr.bf16.mxu0 %v7083_v17  ;;  %v7086_v29 = vld [vmem:[#allocation2 + $0x12c] ss:$24 sps:$4 sm:$0xff]   ;;  %v7088_v30 = vld [vmem:[#allocation2 + $0x128] ss:$24 sps:$4 sm:$0xff]   ;;  %v7092_v33 = vld [vmem:[#allocation2 + $0xfc] ss:$24 sps:$4 sm:$0xff]  }
  0x7e   :  { %vm203_vm0 = vcmp.ge.s32.totalorder %v199_v1, 64  ;;  %vm204_vm1 = vcmp.lt.s32.totalorder %v199_v1, 68  ;;  %vm200_vm3 = vcmp.lt.s32.totalorder %v199_v1, 64  ;;  %618 = vmatprep.subr.bf16.mxu1 %v7086_v29  ;;  %v7089_v31 = vld [vmem:[#allocation2 + $0xf4] ss:$24 sps:$4 sm:$0xff]   ;;  %605 = vmatprep.mubr.bf16.mxu0 %v8964_v49  ;;  %vm7625_vm4 = vmmov 0  }
  0x7f   :  { %vm205_vm2 = vmand %vm203_vm0, %vm204_vm1  ;;  %v7803_v8 = vsel %vm200_vm3, 1.0, %v8966_v2  ;;  %v7091_v32 = vld [vmem:[#allocation2 + $0xf0] ss:$24 sps:$4 sm:$0xff]   ;;  %v7095_v35 = vld [vmem:[#allocation2 + $0xc4] ss:$24 sps:$4 sm:$0xff]   ;;  %648 = vmatprep.mubr.bf16.mxu1 %v8964_v49  ;;  %s9006_s3 = sld [smem:[#allocation37_spill]] }
  0x80   :  { %v7792_v3 = vsel %vm205_vm2, 1.0, %v8966_v2  ;;  %v194_v4 = vld [vmem:[%s9003_s30] sm:$0xff]  ;;  %v195_v5 = vld [vmem:[%s9003_s30 + $0x8] sm:$0xff]  ;;  %576 = vmatpush1.bf16.msra.mxu0 %v7085_v28  ;;  %v7094_v34 = vld [vmem:[#allocation2 + $0xf8] ss:$24 sps:$4 sm:$0xff]   ;;  %vm764_vm5 = vcmask 1043456  }
  0x81   :  { %v218_v6 = vmul.f32 %v7792_v3, %v194_v4  ;;  %v219_v7 = vmul.f32 %v7792_v3, %v195_v5  ;;  %v7806_v9 = vmul.f32 %v7803_v8, %v194_v4  ;;  %v7811_v11 = vmul.f32 %v7803_v8, %v195_v5  ;;  %619 = vmatpush1.bf16.msra.mxu1 %v7088_v30  ;;  %v7097_v36 = vld [vmem:[#allocation2 + $0xc0] ss:$24 sps:$4 sm:$0xff]   ;;  %v7098_v37 = vld [vmem:[#allocation2 + $0xcc] ss:$24 sps:$4 sm:$0xff]   ;;  %v7103_v40 = vld [vmem:[#allocation2 + $0x90] ss:$24 sps:$4 sm:$0xff]  }
  0x82   :  { %577 = vmatprep.subr.bf16.mxu0 %v7089_v31  ;;  %620 = vmatprep.subr.bf16.mxu1 %v7092_v33  ;;  %v7100_v38 = vld [vmem:[#allocation2 + $0xc8] ss:$24 sps:$4 sm:$0xff]   ;;  %v7101_v39 = vld [vmem:[#allocation2 + $0x94] ss:$24 sps:$4 sm:$0xff]   ;;  %v7106_v42 = vld [vmem:[#allocation2 + $0x98] ss:$24 sps:$4 sm:$0xff]  }
  0x83   :  { %220 = vadd.xlane.f32.xlu0 %v218_v6  ;;  %v210_v10 = vmul.f32 %v7806_v9, %v7806_v9  ;;  %v211_v12 = vmul.f32 %v7811_v11, %v7811_v11  ;;  %v7104_v41 = vld [vmem:[#allocation2 + $0x9c] ss:$24 sps:$4 sm:$0xff]   ;;  %v7110_v44 = vld [vmem:[#allocation2 + $0x6c] ss:$24 sps:$4 sm:$0xff]   ;;  %v7109_v45 = vld [vmem:[#allocation2 + $0x60] ss:$24 sps:$4 sm:$0xff]  }
  0x84   :  { %578 = vmatpush1.bf16.msra.mxu0 %v7091_v32  ;;  %v7107_v43 = vld [vmem:[#allocation2 + $0x64] ss:$24 sps:$4 sm:$0xff]   ;;  %v7112_v46 = vld [vmem:[#allocation2 + $0x68] ss:$24 sps:$4 sm:$0xff]   ;;  %v7113_v47 = vld [vmem:[#allocation2 + $0x34] ss:$24 sps:$4 sm:$0xff]  }
  0x85   :  { %212 = vadd.xlane.f32.xlu1 %v210_v10  ;;  %621 = vmatpush1.bf16.msra.mxu1 %v7094_v34  ;;  %v7116_v48 = vld [vmem:[#allocation2 + $0x3c] ss:$24 sps:$4 sm:$0xff]   ;;  %v7115_v50 = vld [vmem:[#allocation2 + $0x30] ss:$24 sps:$4 sm:$0xff]   ;;  %v7122_v53 = vld [vmem:[#allocation2 + $0xc] ss:$24 sps:$4 sm:$0xff]  }
  0x86   :  { %579 = vmatprep.subr.bf16.mxu0 %v7095_v35  ;;  %622 = vmatprep.subr.bf16.mxu1 %v7098_v37  ;;  %v7118_v51 = vld [vmem:[#allocation2 + $0x38] ss:$24 sps:$4 sm:$0xff]   ;;  %v7119_v52 = vld [vmem:[#allocation2 + $0x4] ss:$24 sps:$4 sm:$0xff]   ;;  %v7124_v55 = vld [vmem:[#allocation2 + $0x8] ss:$24 sps:$4 sm:$0xff]  }
  0x87   :  { %222 = vadd.xlane.f32.xlu0 %v219_v7  ;;  %v7121_v54 = vld [vmem:[#allocation2] ss:$24 sps:$4 sm:$0xff]   ;;  %v7127_v56 = vld [vmem:[#allocation2 + $0x164] ss:$24 sps:$4 sm:$0xff]   ;;  %v7142_v29 = vld [vmem:[#allocation2 + $0x74] ss:$24 sps:$4 sm:$0xff]  }
  0x88   :  { %580 = vmatpush1.bf16.msra.mxu0 %v7097_v36  ;;  %v7137_v28 = vld [vmem:[#allocation2 + $0xa0] ss:$24 sps:$4 sm:$0xff]   ;;  %v7140_v30 = vld [vmem:[#allocation2 + $0x70] ss:$24 sps:$4 sm:$0xff]   ;;  %v7145_v31 = vld [vmem:[#allocation2 + $0x44] ss:$24 sps:$4 sm:$0xff]  }
  0x89   :  { %214 = vadd.xlane.f32.xlu1 %v211_v12  ;;  %623 = vmatpush1.bf16.msra.mxu1 %v7100_v38  ;;  %v7143_v32 = vld [vmem:[#allocation2 + $0x40] ss:$24 sps:$4 sm:$0xff]   ;;  %v7148_v33 = vld [vmem:[#allocation2 + $0x14] ss:$24 sps:$4 sm:$0xff]   ;;  %v7146_v34 = vld [vmem:[#allocation2 + $0x10] ss:$24 sps:$4 sm:$0xff]  }
  0x8a   :  { %581 = vmatprep.subr.bf16.mxu0 %v7101_v39  ;;  %624 = vmatprep.subr.bf16.mxu1 %v7104_v41  ;;  %v7839_v35 = vshrl.u32 %v198_v0, 7  ;;  %v7847_v37 = vld [vmem:[%s9006_s3] sm:$0x3f]  ;;  %vm748_vm6 = vcmask 64512   ;;  %s9012_s23 = sld [smem:[#allocation35_spill]]  ;;  %vm1470_vm7 = vcmask 1045504  }
  0x8b   :  { %s9013_s17 = sld [smem:[#allocation39_spill]]  ;;  %vm2028_vm8 = vcmask 1042432   ;;  %vm2012_vm9 = vcmask 48128  }
  0x8c   :  { %582 = vmatpush1.bf16.msra.mxu0 %v7103_v40  ;;  %9004 = vst [vmem:[#allocation21_spill] sm:$0xff] %v7839_v35  ;;  %v7842_v36 = vsub.s32 2, %v7839_v35  ;;  %v7850_v38 = vsub.s32 1, %v7839_v35 }
  0x8d   :  { %625 = vmatpush1.bf16.msra.mxu1 %v7106_v42  ;;  %583 = vmatprep.subr.bf16.mxu0 %v7107_v43 }
  0x8e   :  { %626 = vmatprep.subr.bf16.mxu1 %v7110_v44  ;;  %9005 = vst [vmem:[#allocation22_spill] sm:$0xff] %v7842_v36  ;;  %9007 = vst [vmem:[#allocation23_spill] sm:$0xff] %v7850_v38  ;;  %v314_v41 = vrot.slane %v7847_v37, %v7842_v36  ;;  %v310_v0 = vrot.slane %v7847_v37, %v7850_v38  ;;  %v7859_v44 = vsub.s32 0, %v7839_v35 }
  0x90   :  { %584 = vmatpush1.bf16.msra.mxu0 %v7109_v45  ;;  %9008 = vst [vmem:[#allocation24_spill] sm:$0xff] %v7859_v44 }
  0x91   :  { %627 = vmatpush1.bf16.msra.mxu1 %v7112_v46  ;;  %585 = vmatprep.subr.bf16.mxu0 %v7113_v47 }
  0x92   :  { %628 = vmatprep.subr.bf16.mxu1 %v7116_v48 }
  0x94   :  { %586 = vmatpush1.bf16.msra.mxu0 %v7115_v50 }
  0x95   :  { %629 = vmatpush1.bf16.msra.mxu1 %v7118_v51  ;;  %587 = vmatprep.subr.bf16.mxu0 %v7119_v52 }
  0x96   :  { %630 = vmatprep.subr.bf16.mxu1 %v7122_v53 }
  0x98   :  { %588 = vmatpush1.bf16.msra.mxu0 %v7121_v54  ;;  %v306_v54 = vrot.slane %v7847_v37, %v7859_v44 }
  0x99   :  { %631 = vmatpush1.bf16.msra.mxu1 %v7124_v55  ;;  %659 = vmatprep.subr.bf16.mxu0 %v7127_v56 }
  0x9a   :  { %6719 = vmatprep.subr.bf16.mxu1 %v8966_v2 }
 0x10c   :  { %v221_v18 = vpop.xlane.xlu0 %220 }
 0x10d   :  { %v224_v19 = vmul.f32 0.25, %v221_v18 }
 0x10e   :  { %v213_v57 = vpop.xlane.xlu1 %212 }
 0x10f   :  { %v226_v20 = vsub.f32 %v194_v4, %v224_v19  ;;  %v216_v59 = vmul.f32 0.25, %v213_v57 }
 0x110   :  { %v223_v21 = vpop.xlane.xlu0 %222 }
 0x111   :  { %v225_v22 = vmul.f32 0.25, %v223_v21  ;;  %v7816_v23 = vmul.f32 %v7792_v3, %v226_v20  ;;  %v238_v63 = vadd.f32 0.01, %v216_v59  ;;  %v7125_v21 = vld [vmem:[#allocation2 + $0x160] ss:$24 sps:$4 sm:$0xff]   ;;  %v7875_v59 = vsub.s32 4, %v7839_v35 }
 0x112   :  { %v215_v58 = vpop.xlane.xlu1 %214 }
 0x113   :  { %v227_v24 = vsub.f32 %v195_v5, %v225_v22  ;;  %v230_v25 = vmul.f32 %v7816_v23, %v7816_v23  ;;  %v217_v60 = vmul.f32 0.25, %v215_v58  ;;  %9009 = vst [vmem:[#allocation25_spill] sm:$0xff] %v7875_v59 }
 0x115   :  { %232 = vadd.xlane.f32.xlu0 %v230_v25  ;;  %v7821_v26 = vmul.f32 %v7792_v3, %v227_v24  ;;  %v239_v4 = vadd.f32 0.01, %v217_v60  ;;  %v7130_v24 = vld [vmem:[#allocation2 + $0x134] ss:$24 sps:$4 sm:$0xff]   ;;  %v7128_v25 = vld [vmem:[#allocation2 + $0x130] ss:$24 sps:$4 sm:$0xff]  }
 0x116   :  { %v7878_v60 = vsub.s32 5, %v7839_v35 }
 0x117   :  { %v231_v27 = vmul.f32 %v7821_v26, %v7821_v26 }
 0x118   :  { %9010 = vst [vmem:[#allocation26_spill] sm:$0xff] %v7878_v60 }
 0x119   :  { %234 = vadd.xlane.f32.xlu1 %v231_v27  ;;  %v7131_v27 = vld [vmem:[#allocation2 + $0x100] ss:$24 sps:$4 sm:$0xff]  }
 0x19e   :  { %v233_v61 = vpop.xlane.xlu0 %232 }
 0x19f   :  { %v236_v62 = vmul.f32 0.25, %v233_v61 }
 0x1a1   :  { %v244_v1 = vadd.f32 1e-05, %v236_v62  ;;  %v322_v62 = vrot.slane %v7847_v37, %v7875_v59 }
 0x1a2   :  { %v235_v5 = vpop.xlane.xlu1 %234 }
 0x1a3   :  { %7333 = vrsqrt.f32 %v244_v1  ;;  %v237_v6 = vmul.f32 0.25, %v235_v5  ;;  %v326_v1 = vrot.slane %v7847_v37, %v7878_v60 }
 0x1a4   :  { %7335 = vrsqrt.f32 %v238_v63 }
 0x1a5   :  { %7337 = vrsqrt.f32 %v239_v4  ;;  %v245_v7 = vadd.f32 1e-05, %v237_v6 }
 0x1a7   :  { %7339 = vrsqrt.f32 %v245_v7 }
 0x1b0   :  { %v7334_v10 = vpop.eup %7333 }
 0x1b1   :  { %v7336_v12 = vpop.eup %7335  ;;  %v248_v14 = vmul.f32 %v7334_v10, %v7816_v23  ;;  %v7133_v23 = vld [vmem:[#allocation2 + $0x104] ss:$24 sps:$4 sm:$0xff]  }
 0x1b2   :  { %v7338_v13 = vpop.eup %7337  ;;  %v242_v16 = vmul.f32 %v7336_v12, %v7806_v9  ;;  %v7136_v9 = vld [vmem:[#allocation2 + $0xd4] ss:$24 sps:$4 sm:$0xff]  }
 0x1b3   :  { %v243_v17 = vmul.f32 %v7338_v13, %v7811_v11  ;;  %v7134_v11 = vld [vmem:[#allocation2 + $0xd0] ss:$24 sps:$4 sm:$0xff]  }
 0x1b4   :  { %v7340_v15 = vpop.eup %7339  ;;  %v250_v19 = vadd.f32 %v248_v14, %v242_v16 }
 0x1b5   :  { %v249_v18 = vmul.f32 %v7340_v15, %v7821_v26  ;;  %v7139_v26 = vld [vmem:[#allocation2 + $0xa4] ss:$24 sps:$4 sm:$0xff]  }
 0x1b7   :  { %v251_v20 = vadd.f32 %v249_v18, %v243_v17 }
 0x1b9   :  { %v300_v22 = vpack.c.bf16 %v251_v20, %v250_v19 }
 0x1bb   :  { %606 = vmatmul.mubr.bf16.vlgmr.msra.gmra.mxu0 %v300_v22  ;;  %649 = vmatmul.mubr.bf16.vlgmr.msra.gmra.mxu1 %v300_v22 }
 0x1bc   :  { %660 = vmatpush1.bf16.msra.mxu0 %v7125_v21  ;;  %691 = vmatprep.mubr.bf16.mxu0 %v8964_v49 }
 0x1bd   :  { %661 = vmatprep.subr.bf16.mxu0 %v7130_v24  ;;  %6721 = vmatprep.mubr.msk.bf16.mxu1 %vm7625_vm4, %v8966_v2 }
 0x1c0   :  { %662 = vmatpush1.bf16.msra.mxu0 %v7128_v25 }
 0x1c1   :  { %663 = vmatprep.subr.bf16.mxu0 %v7133_v23 }
 0x1c4   :  { %664 = vmatpush1.bf16.msra.mxu0 %v7131_v27 }
 0x1c5   :  { %665 = vmatprep.subr.bf16.mxu0 %v7136_v9 }
 0x1c8   :  { %666 = vmatpush1.bf16.msra.mxu0 %v7134_v11 }
 0x1c9   :  { %667 = vmatprep.subr.bf16.mxu0 %v7139_v26 }
 0x1cc   :  { %668 = vmatpush1.bf16.msra.mxu0 %v7137_v28 }
 0x1cd   :  { %669 = vmatprep.subr.bf16.mxu0 %v7142_v29 }
 0x1d0   :  { %670 = vmatpush1.bf16.msra.mxu0 %v7140_v30 }
 0x1d1   :  { %671 = vmatprep.subr.bf16.mxu0 %v7145_v31  ;;  %v7892_v31 = vsub.s32 3, %v7839_v35 }
 0x1d3   :  { %9011 = vst [vmem:[#allocation27_spill] sm:$0xff] %v7892_v31 }
 0x1d4   :  { %672 = vmatpush1.bf16.msra.mxu0 %v7143_v32  ;;  %v318_v32 = vrot.slane %v7847_v37, %v7892_v31 }
 0x1d5   :  { %673 = vmatprep.subr.bf16.mxu0 %v7148_v33 }
 0x1d8   :  { %674 = vmatpush1.bf16.msra.mxu0 %v7146_v34 }
 0x1d9   :  { %6743 = vmatprep.subr.bf16.mxu0 %v8966_v2 }
 0x1db   :  { %692 = vmatmul.mubr.bf16.vlgmr.msra.gmra.mxu0 %v300_v22 }
 0x1dc   :  { %6759 = vmatprep.mubr.msk.bf16.mxu0 %vm7625_vm4, %v8966_v2 }
 0x27b   :  { %v607_v39 = vpop.f32.mrf.mxu0  ;;  %v650_v40 = vpop.f32.mrf.mxu1 }
 0x27c   :  { %v651_v47 = vadd.f32 %v650_v40, %v314_v41  ;;  %v608_v57 = vadd.f32 %v607_v39, %v306_v54 }
 0x27d   :  { %v609_v42 = vpop.f32.mrf.mxu0  ;;  %v7854_v43 = vpop.f32.mrf.mxu1 }
 0x27e   :  { %v610_v51 = vadd.f32 %v609_v42, %v310_v0  ;;  %v653_v40 = vadd.f32 %v7854_v43, %v318_v32 }
 0x27f   :  { %v611_v45 = vpop.f32.mrf.mxu0  ;;  %v654_v46 = vpop.f32.mrf.mxu1 }
 0x280   :  { %v655_v48 = vadd.f32 %v654_v46, %v314_v41  ;;  %v612_v56 = vadd.f32 %v611_v45, %v306_v54 }
 0x281   :  { %v613_v50 = vpop.f32.mrf.mxu0  ;;  %v656_v21 = vpop.f32.mrf.mxu1 }
 0x282   :  { %v7861_v52 = vpack.c.bf16 %v655_v48, %v651_v47  ;;  %v614_v53 = vadd.f32 %v613_v50, %v310_v0  ;;  %v7869_v58 = vpack.c.bf16 %v612_v56, %v608_v57  ;;  %v657_v34 = vadd.f32 %v656_v21, %v318_v32  ;;  %v7958_v21 = vld [vmem:[#allocation4 + $0x20] sm:$0xff]  }
 0x284   :  { %v7865_v55 = vpack.c.bf16 %v614_v53, %v610_v51  ;;  %6720 = vmatpush3.bf16.xpose.msra.mxu1 %v7861_v52  ;;  %v7897_v42 = vpack.c.bf16 %v657_v34, %v653_v40 }
 0x285   :  { %6725 = vmatprep.subr.bf16.mxu1 %v8966_v2 }
 0x286   :  { %v1228_v32 = vrot.slane %v7897_v42, 4 }
 0x28b   :  { %6722 = vmatmul.mubr.bf16.vlgmr.msra.gmra.mxu1 %v7869_v58 }
 0x28c   :  { %6727 = vmatprep.mubr.msk.bf16.mxu1 %vm7625_vm4, %v8966_v2 }
 0x29b   :  { %v693_v61 = vpop.f32.mrf.mxu0 }
 0x29c   :  { %v694_v5 = vadd.f32 %v693_v61, %v322_v62 }
 0x29d   :  { %v695_v63 = vpop.f32.mrf.mxu0 }
 0x29e   :  { %v696_v10 = vadd.f32 %v695_v63, %v326_v1  ;;  %v7915_v63 = vld [vmem:[#allocation4 + $0x70] sm:$0xff]  }
 0x29f   :  { %v697_v4 = vpop.f32.mrf.mxu0 }
 0x2a0   :  { %v698_v6 = vadd.f32 %v697_v4, %v322_v62  ;;  %v7912_v62 = vld [vmem:[#allocation4 + $0x78] sm:$0xff]   ;;  %v7923_v4 = vld [vmem:[#allocation4 + $0x60] sm:$0xff]  }
 0x2a1   :  { %v699_v7 = vpop.f32.mrf.mxu0  ;;  %6744 = vmatpush3.bf16.msra.mxu0 %v7912_v62 }
 0x2a2   :  { %v706_v12 = vpack.c.bf16 %v698_v6, %v694_v5  ;;  %v700_v13 = vadd.f32 %v699_v7, %v326_v1  ;;  %6745 = vmatprep.subr.bf16.mxu0 %v8966_v2  ;;  %v7919_v1 = vld [vmem:[#allocation4 + $0x68] sm:$0xff]   ;;  %v7927_v5 = vld [vmem:[#allocation4 + $0x58] sm:$0xff]   ;;  %v7931_v6 = vld [vmem:[#allocation4 + $0x50] sm:$0xff]  }
 0x2a3   :  { %v7935_v7 = vld [vmem:[#allocation4 + $0x48] sm:$0xff]  }
 0x2a4   :  { %v1176_v14 = vrot.slane %v706_v12, 4  ;;  %v707_v15 = vpack.c.bf16 %v700_v13, %v696_v10  ;;  %v766_v16 = vsel %vm764_vm5, %v706_v12, 0  ;;  %v7939_v10 = vld [vmem:[#allocation4 + $0x40] sm:$0xff]  }
 0x2a5   :  { %6726 = vmatpush3.bf16.msra.mxu1 %v766_v16  ;;  %6746 = vmatpush3.bf16.msra.mxu0 %v7915_v63 }
 0x2a6   :  { %v1283_v17 = vrot.slane %v707_v15, 4  ;;  %6731 = vmatprep.subr.bf16.mxu1 %v8966_v2  ;;  %v881_v18 = vsel %vm764_vm5, %v707_v15, 0  ;;  %v7885_v19 = vsel %vm764_vm5, %v1176_v14, 0  ;;  %6747 = vmatprep.subr.bf16.mxu0 %v8966_v2  ;;  %v7944_v15 = vld [vmem:[#allocation4 + $0x38] sm:$0xff]  }
 0x2a8   :  { %v7887_v20 = vsel %vm764_vm5, %v1283_v17, 0  ;;  %v7948_v17 = vld [vmem:[#allocation4 + $0x30] sm:$0xff]  }
 0x2a9   :  { %6748 = vmatpush3.bf16.msra.mxu0 %v7919_v1 }
 0x2aa   :  { %6749 = vmatprep.subr.bf16.mxu0 %v8966_v2 }
 0x2ad   :  { %6750 = vmatpush3.bf16.msra.mxu0 %v7923_v4 }
 0x2ae   :  { %6751 = vmatprep.subr.bf16.mxu0 %v8966_v2 }
 0x2b1   :  { %6752 = vmatpush3.bf16.msra.mxu0 %v7927_v5 }
 0x2b2   :  { %6753 = vmatprep.subr.bf16.mxu0 %v8966_v2 }
 0x2b5   :  { %6754 = vmatpush3.bf16.msra.mxu0 %v7931_v6 }
 0x2b6   :  { %6755 = vmatprep.subr.bf16.mxu0 %v8966_v2 }
 0x2b9   :  { %6756 = vmatpush3.bf16.msra.mxu0 %v7935_v7 }
 0x2ba   :  { %6757 = vmatprep.subr.bf16.mxu0 %v8966_v2 }
 0x2bd   :  { %6758 = vmatpush3.bf16.msra.mxu0 %v7939_v10 }
 0x2be   :  { %6783 = vmatprep.subr.bf16.mxu0 %v8966_v2 }
 0x34b   :  { %v742_v22 = vpop.f32.mrf.mxu1 }
 0x34c   :  { %v749_v24 = vsel %vm748_vm6, %v742_v22, -inf }
 0x34d   :  { %750 = vmax.xlane.f32.xlu0 %v749_v24  ;;  %v6723_v25 = vpop.f32.mrf.mxu1  ;;  %v7966_v24 = vld [vmem:[#allocation4 + $0x10] sm:$0xff]  }
 0x34e   :  { %v7970_v25 = vld [vmem:[#allocation4 + $0x8] sm:$0xff]  }
 0x34f   :  { %v745_v23 = vpop.f32.mrf.mxu1 }
 0x350   :  { %v7974_v23 = vld [vmem:[#allocation4] sm:$0xff]  }
 0x351   :  { %v6724_v27 = vpop.f32.mrf.mxu1 }
 0x3d6   :  { %v751_v9 = vpop.xlane.xlu0 %750 }
 0x3d7   :  { %v752_v11 = vsub.f32 %v742_v22, %v751_v9  ;;  %v7962_v22 = vld [vmem:[#allocation4 + $0x18] sm:$0xff]  }
 0x3d9   :  { %v753_v26 = vmul.f32 1.442695, %v752_v11 }
 0x3db   :  { %7341 = vpow2.f32 %v753_v26  ;;  %v1121_v26 = vrot.slane %v7861_v52, 4  ;;  %v1225_v52 = vrot.slane %v7865_v55, 4 }
 0x3e8   :  { %v7342_v28 = vpop.eup %7341 }
 0x3e9   :  { %v755_v29 = vsel %vm748_vm6, %v7342_v28, 0.0 }
 0x3ea   :  { %756 = vadd.xlane.f32.xlu1 %v755_v29 }
 0x473   :  { %v757_v30 = vpop.xlane.xlu1 %756 }
 0x474   :  { %7343 = vrcp.f32 %v757_v30 }
 0x481   :  { %v7344_v33 = vpop.eup %7343 }
 0x482   :  { %v759_v39 = vmul.f32 %v7344_v33, %v7342_v28 }
 0x484   :  { %v760_v41 = vpack.c.bf16 %v759_v39, %v759_v39 }
 0x486   :  { %6728 = vmatmul.mubr.msk.bf16.vlgmr.msra.gmra.mxu1 %vm748_vm6, %v760_v41 }
 0x487   :  { %6732 = vmatpush3.bf16.xpose.msra.mxu1 %v7897_v42  ;;  %6733 = vmatprep.mubr.msk.bf16.mxu1 %vm7625_vm4, %v8966_v2 }
 0x488   :  { %6737 = vmatprep.subr.bf16.mxu1 %v8966_v2 }
 0x48e   :  { %6734 = vmatmul.mubr.bf16.vlgmr.msra.gmra.mxu1 %v7865_v55 }
 0x48f   :  { %6738 = vmatpush3.bf16.msra.mxu1 %v881_v18  ;;  %6739 = vmatprep.mubr.msk.bf16.mxu1 %vm7625_vm4, %v8966_v2  ;;  %v7954_v18 = vld [vmem:[#allocation4 + $0x28] sm:$0xff]  }
 0x490   :  { %6763 = vmatprep.subr.bf16.mxu1 %v8966_v2 }
 0x546   :  { %v7908_v37 = vpop.f32.mrf.mxu1 }
 0x547   :  { %v808_v27 = vpack.c.bf16 %v7908_v37, %v7908_v37 }
 0x548   :  { %v6729_v43 = vpop.f32.mrf.mxu1 }
 0x54a   :  { %v805_v0 = vpop.f32.mrf.mxu1 }
 0x54c   :  { %v6730_v45 = vpop.f32.mrf.mxu1 }
 0x54e   :  { %v859_v46 = vpop.f32.mrf.mxu1 }
 0x54f   :  { %v865_v47 = vsel %vm748_vm6, %v859_v46, -inf }
 0x550   :  { %866 = vmax.xlane.f32.xlu0 %v865_v47  ;;  %v6735_v48 = vpop.f32.mrf.mxu1 }
 0x552   :  { %v862_v50 = vpop.f32.mrf.mxu1 }
 0x554   :  { %v6736_v51 = vpop.f32.mrf.mxu1 }
 0x5d9   :  { %v867_v53 = vpop.xlane.xlu0 %866 }
 0x5da   :  { %v868_v54 = vsub.f32 %v859_v46, %v867_v53 }
 0x5dc   :  { %v869_v56 = vmul.f32 1.442695, %v868_v54 }
 0x5de   :  { %7345 = vpow2.f32 %v869_v56 }
 0x5eb   :  { %v7346_v57 = vpop.eup %7345 }
 0x5ec   :  { %v871_v61 = vsel %vm748_vm6, %v7346_v57, 0.0 }
 0x5ed   :  { %872 = vadd.xlane.f32.xlu1 %v871_v61 }
 0x676   :  { %v873_v12 = vpop.xlane.xlu1 %872 }
 0x677   :  { %7347 = vrcp.f32 %v873_v12  ;;  %v8026_v12 = vld [vmem:[%s9013_s17] ss:$0 sm:$0xff] }
 0x684   :  { %v7348_v13 = vpop.eup %7347 }
 0x685   :  { %v875_v14 = vmul.f32 %v7348_v13, %v7346_v57 }
 0x687   :  { %v876_v16 = vpack.c.bf16 %v875_v14, %v875_v14 }
 0x689   :  { %6740 = vmatmul.mubr.msk.bf16.vlgmr.msra.gmra.mxu1 %vm748_vm6, %v876_v16 }
 0x68a   :  { %6764 = vmatpush3.bf16.msra.mxu1 %v7944_v15  ;;  %6779 = vmatprep.mubr.msk.bf16.mxu1 %vm7625_vm4, %v8966_v2 }
 0x68b   :  { %6765 = vmatprep.subr.bf16.mxu1 %v8966_v2 }
 0x68e   :  { %6766 = vmatpush3.bf16.msra.mxu1 %v7948_v17 }
 0x68f   :  { %6767 = vmatprep.subr.bf16.mxu1 %v8966_v2 }
 0x692   :  { %6768 = vmatpush3.bf16.msra.mxu1 %v7954_v18 }
 0x693   :  { %6769 = vmatprep.subr.bf16.mxu1 %v8966_v2 }
 0x696   :  { %6770 = vmatpush3.bf16.msra.mxu1 %v7958_v21 }
 0x697   :  { %6771 = vmatprep.subr.bf16.mxu1 %v8966_v2 }
 0x69a   :  { %6772 = vmatpush3.bf16.msra.mxu1 %v7962_v22 }
 0x69b   :  { %6773 = vmatprep.subr.bf16.mxu1 %v8966_v2 }
 0x69e   :  { %6774 = vmatpush3.bf16.msra.mxu1 %v7966_v24 }
 0x69f   :  { %6775 = vmatprep.subr.bf16.mxu1 %v8966_v2 }
 0x6a2   :  { %6776 = vmatpush3.bf16.msra.mxu1 %v7970_v25 }
 0x6a3   :  { %6777 = vmatprep.subr.bf16.mxu1 %v8966_v2 }
 0x6a6   :  { %6778 = vmatpush3.bf16.msra.mxu1 %v7974_v23 }
 0x6a7   :  { %6789 = vmatprep.subr.bf16.mxu1 %v8966_v2 }
 0x6a9   :  { %6780 = vmatmul.mubr.bf16.vlgmr.msra.gmra.mxu1 %v808_v27 }
 0x6aa   :  { %6790 = vmatpush3.bf16.msra.mxu1 %v7885_v19  ;;  %6791 = vmatprep.mubr.msk.bf16.mxu1 %vm7625_vm4, %v8966_v2  ;;  %v1118_v19 = vrot.slane %v7869_v58, 4 }
 0x6ab   :  { %6801 = vmatprep.subr.bf16.mxu1 %v8966_v2 }
 0x749   :  { %v917_v9 = vpop.f32.mrf.mxu1 }
 0x74a   :  { %v923_v11 = vpack.c.bf16 %v917_v9, %v917_v9 }
 0x74b   :  { %v6741_v28 = vpop.f32.mrf.mxu1 }
 0x74c   :  { %6760 = vmatmul.mubr.bf16.vlgmr.msra.gmra.mxu0 %v923_v11 }
 0x74d   :  { %6784 = vmatpush3.bf16.xpose.msra.mxu0 %v1121_v26  ;;  %v920_v29 = vpop.f32.mrf.mxu1  ;;  %6785 = vmatprep.mubr.msk.bf16.mxu0 %vm7625_vm4, %v8966_v2 }
 0x74e   :  { %6795 = vmatprep.subr.bf16.mxu0 %v8966_v2 }
 0x74f   :  { %v6742_v30 = vpop.f32.mrf.mxu1 }
 0x754   :  { %6786 = vmatmul.mubr.bf16.vlgmr.msra.gmra.mxu0 %v1118_v19 }
 0x755   :  { %6796 = vmatpush3.bf16.xpose.msra.mxu0 %v1228_v32  ;;  %6797 = vmatprep.mubr.msk.bf16.mxu0 %vm7625_vm4, %v8966_v2 }
 0x756   :  { %6807 = vmatprep.subr.bf16.mxu0 %v8966_v2 }
 0x75c   :  { %6798 = vmatmul.mubr.bf16.vlgmr.msra.gmra.mxu0 %v1225_v52 }
 0x75d   :  { %6808 = vmatpush3.bf16.msra.mxu0 %v7912_v62  ;;  %6823 = vmatprep.mubr.msk.bf16.mxu0 %vm7625_vm4, %v8966_v2 }
 0x75e   :  { %6809 = vmatprep.subr.bf16.mxu0 %v8966_v2 }
 0x761   :  { %6810 = vmatpush3.bf16.msra.mxu0 %v7915_v63 }
 0x762   :  { %6811 = vmatprep.subr.bf16.mxu0 %v8966_v2 }
 0x765   :  { %6812 = vmatpush3.bf16.msra.mxu0 %v7919_v1 }
 0x766   :  { %6813 = vmatprep.subr.bf16.mxu0 %v8966_v2 }
 0x769   :  { %v1111_v58 = vpop.f32.mrf.mxu1  ;;  %6814 = vmatpush3.bf16.msra.mxu0 %v7923_v4 }
 0x76a   :  { %6815 = vmatprep.subr.bf16.mxu0 %v8966_v2 }
 0x76b   :  { %v6781_v55 = vpop.f32.mrf.mxu1 }
 0x76d   :  { %v1114_v33 = vpop.f32.mrf.mxu1  ;;  %6816 = vmatpush3.bf16.msra.mxu0 %v7927_v5 }
 0x76e   :  { %6817 = vmatprep.subr.bf16.mxu0 %v8966_v2 }
 0x76f   :  { %v6782_v34 = vpop.f32.mrf.mxu1 }
 0x771   :  { %6818 = vmatpush3.bf16.msra.mxu0 %v7931_v6  ;;  %v7413_v6 = vld [vmem:[%s9003_s30] sm:$0xff] }
 0x772   :  { %6819 = vmatprep.subr.bf16.mxu0 %v8966_v2 }
 0x775   :  { %6820 = vmatpush3.bf16.msra.mxu0 %v7935_v7 }
 0x776   :  { %6821 = vmatprep.subr.bf16.mxu0 %v8966_v2 }
 0x779   :  { %6822 = vmatpush3.bf16.msra.mxu0 %v7939_v10  ;;  %v8021_v10 = vld [vmem:[%s9012_s23] sm:$0x3f] }
 0x77a   :  { %v8030_v13 = vmul.f32 %v7803_v8, %v8021_v10 }
 0x77c   :  { %v1468_v9 = vmul.f32 %v8030_v13, %v8030_v13 }
 0x77e   :  { %v1471_v26 = vsel %vm1470_vm7, %v1468_v9, 0.0 }
 0x80c   :  { %v1023_v39 = vpop.f32.mrf.mxu0 }
 0x80d   :  { %v1112_v4 = vadd.f32 %v1111_v58, %v1023_v39 }
 0x80e   :  { %v6761_v40 = vpop.f32.mrf.mxu0 }
 0x80f   :  { %v1411_v7 = vadd.f32 %v7413_v6, %v1112_v4  ;;  %v7414_v4 = vld [vmem:[%s9003_s30 + $0x8] sm:$0xff] }
 0x810   :  { %v1026_v41 = vpop.f32.mrf.mxu0 }
 0x811   :  { %v8033_v16 = vadd.f32 %v8026_v12, %v1411_v7 }
 0x812   :  { %v6762_v42 = vpop.f32.mrf.mxu0 }
 0x813   :  { %v1432_v11 = vmul.f32 %v7792_v3, %v8033_v16  ;;  %v8043_v28 = vmul.f32 %v7803_v8, %v8033_v16 }
 0x814   :  { %v1157_v37 = vpop.f32.mrf.mxu0 }
 0x815   :  { %v1163_v43 = vsel %vm748_vm6, %v1157_v37, -inf  ;;  %v1424_v29 = vmul.f32 %v8043_v28, %v8043_v28 }
 0x816   :  { %1164 = vmax.xlane.f32.xlu0 %v1163_v43  ;;  %v6787_v0 = vpop.f32.mrf.mxu0 }
 0x818   :  { %v1160_v45 = vpop.f32.mrf.mxu0 }
 0x81a   :  { %v6788_v46 = vpop.f32.mrf.mxu0 }
 0x81b   :  { %v8084_v46 = vld [vmem:[%s8944_s8 + $0xe0] ss:$16 sps:$4 sm:$0xff]  }
 0x81c   :  { %v1264_v47 = vpop.f32.mrf.mxu0 }
 0x81d   :  { %v1270_v48 = vsel %vm748_vm6, %v1264_v47, -inf }
 0x81e   :  { %1271 = vmax.xlane.f32.xlu1 %v1270_v48  ;;  %v6799_v50 = vpop.f32.mrf.mxu0 }
 0x820   :  { %v1267_v51 = vpop.f32.mrf.mxu0 }
 0x822   :  { %v6800_v53 = vpop.f32.mrf.mxu0 }
 0x89f   :  { %v1165_v54 = vpop.xlane.xlu0 %1164 }
 0x8a0   :  { %v1166_v56 = vsub.f32 %v1157_v37, %v1165_v54 }
 0x8a2   :  { %v1167_v57 = vmul.f32 1.442695, %v1166_v56 }
 0x8a4   :  { %7349 = vpow2.f32 %v1167_v57 }
 0x8a7   :  { %v1272_v61 = vpop.xlane.xlu1 %1271 }
 0x8a8   :  { %v1273_v62 = vsub.f32 %v1264_v47, %v1272_v61  ;;  %v8089_v47 = vld [vmem:[%s8944_s8 + $0xe4] ss:$16 sps:$4 sm:$0xff]  }
 0x8aa   :  { %v1274_v63 = vmul.f32 1.442695, %v1273_v62 }
 0x8ac   :  { %7351 = vpow2.f32 %v1274_v63 }
 0x8b1   :  { %v7350_v1 = vpop.eup %7349 }
 0x8b2   :  { %v1169_v5 = vsel %vm748_vm6, %v7350_v1, 0.0 }
 0x8b3   :  { %1170 = vadd.xlane.f32.xlu0 %v1169_v5 }
 0x8b9   :  { %v7352_v14 = vpop.eup %7351 }
 0x8ba   :  { %v1276_v27 = vsel %vm748_vm6, %v7352_v14, 0.0 }
 0x8bb   :  { %1277 = vadd.xlane.f32.xlu1 %v1276_v27 }
 0x8bf   :  { %1434 = vadd.xlane.f32.xlu1 %v1432_v11 }
 0x8c3   :  { %1472 = vadd.xlane.f32.xlu1 %v1471_v26 }
 0x8c7   :  { %1426 = vadd.xlane.f32.xlu1 %v1424_v29  ;;  %v8122_v29 = vld [vmem:[%s8944_s8 + $0xc0] ss:$16 sps:$4 sm:$0xff]  }
 0x93c   :  { %v1171_v30 = vpop.xlane.xlu0 %1170 }
 0x93d   :  { %7353 = vrcp.f32 %v1171_v30  ;;  %v8129_v30 = vld [vmem:[%s8944_s8 + $0xa4] ss:$16 sps:$4 sm:$0xff]  }
 0x944   :  { %v1278_v19 = vpop.xlane.xlu1 %1277 }
 0x945   :  { %7355 = vrcp.f32 %v1278_v19  ;;  %v8134_v19 = vld [vmem:[%s8944_s8 + $0xa0] ss:$16 sps:$4 sm:$0xff]  }
 0x948   :  { %v1435_v32 = vpop.xlane.xlu1 %1434 }
 0x949   :  { %v1438_v52 = vmul.f32 0.25, %v1435_v32  ;;  %v8141_v32 = vld [vmem:[%s8944_s8 + $0x84] ss:$16 sps:$4 sm:$0xff]  }
 0x94a   :  { %v7354_v58 = vpop.eup %7353 }
 0x94b   :  { %v1440_v55 = vsub.f32 %v8033_v16, %v1438_v52  ;;  %v1173_v33 = vmul.f32 %v7354_v58, %v7350_v1  ;;  %v8146_v52 = vld [vmem:[%s8944_s8 + $0x80] ss:$16 sps:$4 sm:$0xff]   ;;  %v8153_v58 = vld [vmem:[%s8944_s8 + $0x64] ss:$16 sps:$4 sm:$0xff]  }
 0x94d   :  { %v1174_v34 = vpack.c.bf16 %v1173_v33, %v1173_v33  ;;  %v8049_v39 = vmul.f32 %v7792_v3, %v1440_v55  ;;  %v8158_v55 = vld [vmem:[%s8944_s8 + $0x60] ss:$16 sps:$4 sm:$0xff]   ;;  %v8163_v33 = vld [vmem:[%s8944_s8 + $0x44] ss:$16 sps:$4 sm:$0xff]  }
 0x94f   :  { %6792 = vmatmul.mubr.msk.bf16.vlgmr.msra.gmra.mxu1 %vm748_vm6, %v1174_v34  ;;  %v1444_v40 = vmul.f32 %v8049_v39, %v8049_v39  ;;  %v8170_v34 = vld [vmem:[%s8944_s8 + $0x40] ss:$16 sps:$4 sm:$0xff]  }
 0x950   :  { %6802 = vmatpush3.bf16.msra.mxu1 %v7887_v20  ;;  %6803 = vmatprep.mubr.msk.bf16.mxu1 %vm7625_vm4, %v8966_v2  ;;  %v1479_v20 = vmul.f32 %v7792_v3, %v8021_v10 }
 0x951   :  { %1446 = vadd.xlane.f32.xlu1 %v1444_v40  ;;  %6827 = vmatprep.subr.bf16.mxu1 %v8966_v2  ;;  %v8176_v40 = vld [vmem:[%s8944_s8 + $0x24] ss:$16 sps:$4 sm:$0xff]  }
 0x952   :  { %v7356_v41 = vpop.eup %7355 }
 0x953   :  { %v1280_v42 = vmul.f32 %v7356_v41, %v7352_v14  ;;  %v8182_v41 = vld [vmem:[%s8944_s8 + $0x20] ss:$16 sps:$4 sm:$0xff]  }
 0x955   :  { %v1281_v37 = vpack.c.bf16 %v1280_v42, %v1280_v42  ;;  %v8188_v42 = vld [vmem:[%s8944_s8 + $0x4] ss:$16 sps:$4 sm:$0xff]  }
 0x957   :  { %6804 = vmatmul.mubr.msk.bf16.vlgmr.msra.gmra.mxu1 %vm748_vm6, %v1281_v37  ;;  %v8194_v37 = vld [vmem:[%s8944_s8] ss:$16 sps:$4 sm:$0xff]  }
 0x958   :  { %6828 = vmatpush3.bf16.msra.mxu1 %v7944_v15  ;;  %6843 = vmatprep.mubr.msk.bf16.mxu1 %vm7625_vm4, %v8966_v2  ;;  %v1481_v15 = vsel %vm1470_vm7, %v1479_v20, 0.0  ;;  %v7189_v20 = vld [vmem:[#allocation6 + $0x70] ss:$8 sps:$4 sm:$0xff]  }
 0x959   :  { %6829 = vmatprep.subr.bf16.mxu1 %v8966_v2  ;;  %1482 = vadd.xlane.f32.xlu0 %v1481_v15  ;;  %v7191_v15 = vld [vmem:[#allocation6 + $0x74] ss:$8 sps:$4 sm:$0xff]  }
 0x95a   :  { %1626 = vmatprep.subr.bf16.mxu0 %v7191_v15  ;;  %v8211_v15 = vld [vmem:[%s8944_s8 + $0xec] ss:$16 sps:$4 sm:$0xff]  }
 0x95c   :  { %6830 = vmatpush3.bf16.msra.mxu1 %v7948_v17 }
 0x95d   :  { %6831 = vmatprep.subr.bf16.mxu1 %v8966_v2 }
 0x960   :  { %6832 = vmatpush3.bf16.msra.mxu1 %v7954_v18 }
 0x961   :  { %6833 = vmatprep.subr.bf16.mxu1 %v8966_v2 }
 0x964   :  { %6834 = vmatpush3.bf16.msra.mxu1 %v7958_v21 }
 0x965   :  { %6835 = vmatprep.subr.bf16.mxu1 %v8966_v2 }
 0x968   :  { %6836 = vmatpush3.bf16.msra.mxu1 %v7962_v22 }
 0x969   :  { %6837 = vmatprep.subr.bf16.mxu1 %v8966_v2 }
 0x96c   :  { %6838 = vmatpush3.bf16.msra.mxu1 %v7966_v24 }
 0x96d   :  { %6839 = vmatprep.subr.bf16.mxu1 %v8966_v2 }
 0x970   :  { %6840 = vmatpush3.bf16.msra.mxu1 %v7970_v25 }
 0x971   :  { %6841 = vmatprep.subr.bf16.mxu1 %v8966_v2 }
 0x974   :  { %6842 = vmatpush3.bf16.msra.mxu1 %v7974_v23 }
 0x975   :  { %1886 = vmatprep.subr.bf16.mxu1 %v8089_v47 }
 0x9e2   :  { %v1483_v48 = vpop.xlane.xlu0 %1482 }
 0x9e3   :  { %v1487_v53 = vmul.f32 0.25, %v1483_v48 }
 0x9e5   :  { %v1489_v57 = vsub.f32 %v8021_v10, %v1487_v53 }
 0x9e7   :  { %v8095_v1 = vmul.f32 %v7792_v3, %v1489_v57 }
 0x9e9   :  { %v1493_v27 = vmul.f32 %v8095_v1, %v8095_v1 }
 0x9eb   :  { %v1495_v9 = vsel %vm1470_vm7, %v1493_v27, 0.0  ;;  %v7206_v27 = vld [vmem:[#allocation6 + $0x24] ss:$8 sps:$4 sm:$0xff]  }
 0xa0f   :  { %v1217_v17 = vpop.f32.mrf.mxu1 }
 0xa10   :  { %v1223_v18 = vpack.c.bf16 %v1217_v17, %v1217_v17  ;;  %v7194_v17 = vld [vmem:[#allocation6 + $0x64] ss:$8 sps:$4 sm:$0xff]  }
 0xa11   :  { %v6793_v21 = vpop.f32.mrf.mxu1 }
 0xa12   :  { %6844 = vmatmul.mubr.bf16.vlgmr.msra.gmra.mxu1 %v1223_v18  ;;  %v7192_v18 = vld [vmem:[#allocation6 + $0x60] ss:$8 sps:$4 sm:$0xff]   ;;  %v7197_v21 = vld [vmem:[#allocation6 + $0x54] ss:$8 sps:$4 sm:$0xff]  }
 0xa13   :  { %v1220_v22 = vpop.f32.mrf.mxu1  ;;  %1918 = vmatprep.mubr.bf16.mxu1 %v8964_v49  ;;  %1887 = vmatpush1.bf16.msra.mxu1 %v8084_v46 }
 0xa14   :  { %v7195_v22 = vld [vmem:[#allocation6 + $0x50] ss:$8 sps:$4 sm:$0xff]  }
 0xa15   :  { %v6794_v24 = vpop.f32.mrf.mxu1 }
 0xa16   :  { %v1473_v24 = vpop.xlane.xlu1 %1472 }
 0xa17   :  { %v1324_v43 = vpop.f32.mrf.mxu1 }
 0xa18   :  { %v1330_v25 = vpack.c.bf16 %v1324_v43, %v1324_v43  ;;  %v1477_v43 = vmul.f32 0.25, %v1473_v24 }
 0xa19   :  { %v6805_v0 = vpop.f32.mrf.mxu1 }
 0xa1a   :  { %6824 = vmatmul.mubr.bf16.vlgmr.msra.gmra.mxu0 %v1330_v25  ;;  %v1503_v0 = vadd.f32 0.01, %v1477_v43 }
 0xa1b   :  { %v1327_v45 = vpop.f32.mrf.mxu1  ;;  %1658 = vmatprep.mubr.bf16.mxu0 %v8964_v49  ;;  %1627 = vmatpush1.bf16.msra.mxu0 %v7189_v20  ;;  %v7210_v20 = vld [vmem:[#allocation6] ss:$8 sps:$4 sm:$0xff]  }
 0xa1c   :  { %1628 = vmatprep.subr.bf16.mxu0 %v7194_v17  ;;  %7357 = vrsqrt.f32 %v1503_v0  ;;  %v1427_v17 = vpop.xlane.xlu1 %1426 }
 0xa1d   :  { %v6806_v23 = vpop.f32.mrf.mxu1  ;;  %v1430_v24 = vmul.f32 0.25, %v1427_v17  ;;  %v8280_v17 = vld [vmem:[%s8944_s8 + $0x48] ss:$16 sps:$4 sm:$0xff]  }
 0xa1f   :  { %1629 = vmatpush1.bf16.msra.mxu0 %v7192_v18  ;;  %v1452_v0 = vadd.f32 0.01, %v1430_v24  ;;  %v8304_v24 = vld [vmem:[%s8944_s8 + $0x8] ss:$16 sps:$4 sm:$0xff]  }
 0xa20   :  { %1630 = vmatprep.subr.bf16.mxu0 %v7197_v21  ;;  %v1447_v18 = vpop.xlane.xlu1 %1446 }
 0xa23   :  { %1631 = vmatpush1.bf16.msra.mxu0 %v7195_v22  ;;  %v1450_v22 = vmul.f32 0.25, %v1447_v18  ;;  %v8286_v18 = vld [vmem:[%s8944_s8 + $0x2c] ss:$16 sps:$4 sm:$0xff]  }
 0xad2   :  { %v1405_v50 = vpop.f32.mrf.mxu1 }
 0xad4   :  { %v6845_v51 = vpop.f32.mrf.mxu1 }
 0xad6   :  { %v1408_v54 = vpop.f32.mrf.mxu1 }
 0xad8   :  { %v6846_v56 = vpop.f32.mrf.mxu1 }
 0xad9   :  { %v7358_v56 = vpop.eup %7357 }
 0xada   :  { %v1365_v61 = vpop.f32.mrf.mxu0  ;;  %v1507_v57 = vmul.f32 %v7358_v56, %v8030_v13  ;;  %v7209_v13 = vld [vmem:[#allocation6 + $0x14] ss:$8 sps:$4 sm:$0xff]  }
 0xadb   :  { %v1406_v62 = vadd.f32 %v1405_v50, %v1365_v61  ;;  %v7200_v61 = vld [vmem:[#allocation6 + $0x44] ss:$8 sps:$4 sm:$0xff]  }
 0xadc   :  { %v6825_v63 = vpop.f32.mrf.mxu0  ;;  %1632 = vmatprep.subr.bf16.mxu0 %v7200_v61 }
 0xadd   :  { %v1412_v5 = vadd.f32 %v7414_v4, %v1406_v62  ;;  %v7198_v63 = vld [vmem:[#allocation6 + $0x40] ss:$8 sps:$4 sm:$0xff]  }
 0xade   :  { %v1368_v6 = vpop.f32.mrf.mxu0  ;;  %1633 = vmatpush1.bf16.msra.mxu0 %v7198_v63 }
 0xadf   :  { %v8101_v7 = vadd.f32 %v8026_v12, %v1412_v5  ;;  %v8117_v12 = vld [vmem:[%s8944_s8 + $0xc4] ss:$16 sps:$4 sm:$0xff]   ;;  %v7201_v6 = vld [vmem:[#allocation6 + $0x30] ss:$8 sps:$4 sm:$0xff]  }
 0xae0   :  { %v6826_v14 = vpop.f32.mrf.mxu0  ;;  %1888 = vmatprep.subr.bf16.mxu1 %v8117_v12  ;;  %v7203_v5 = vld [vmem:[#allocation6 + $0x34] ss:$8 sps:$4 sm:$0xff]  }
 0xae1   :  { %9014 = vst [vmem:[#allocation28_spill] sm:$0xff] %v8101_v7  ;;  %v1433_v10 = vmul.f32 %v7792_v3, %v8101_v7  ;;  %v8110_v11 = vmul.f32 %v7803_v8, %v8101_v7  ;;  %1889 = vmatpush1.bf16.msra.mxu1 %v8122_v29  ;;  %1634 = vmatprep.subr.bf16.mxu0 %v7203_v5 }
 0xae2   :  { %1890 = vmatprep.subr.bf16.mxu1 %v8129_v30  ;;  %1635 = vmatpush1.bf16.msra.mxu0 %v7201_v6 }
 0xae3   :  { %1436 = vadd.xlane.f32.xlu0 %v1433_v10  ;;  %v1425_v26 = vmul.f32 %v8110_v11, %v8110_v11  ;;  %1636 = vmatprep.subr.bf16.mxu0 %v7206_v27 }
 0xae5   :  { %1891 = vmatpush1.bf16.msra.mxu1 %v8134_v19 }
 0xae6   :  { %1892 = vmatprep.subr.bf16.mxu1 %v8141_v32 }
 0xae7   :  { %1496 = vadd.xlane.f32.xlu0 %v1495_v9  ;;  %v7204_v9 = vld [vmem:[#allocation6 + $0x20] ss:$8 sps:$4 sm:$0xff]  }
 0xae8   :  { %1637 = vmatpush1.bf16.msra.mxu0 %v7204_v9  ;;  %v8225_v9 = vld [vmem:[%s8944_s8 + $0xcc] ss:$16 sps:$4 sm:$0xff]  }
 0xae9   :  { %1893 = vmatpush1.bf16.msra.mxu1 %v8146_v52  ;;  %1638 = vmatprep.subr.bf16.mxu0 %v7209_v13  ;;  %v8256_v13 = vld [vmem:[%s8944_s8 + $0x88] ss:$16 sps:$4 sm:$0xff]  }
 0xaea   :  { %1894 = vmatprep.subr.bf16.mxu1 %v8153_v58 }
 0xaeb   :  { %1428 = vadd.xlane.f32.xlu0 %v1425_v26  ;;  %v7212_v26 = vld [vmem:[#allocation6 + $0x4] ss:$8 sps:$4 sm:$0xff]  }
 0xaed   :  { %1895 = vmatpush1.bf16.msra.mxu1 %v8158_v55 }
 0xaee   :  { %1896 = vmatprep.subr.bf16.mxu1 %v8163_v33 }
 0xaf1   :  { %1897 = vmatpush1.bf16.msra.mxu1 %v8170_v34 }
 0xaf2   :  { %1898 = vmatprep.subr.bf16.mxu1 %v8176_v40 }
 0xaf5   :  { %1899 = vmatpush1.bf16.msra.mxu1 %v8182_v41 }
 0xaf6   :  { %1900 = vmatprep.subr.bf16.mxu1 %v8188_v42 }
 0xaf9   :  { %1901 = vmatpush1.bf16.msra.mxu1 %v8194_v37 }
 0xafa   :  { %6847 = vmatprep.subr.bf16.mxu1 %v8966_v2 }
 0xb6c   :  { %v1437_v25 = vpop.xlane.xlu0 %1436 }
 0xb6d   :  { %v1439_v45 = vmul.f32 0.25, %v1437_v25  ;;  %v1458_v25 = vadd.f32 1e-05, %v1450_v22  ;;  %v8298_v22 = vld [vmem:[%s8944_s8 + $0xc] ss:$16 sps:$4 sm:$0xff]  }
 0xb6f   :  { %v1441_v23 = vsub.f32 %v8101_v7, %v1439_v45 }
 0xb70   :  { %v1497_v48 = vpop.xlane.xlu0 %1496 }
 0xb71   :  { %v1501_v50 = vmul.f32 0.25, %v1497_v48  ;;  %v1443_v51 = vmul.f32 %v7792_v3, %v1441_v23 }
 0xb73   :  { %v1509_v53 = vadd.f32 1e-05, %v1501_v50  ;;  %v1445_v54 = vmul.f32 %v1443_v51, %v1443_v51 }
 0xb74   :  { %v1429_v21 = vpop.xlane.xlu0 %1428 }
 0xb75   :  { %7359 = vrsqrt.f32 %v1509_v53  ;;  %1448 = vadd.xlane.f32.xlu0 %v1445_v54  ;;  %v1431_v43 = vmul.f32 0.25, %v1429_v21  ;;  %v8292_v21 = vld [vmem:[%s8944_s8 + $0x28] ss:$16 sps:$4 sm:$0xff]  }
 0xb76   :  { %7361 = vrsqrt.f32 %v1458_v25 }
 0xb77   :  { %v1453_v45 = vadd.f32 0.01, %v1431_v43  ;;  %7363 = vrsqrt.f32 %v1452_v0  ;;  %v1704_v43 = vld [vmem:[%s8945_s9] sm:$0xf] }
 0xb78   :  { %v8316_v25 = vrot.slane %v1704_v43, %v7859_v44 }
 0xb79   :  { %7365 = vrsqrt.f32 %v1453_v45 }
 0xb82   :  { %v7360_v62 = vpop.eup %7359 }
 0xb83   :  { %v1513_v4 = vmul.f32 %v7360_v62, %v8095_v1  ;;  %v7207_v1 = vld [vmem:[#allocation6 + $0x10] ss:$8 sps:$4 sm:$0xff]   ;;  %v7362_v53 = vpop.eup %7361 }
 0xb84   :  { %1639 = vmatpush1.bf16.msra.mxu0 %v7207_v1  ;;  %v7364_v54 = vpop.eup %7363  ;;  %v8262_v1 = vld [vmem:[%s8944_s8 + $0x6c] ss:$16 sps:$4 sm:$0xff]  }
 0xb85   :  { %v1515_v14 = vadd.f32 %v1513_v4, %v1507_v57  ;;  %1640 = vmatprep.subr.bf16.mxu0 %v7212_v26  ;;  %v1462_v57 = vmul.f32 %v7362_v53, %v8049_v39  ;;  %v1456_v62 = vmul.f32 %v7364_v54, %v8043_v28  ;;  %v8231_v28 = vld [vmem:[%s8944_s8 + $0xc8] ss:$16 sps:$4 sm:$0xff]   ;;  %v8238_v39 = vld [vmem:[%s8944_s8 + $0xac] ss:$16 sps:$4 sm:$0xff]  }
 0xb86   :  { %v7366_v56 = vpop.eup %7365  ;;  %v8268_v26 = vld [vmem:[%s8944_s8 + $0x68] ss:$16 sps:$4 sm:$0xff]  }
 0xb87   :  { %v8203_v10 = vpack.c.bf16 %v1515_v14, %v1515_v14  ;;  %v1457_v63 = vmul.f32 %v7366_v56, %v8110_v11  ;;  %v1464_v5 = vadd.f32 %v1462_v57, %v1456_v62  ;;  %v8220_v14 = vld [vmem:[%s8944_s8 + $0xe8] ss:$16 sps:$4 sm:$0xff]  }
 0xb88   :  { %1641 = vmatpush1.bf16.msra.mxu0 %v7210_v20  ;;  %v8244_v11 = vld [vmem:[%s8944_s8 + $0xa8] ss:$16 sps:$4 sm:$0xff]   ;;  %v8274_v20 = vld [vmem:[%s8944_s8 + $0x4c] ss:$16 sps:$4 sm:$0xff]  }
 0xb89   :  { %1919 = vmatmul.mubr.bf16.vlgmr.msra.gmra.mxu1 %v8203_v10  ;;  %1927 = vmatprep.subr.bf16.mxu0 %v8211_v15 }
 0xb8a   :  { %6849 = vmatprep.mubr.msk.bf16.mxu1 %vm7625_vm4, %v8966_v2 }
 0xbfe   :  { %v1449_v23 = vpop.xlane.xlu0 %1448 }
 0xbff   :  { %v1451_v48 = vmul.f32 0.25, %v1449_v23 }
 0xc01   :  { %v1459_v50 = vadd.f32 1e-05, %v1451_v48 }
 0xc03   :  { %7367 = vrsqrt.f32 %v1459_v50 }
 0xc10   :  { %v7368_v61 = vpop.eup %7367 }
 0xc11   :  { %v1463_v4 = vmul.f32 %v7368_v61, %v1443_v51  ;;  %v8250_v51 = vld [vmem:[%s8944_s8 + $0x8c] ss:$16 sps:$4 sm:$0xff]  }
 0xc13   :  { %v1465_v6 = vadd.f32 %v1463_v4, %v1457_v63 }
 0xc15   :  { %v1533_v27 = vpack.c.bf16 %v1465_v6, %v1464_v5 }
 0xc17   :  { %1659 = vmatmul.mubr.bf16.vlgmr.msra.gmra.mxu0 %v1533_v27 }
 0xc18   :  { %1928 = vmatpush1.bf16.msra.mxu0 %v8220_v14  ;;  %1959 = vmatprep.mubr.bf16.mxu0 %v8964_v49 }
 0xc19   :  { %1929 = vmatprep.subr.bf16.mxu0 %v8225_v9 }
 0xc1c   :  { %1930 = vmatpush1.bf16.msra.mxu0 %v8231_v28 }
 0xc1d   :  { %1931 = vmatprep.subr.bf16.mxu0 %v8238_v39 }
 0xc20   :  { %1932 = vmatpush1.bf16.msra.mxu0 %v8244_v11 }
 0xc21   :  { %1933 = vmatprep.subr.bf16.mxu0 %v8250_v51 }
 0xc24   :  { %1934 = vmatpush1.bf16.msra.mxu0 %v8256_v13 }
 0xc25   :  { %1935 = vmatprep.subr.bf16.mxu0 %v8262_v1 }
 0xc28   :  { %1936 = vmatpush1.bf16.msra.mxu0 %v8268_v26 }
 0xc29   :  { %1937 = vmatprep.subr.bf16.mxu0 %v8274_v20 }
 0xc2c   :  { %1938 = vmatpush1.bf16.msra.mxu0 %v8280_v17 }
 0xc2d   :  { %1939 = vmatprep.subr.bf16.mxu0 %v8286_v18 }
 0xc30   :  { %1940 = vmatpush1.bf16.msra.mxu0 %v8292_v21 }
 0xc31   :  { %1941 = vmatprep.subr.bf16.mxu0 %v8298_v22 }
 0xc34   :  { %1942 = vmatpush1.bf16.msra.mxu0 %v8304_v24 }
 0xc35   :  { %6871 = vmatprep.subr.bf16.mxu0 %v8966_v2 }
 0xc37   :  { %1960 = vmatmul.mubr.bf16.vlgmr.msra.gmra.mxu0 %v8203_v10  ;;  %v1534_v10 = vld [vmem:[%s8943_s7] sm:$0x3] }
 0xc38   :  { %6887 = vmatprep.mubr.msk.bf16.mxu0 %vm7625_vm4, %v8966_v2  ;;  %v1539_v56 = vrot.slane %v1534_v10, %v7859_v44  ;;  %v1543_v61 = vrot.slane %v1534_v10, %v7850_v38 }
 0xc49   :  { %v1920_v0 = vpop.f32.mrf.mxu1 }
 0xc4a   :  { %v1921_v45 = vadd.f32 %v1920_v0, %v8316_v25 }
 0xc4b   :  { %v1922_v23 = vpop.f32.mrf.mxu1 }
 0xc4c   :  { %v1968_v48 = vpack.c.bf16 %v1921_v45, %v1921_v45 }
 0xc4d   :  { %v1924_v50 = vpop.f32.mrf.mxu1 }
 0xc4e   :  { %6848 = vmatpush3.bf16.xpose.msra.mxu1 %v1968_v48  ;;  %v8333_v48 = vrot.slane %v1704_v43, %v7842_v36  ;;  %v8440_v36 = vld [vmem:[#allocation7] sm:$0xff]  }
 0xc4f   :  { %v1925_v53 = vpop.f32.mrf.mxu1  ;;  %6853 = vmatprep.subr.bf16.mxu1 %v8966_v2 }
 0xcd7   :  { %v1660_v54 = vpop.f32.mrf.mxu0 }
 0xcd8   :  { %v1661_v63 = vadd.f32 %v1660_v54, %v1539_v56 }
 0xcd9   :  { %v1662_v57 = vpop.f32.mrf.mxu0 }
 0xcda   :  { %v1663_v6 = vadd.f32 %v1662_v57, %v1543_v61 }
 0xcdb   :  { %v1664_v62 = vpop.f32.mrf.mxu0 }
 0xcdc   :  { %v1665_v4 = vadd.f32 %v1664_v62, %v1539_v56 }
 0xcdd   :  { %v1666_v5 = vpop.f32.mrf.mxu0 }
 0xcde   :  { %v8325_v27 = vpack.c.bf16 %v1665_v4, %v1661_v63  ;;  %v1667_v0 = vadd.f32 %v1666_v5, %v1543_v61 }
 0xce0   :  { %v8327_v45 = vpack.c.bf16 %v1667_v0, %v1663_v6  ;;  %6850 = vmatmul.mubr.bf16.vlgmr.msra.gmra.mxu1 %v8325_v27 }
 0xce1   :  { %6855 = vmatprep.mubr.msk.bf16.mxu1 %vm7625_vm4, %v8966_v2 }
 0xcf7   :  { %v1961_v50 = vpop.f32.mrf.mxu0 }
 0xcf8   :  { %v1962_v53 = vadd.f32 %v1961_v50, %v8333_v48 }
 0xcf9   :  { %v1963_v10 = vpop.f32.mrf.mxu0 }
 0xcfa   :  { %v1970_v54 = vpack.c.bf16 %v1962_v53, %v1962_v53 }
 0xcfb   :  { %v1965_v56 = vpop.f32.mrf.mxu0 }
 0xcfc   :  { %v2030_v57 = vsel %vm2028_vm8, %v1970_v54, 0 }
 0xcfd   :  { %v1966_v61 = vpop.f32.mrf.mxu0  ;;  %6854 = vmatpush3.bf16.msra.mxu1 %v2030_v57  ;;  %v8341_v57 = vrot.slane %v1704_v43, %v7850_v38 }
 0xcfe   :  { %6859 = vmatprep.subr.bf16.mxu1 %v8966_v2 }
 0xcff   :  { %v1923_v2 = vadd.f32 %v1922_v23, %v8341_v57 }
 0xda0   :  { %v2006_v62 = vpop.f32.mrf.mxu1 }
 0xda1   :  { %v2013_v63 = vsel %vm2012_vm9, %v2006_v62, -inf }
 0xda2   :  { %2014 = vmax.xlane.f32.xlu1 %v2013_v63  ;;  %v6851_v4 = vpop.f32.mrf.mxu1  ;;  %v8345_v63 = vrot.slane %v1704_v43, %v7892_v31  ;;  %v8414_v31 = vld [vmem:[#allocation7 + $0x30] sm:$0xff]  }
 0xda4   :  { %v2009_v5 = vpop.f32.mrf.mxu1 }
 0xda6   :  { %v6852_v6 = vpop.f32.mrf.mxu1 }
 0xda7   :  { %v9015_v6 = vmov 0.0  }
 0xe2b   :  { %v2015_v0 = vpop.xlane.xlu1 %2014 }
 0xe2c   :  { %v2016_v50 = vsub.f32 %v2006_v62, %v2015_v0  ;;  %v1969_v62 = vpack.c.bf16 %v1923_v2, %v1923_v2 }
 0xe2e   :  { %v2017_v49 = vmul.f32 1.442695, %v2016_v50 }
 0xe30   :  { %7369 = vpow2.f32 %v2017_v49  ;;  %v1964_v49 = vadd.f32 %v1963_v10, %v8345_v63  ;;  %v197_v10 = vld [vmem:[%s9012_s23 + $0x8] sm:$0x3f] }
 0xe32   :  { %v1971_v0 = vpack.c.bf16 %v1964_v49, %v1964_v49 }
 0xe34   :  { %v2145_v50 = vsel %vm2028_vm8, %v1971_v0, 0 }
 0xe3d   :  { %v7370_v53 = vpop.eup %7369 }
 0xe3e   :  { %v2019_v56 = vsel %vm2012_vm9, %v7370_v53, 0.0 }
 0xe3f   :  { %2020 = vadd.xlane.f32.xlu0 %v2019_v56  ;;  %v1480_v56 = vmul.f32 %v7792_v3, %v197_v10 }
 0xec8   :  { %v2021_v54 = vpop.xlane.xlu0 %2020 }
 0xec9   :  { %7371 = vrcp.f32 %v2021_v54 }
 0xed6   :  { %v7372_v61 = vpop.eup %7371 }
 0xed7   :  { %v2023_v4 = vmul.f32 %v7372_v61, %v7370_v53 }
 0xed9   :  { %v2024_v5 = vpack.c.bf16 %v2023_v4, %v2023_v4 }
 0xedb   :  { %6856 = vmatmul.mubr.msk.bf16.vlgmr.msra.gmra.mxu1 %vm2012_vm9, %v2024_v5  ;;  %v1484_v5 = vsel %vm1470_vm7, %v1480_v56, 0.0 }
 0xedc   :  { %6860 = vmatpush3.bf16.xpose.msra.mxu1 %v1969_v62  ;;  %6861 = vmatprep.mubr.msk.bf16.mxu1 %vm7625_vm4, %v9015_v6 }
 0xedd   :  { %6865 = vmatprep.subr.bf16.mxu1 %v9015_v6 }
 0xee3   :  { %6862 = vmatmul.mubr.bf16.vlgmr.msra.gmra.mxu1 %v8327_v45 }
 0xee4   :  { %6866 = vmatpush3.bf16.msra.mxu1 %v2145_v50  ;;  %6867 = vmatprep.mubr.msk.bf16.mxu1 %vm7625_vm4, %v9015_v6 }
 0xee5   :  { %6891 = vmatprep.subr.bf16.mxu1 %v9015_v6 }
 0xf9b   :  { %v8357_v2 = vpop.f32.mrf.mxu1 }
 0xf9d   :  { %v6857_v43 = vpop.f32.mrf.mxu1 }
 0xf9f   :  { %v2069_v23 = vpop.f32.mrf.mxu1 }
 0xfa1   :  { %v6858_v53 = vpop.f32.mrf.mxu1 }
 0xfa3   :  { %v2123_v54 = vpop.f32.mrf.mxu1 }
 0xfa4   :  { %v2129_v61 = vsel %vm2012_vm9, %v2123_v54, -inf }
 0xfa5   :  { %2130 = vmax.xlane.f32.xlu1 %v2129_v61  ;;  %v6863_v4 = vpop.f32.mrf.mxu1  ;;  %v8371_v61 = vmul.f32 %v7803_v8, %v197_v10 }
 0xfa7   :  { %v2126_v62 = vpop.f32.mrf.mxu1 }
 0xfa8   :  { %v8381_v62 = vld [vmem:[#allocation7 + $0x70] sm:$0xff]  }
 0xfa9   :  { %v6864_v49 = vpop.f32.mrf.mxu1  ;;  %1485 = vadd.xlane.f32.xlu1 %v1484_v5 }
 0xfaa   :  { %v8393_v49 = vld [vmem:[#allocation7 + $0x58] sm:$0xff]  }
0x102e   :  { %v2131_v0 = vpop.xlane.xlu1 %2130 }
0x102f   :  { %v2132_v50 = vsub.f32 %v2123_v54, %v2131_v0  ;;  %v1469_v54 = vmul.f32 %v8371_v61, %v8371_v61  ;;  %v8397_v0 = vld [vmem:[#allocation7 + $0x50] sm:$0xff]  }
0x1031   :  { %v2133_v43 = vmul.f32 1.442695, %v2132_v50  ;;  %v8401_v50 = vld [vmem:[#allocation7 + $0x48] sm:$0xff]  }
0x1032   :  { %v1486_v23 = vpop.xlane.xlu1 %1485 }
0x1033   :  { %7373 = vpow2.f32 %v2133_v43  ;;  %v1488_v35 = vmul.f32 0.25, %v1486_v23  ;;  %v8405_v43 = vld [vmem:[#allocation7 + $0x40] sm:$0xff]  }
0x1035   :  { %v1490_v60 = vsub.f32 %v197_v10, %v1488_v35  ;;  %v1474_v35 = vsel %vm1470_vm7, %v1469_v54, 0.0  ;;  %v8389_v10 = vld [vmem:[#allocation7 + $0x60] sm:$0xff]  }
0x1037   :  { %v8366_v53 = vmul.f32 %v7792_v3, %v1490_v60  ;;  %v8378_v60 = vld [vmem:[#allocation7 + $0x78] sm:$0xff]  }
0x1038   :  { %6872 = vmatpush3.bf16.msra.mxu0 %v8378_v60 }
0x1039   :  { %v1494_v59 = vmul.f32 %v8366_v53, %v8366_v53  ;;  %6873 = vmatprep.subr.bf16.mxu0 %v9015_v6 }
0x103b   :  { %v1498_v56 = vsel %vm1470_vm7, %v1494_v59, 0.0  ;;  %v8385_v59 = vld [vmem:[#allocation7 + $0x68] sm:$0xff]  }
0x103c   :  { %1499 = vadd.xlane.f32.xlu1 %v1498_v56  ;;  %6874 = vmatpush3.bf16.msra.mxu0 %v8381_v62 }
0x103d   :  { %6875 = vmatprep.subr.bf16.mxu0 %v9015_v6 }
0x1040   :  { %v7374_v4 = vpop.eup %7373  ;;  %6876 = vmatpush3.bf16.msra.mxu0 %v8385_v59 }
0x1041   :  { %v2135_v5 = vsel %vm2012_vm9, %v7374_v4, 0.0  ;;  %6877 = vmatprep.subr.bf16.mxu0 %v9015_v6 }
0x1042   :  { %2136 = vadd.xlane.f32.xlu0 %v2135_v5  ;;  %v8410_v5 = vld [vmem:[#allocation7 + $0x38] sm:$0xff]  }
0x1044   :  { %6878 = vmatpush3.bf16.msra.mxu0 %v8389_v10 }
0x1045   :  { %6879 = vmatprep.subr.bf16.mxu0 %v9015_v6 }
0x1046   :  { %1475 = vadd.xlane.f32.xlu0 %v1474_v35 }
0x1048   :  { %6880 = vmatpush3.bf16.msra.mxu0 %v8393_v49 }
0x1049   :  { %6881 = vmatprep.subr.bf16.mxu0 %v9015_v6 }
0x104c   :  { %6882 = vmatpush3.bf16.msra.mxu0 %v8397_v0 }
0x104d   :  { %6883 = vmatprep.subr.bf16.mxu0 %v9015_v6 }
0x1050   :  { %6884 = vmatpush3.bf16.msra.mxu0 %v8401_v50 }
0x1051   :  { %6885 = vmatprep.subr.bf16.mxu0 %v9015_v6 }
0x1054   :  { %6886 = vmatpush3.bf16.msra.mxu0 %v8405_v43 }
0x1055   :  { %2382 = vmatprep.subr.bf16.mxu0 %v8089_v47  ;;  %v8420_v47 = vld [vmem:[#allocation7 + $0x28] sm:$0xff]  }
0x10cb   :  { %v2137_v23 = vpop.xlane.xlu0 %2136 }
0x10cc   :  { %7375 = vrcp.f32 %v2137_v23  ;;  %v8428_v23 = vld [vmem:[#allocation7 + $0x18] sm:$0xff]  }
0x10cd   :  { %9017 = vst [vmem:[#allocation30_spill] sm:$0xff] %v8428_v23 }
0x10cf   :  { %v1476_v44 = vpop.xlane.xlu0 %1475 }
0x10d0   :  { %v1478_v7 = vmul.f32 0.25, %v1476_v44 }
0x10d9   :  { %v7376_v56 = vpop.eup %7375 }
0x10da   :  { %v2139_v54 = vmul.f32 %v7376_v56, %v7374_v4  ;;  %v8424_v4 = vld [vmem:[#allocation7 + $0x20] sm:$0xff]   ;;  %v8432_v56 = vld [vmem:[#allocation7 + $0x10] sm:$0xff]  }
0x10db   :  { %9016 = vst [vmem:[#allocation29_spill] sm:$0xff] %v8424_v4  ;;  %9018 = vst [vmem:[#allocation31_spill] sm:$0xff] %v8432_v56 }
0x10dc   :  { %v2140_v35 = vpack.c.bf16 %v2139_v54, %v2139_v54  ;;  %v8436_v54 = vld [vmem:[#allocation7 + $0x8] sm:$0xff]  }
0x10dd   :  { %9019 = vst [vmem:[#allocation32_spill] sm:$0xff] %v8436_v54 }
0x10de   :  { %6868 = vmatmul.mubr.msk.bf16.vlgmr.msra.gmra.mxu1 %vm2012_vm9, %v2140_v35  ;;  %v1500_v35 = vpop.xlane.xlu1 %1499 }
0x10df   :  { %6892 = vmatpush3.bf16.msra.mxu1 %v8410_v5  ;;  %6907 = vmatprep.mubr.msk.bf16.mxu1 %vm7625_vm4, %v9015_v6  ;;  %v1502_v38 = vmul.f32 0.25, %v1500_v35 }
0x10e0   :  { %6893 = vmatprep.subr.bf16.mxu1 %v9015_v6 }
0x10e3   :  { %6894 = vmatpush3.bf16.msra.mxu1 %v8414_v31 }
0x10e4   :  { %6895 = vmatprep.subr.bf16.mxu1 %v9015_v6 }
0x10e7   :  { %6896 = vmatpush3.bf16.msra.mxu1 %v8420_v47 }
0x10e8   :  { %6897 = vmatprep.subr.bf16.mxu1 %v9015_v6 }
0x10eb   :  { %6898 = vmatpush3.bf16.msra.mxu1 %v8424_v4  ;;  %v1504_v4 = vadd.f32 0.01, %v1478_v7 }
0x10ec   :  { %6899 = vmatprep.subr.bf16.mxu1 %v9015_v6 }
0x10ef   :  { %6900 = vmatpush3.bf16.msra.mxu1 %v8428_v23  ;;  %v2072_v23 = vpack.c.bf16 %v8357_v2, %v8357_v2 }
0x10f0   :  { %6901 = vmatprep.subr.bf16.mxu1 %v9015_v6 }
0x10f3   :  { %6902 = vmatpush3.bf16.msra.mxu1 %v8432_v56  ;;  %v1510_v56 = vadd.f32 1e-05, %v1502_v38 }
0x10f4   :  { %6903 = vmatprep.subr.bf16.mxu1 %v9015_v6 }
0x10f5   :  { %7377 = vrsqrt.f32 %v1510_v56 }
0x10f6   :  { %7379 = vrsqrt.f32 %v1504_v4 }
0x10f7   :  { %6904 = vmatpush3.bf16.msra.mxu1 %v8436_v54  ;;  %v9020_v54 = vmov 0  }
0x10f8   :  { %6905 = vmatprep.subr.bf16.mxu1 %v9015_v6 }
0x10fb   :  { %6906 = vmatpush3.bf16.msra.mxu1 %v8440_v36 }
0x10fc   :  { %2423 = vmatprep.subr.bf16.mxu1 %v8211_v15 }
0x10fe   :  { %6908 = vmatmul.mubr.bf16.vlgmr.msra.gmra.mxu1 %v2072_v23 }
0x10ff   :  { %2424 = vmatpush1.bf16.msra.mxu1 %v8220_v14  ;;  %2455 = vmatprep.mubr.bf16.mxu1 %v9020_v54 }
0x1100   :  { %2425 = vmatprep.subr.bf16.mxu1 %v8225_v9 }
0x1102   :  { %v7378_v38 = vpop.eup %7377 }
0x1103   :  { %2426 = vmatpush1.bf16.msra.mxu1 %v8231_v28  ;;  %v7380_v44 = vpop.eup %7379  ;;  %v1514_v15 = vmul.f32 %v7378_v38, %v8366_v53  ;;  %v8526_v38 = vld [vmem:[%s8947_s11] ss:$0 sm:$0xff] }
0x1104   :  { %2427 = vmatprep.subr.bf16.mxu1 %v8238_v39  ;;  %v1508_v7 = vmul.f32 %v7380_v44, %v8371_v61 }
0x1106   :  { %v1516_v14 = vadd.f32 %v1514_v15, %v1508_v7 }
0x1107   :  { %2428 = vmatpush1.bf16.msra.mxu1 %v8244_v11 }
0x1108   :  { %2429 = vmatprep.subr.bf16.mxu1 %v8250_v51  ;;  %v2381_v9 = vpack.c.bf16 %v1516_v14, %v1516_v14 }
0x110b   :  { %2430 = vmatpush1.bf16.msra.mxu1 %v8256_v13 }
0x110c   :  { %2431 = vmatprep.subr.bf16.mxu1 %v8262_v1 }
0x110f   :  { %2432 = vmatpush1.bf16.msra.mxu1 %v8268_v26 }
0x1110   :  { %2433 = vmatprep.subr.bf16.mxu1 %v8274_v20 }
0x1113   :  { %2434 = vmatpush1.bf16.msra.mxu1 %v8280_v17 }
0x1114   :  { %2435 = vmatprep.subr.bf16.mxu1 %v8286_v18 }
0x1117   :  { %2436 = vmatpush1.bf16.msra.mxu1 %v8292_v21 }
0x1118   :  { %2437 = vmatprep.subr.bf16.mxu1 %v8298_v22 }
0x111b   :  { %2438 = vmatpush1.bf16.msra.mxu1 %v8304_v24  ;;  %v2469_v24 = vrot.slane %v8325_v27, 4 }
0x111c   :  { %6917 = vmatprep.subr.bf16.mxu1 %v9015_v6 }
0x111e   :  { %2456 = vmatmul.mubr.bf16.vlgmr.msra.gmra.mxu1 %v2381_v9 }
0x111f   :  { %6919 = vmatprep.mubr.msk.bf16.mxu1 %vm7625_vm4, %v9015_v6 }
0x119e   :  { %v2181_v28 = vpop.f32.mrf.mxu1 }
0x119f   :  { %v2187_v39 = vpack.c.bf16 %v2181_v28, %v2181_v28 }
0x11a0   :  { %v6869_v11 = vpop.f32.mrf.mxu1 }
0x11a1   :  { %6888 = vmatmul.mubr.bf16.vlgmr.msra.gmra.mxu0 %v2187_v39 }
0x11a2   :  { %2383 = vmatpush1.bf16.msra.mxu0 %v8084_v46  ;;  %v2184_v51 = vpop.f32.mrf.mxu1  ;;  %2414 = vmatprep.mubr.bf16.mxu0 %v9020_v54 }
0x11a3   :  { %2384 = vmatprep.subr.bf16.mxu0 %v8117_v12 }
0x11a4   :  { %v6870_v13 = vpop.f32.mrf.mxu1 }
0x11a6   :  { %2385 = vmatpush1.bf16.msra.mxu0 %v8122_v29 }
0x11a7   :  { %2386 = vmatprep.subr.bf16.mxu0 %v8129_v30 }
0x11aa   :  { %2387 = vmatpush1.bf16.msra.mxu0 %v8134_v19 }
0x11ab   :  { %2388 = vmatprep.subr.bf16.mxu0 %v8141_v32 }
0x11ae   :  { %2389 = vmatpush1.bf16.msra.mxu0 %v8146_v52 }
0x11af   :  { %2390 = vmatprep.subr.bf16.mxu0 %v8153_v58 }
0x11b2   :  { %2391 = vmatpush1.bf16.msra.mxu0 %v8158_v55 }
0x11b3   :  { %2392 = vmatprep.subr.bf16.mxu0 %v8163_v33 }
0x11b6   :  { %2393 = vmatpush1.bf16.msra.mxu0 %v8170_v34 }
0x11b7   :  { %2394 = vmatprep.subr.bf16.mxu0 %v8176_v40 }
0x11ba   :  { %2395 = vmatpush1.bf16.msra.mxu0 %v8182_v41 }
0x11bb   :  { %2396 = vmatprep.subr.bf16.mxu0 %v8188_v42 }
0x11be   :  { %v8483_v46 = vpop.f32.mrf.mxu1  ;;  %2397 = vmatpush1.bf16.msra.mxu0 %v8194_v37 }
0x11bf   :  { %6911 = vmatprep.subr.bf16.mxu0 %v9015_v6 }
0x11c0   :  { %v6909_v12 = vpop.f32.mrf.mxu1 }
0x11c1   :  { %2415 = vmatmul.mubr.bf16.vlgmr.msra.gmra.mxu0 %v2381_v9 }
0x11c2   :  { %v2378_v29 = vpop.f32.mrf.mxu1  ;;  %6913 = vmatprep.mubr.msk.bf16.mxu0 %vm7625_vm4, %v9015_v6 }
0x11c4   :  { %v6910_v30 = vpop.f32.mrf.mxu1 }
0x11de   :  { %v2457_v19 = vpop.f32.mrf.mxu1 }
0x11df   :  { %v2458_v32 = vadd.f32 %v2457_v19, %v8333_v48 }
0x11e0   :  { %v8490_v52 = vpop.f32.mrf.mxu1 }
0x11e1   :  { %v2466_v58 = vpack.c.bf16 %v2458_v32, %v2458_v32  ;;  %v2460_v30 = vadd.f32 %v8490_v52, %v8345_v63 }
0x11e2   :  { %v2461_v55 = vpop.f32.mrf.mxu1 }
0x11e3   :  { %v2527_v33 = vsel %vm2028_vm8, %v2466_v58, 0  ;;  %v2467_v58 = vpack.c.bf16 %v2460_v30, %v2460_v30 }
0x11e4   :  { %v2462_v34 = vpop.f32.mrf.mxu1  ;;  %6918 = vmatpush3.bf16.msra.mxu1 %v2527_v33 }
0x11e5   :  { %6929 = vmatprep.subr.bf16.mxu1 %v9015_v6  ;;  %v2629_v34 = vsel %vm2028_vm8, %v2467_v58, 0 }
0x1261   :  { %v2287_v40 = vpop.f32.mrf.mxu0 }
0x1262   :  { %v2376_v23 = vadd.f32 %v8483_v46, %v2287_v40 }
0x1263   :  { %v6889_v41 = vpop.f32.mrf.mxu0 }
0x1264   :  { %v2752_v35 = vadd.f32 %v2376_v23, %v8033_v16  ;;  %v9022_v41 = vld [vmem:[#allocation29_spill] sm:$0xff] }
0x1265   :  { %v2290_v42 = vpop.f32.mrf.mxu0 }
0x1266   :  { %v8529_v7 = vadd.f32 %v8526_v38, %v2752_v35  ;;  %v9023_v42 = vld [vmem:[#allocation30_spill] sm:$0xff] }
0x1267   :  { %v6890_v37 = vpop.f32.mrf.mxu0  ;;  %v2929_v35 = vld [vmem:[#allocation9 + $0x3c8] sm:$0xff] }
0x1268   :  { %9021 = vst [vmem:[#allocation33_spill] sm:$0xff] %v8529_v7  ;;  %v2773_v14 = vmul.f32 %v7792_v3, %v8529_v7  ;;  %v8536_v9 = vmul.f32 %v7803_v8, %v8529_v7  ;;  %v9025_v37 = vld [vmem:[#allocation32_spill] sm:$0xff] }
0x126a   :  { %v2765_v28 = vmul.f32 %v8536_v9, %v8536_v9 }
0x1281   :  { %v2416_v1 = vpop.f32.mrf.mxu0 }
0x1282   :  { %v2417_v26 = vadd.f32 %v2416_v1, %v8316_v25  ;;  %v2571_v25 = vrot.slane %v8327_v45, 4 }
0x1283   :  { %v2418_v20 = vpop.f32.mrf.mxu0 }
0x1284   :  { %v2464_v17 = vpack.c.bf16 %v2417_v26, %v2417_v26  ;;  %v2419_v22 = vadd.f32 %v2418_v20, %v8341_v57 }
0x1285   :  { %v2420_v18 = vpop.f32.mrf.mxu0 }
0x1286   :  { %6912 = vmatpush3.bf16.xpose.msra.mxu0 %v2464_v17  ;;  %v2465_v48 = vpack.c.bf16 %v2419_v22, %v2419_v22 }
0x1287   :  { %v2421_v21 = vpop.f32.mrf.mxu0  ;;  %6923 = vmatprep.subr.bf16.mxu0 %v9015_v6 }
0x128d   :  { %6914 = vmatmul.mubr.bf16.vlgmr.msra.gmra.mxu0 %v2469_v24 }
0x128e   :  { %6924 = vmatpush3.bf16.xpose.msra.mxu0 %v2465_v48  ;;  %6925 = vmatprep.mubr.msk.bf16.mxu0 %vm7625_vm4, %v9015_v6 }
0x128f   :  { %6935 = vmatprep.subr.bf16.mxu0 %v9015_v6 }
0x1295   :  { %6926 = vmatmul.mubr.bf16.vlgmr.msra.gmra.mxu0 %v2571_v25 }
0x1296   :  { %6936 = vmatpush3.bf16.msra.mxu0 %v8378_v60  ;;  %6951 = vmatprep.mubr.msk.bf16.mxu0 %vm7625_vm4, %v9015_v6 }
0x1297   :  { %6937 = vmatprep.subr.bf16.mxu0 %v9015_v6 }
0x129a   :  { %6938 = vmatpush3.bf16.msra.mxu0 %v8381_v62 }
0x129b   :  { %6939 = vmatprep.subr.bf16.mxu0 %v9015_v6 }
0x129e   :  { %6940 = vmatpush3.bf16.msra.mxu0 %v8385_v59 }
0x129f   :  { %6941 = vmatprep.subr.bf16.mxu0 %v9015_v6 }
0x12a2   :  { %6942 = vmatpush3.bf16.msra.mxu0 %v8389_v10 }
0x12a3   :  { %6943 = vmatprep.subr.bf16.mxu0 %v9015_v6 }
0x12a6   :  { %6944 = vmatpush3.bf16.msra.mxu0 %v8393_v49 }
0x12a7   :  { %6945 = vmatprep.subr.bf16.mxu0 %v9015_v6 }
0x12aa   :  { %6946 = vmatpush3.bf16.msra.mxu0 %v8397_v0 }
0x12ab   :  { %6947 = vmatprep.subr.bf16.mxu0 %v9015_v6 }
0x12ae   :  { %6948 = vmatpush3.bf16.msra.mxu0 %v8401_v50 }
0x12af   :  { %6949 = vmatprep.subr.bf16.mxu0 %v9015_v6 }
0x12b2   :  { %6950 = vmatpush3.bf16.msra.mxu0 %v8405_v43 }
0x134d   :  { %v2505_v27 = vpop.f32.mrf.mxu0 }
0x134e   :  { %v2511_v45 = vsel %vm2012_vm9, %v2505_v27, -inf }
0x134f   :  { %2512 = vmax.xlane.f32.xlu0 %v2511_v45  ;;  %v6915_v57 = vpop.f32.mrf.mxu0 }
0x1351   :  { %v2508_v2 = vpop.f32.mrf.mxu0 }
0x1353   :  { %v6916_v53 = vpop.f32.mrf.mxu0 }
0x1354   :  { %v9026_v53 = vld [vmem:[#allocation28_spill] sm:$0xff] }
0x1355   :  { %v2607_v61 = vpop.f32.mrf.mxu0 }
0x1356   :  { %v2613_v60 = vsel %vm2012_vm9, %v2607_v61, -inf }
0x1357   :  { %2614 = vmax.xlane.f32.xlu1 %v2613_v60  ;;  %v6927_v62 = vpop.f32.mrf.mxu0 }
0x1359   :  { %v2610_v59 = vpop.f32.mrf.mxu0 }
0x135b   :  { %v6928_v10 = vpop.f32.mrf.mxu0 }
0x13d8   :  { %v2513_v49 = vpop.xlane.xlu0 %2512 }
0x13d9   :  { %v2514_v0 = vsub.f32 %v2505_v27, %v2513_v49 }
0x13db   :  { %v2515_v50 = vmul.f32 1.442695, %v2514_v0 }
0x13dd   :  { %7381 = vpow2.f32 %v2515_v50  ;;  %v2920_v50 = vld [vmem:[#allocation9 + $0x380] sm:$0xff] }
0x13e0   :  { %v2615_v4 = vpop.xlane.xlu1 %2614 }
0x13e1   :  { %v2616_v43 = vsub.f32 %v2607_v61, %v2615_v4  ;;  %v2928_v4 = vld [vmem:[#allocation9 + $0x3c0] sm:$0xff] }
0x13e2   :  { %v6370_v23 = vcombine.low %v2920_v50, %v2928_v4 }
0x13e3   :  { %v2617_v56 = vmul.f32 1.442695, %v2616_v43  ;;  %v2921_v43 = vld [vmem:[#allocation9 + $0x388] sm:$0xff] }
0x13e5   :  { %7383 = vpow2.f32 %v2617_v56  ;;  %v6371_v56 = vcombine.high %v2920_v50, %v2928_v4  ;;  %v2833_v50 = vld [vmem:[#allocation9 + $0xc8] sm:$0xff] }
0x13e7   :  { %3660 = vmatprep.subr.bf16.mxu0 %v6371_v56  ;;  %v2808_v56 = vld [vmem:[#allocation9] sm:$0xff] }
0x13ea   :  { %v7382_v44 = vpop.eup %7381 }
0x13eb   :  { %v2517_v15 = vsel %vm2012_vm9, %v7382_v44, 0.0 }
0x13ec   :  { %2518 = vadd.xlane.f32.xlu0 %v2517_v15  ;;  %v6372_v15 = vcombine.low %v2921_v43, %v2929_v35 }
0x13f0   :  { %2775 = vadd.xlane.f32.xlu0 %v2773_v14  ;;  %v6373_v14 = vcombine.high %v2921_v43, %v2929_v35  ;;  %v2816_v35 = vld [vmem:[#allocation9 + $0x40] sm:$0xff] }
0x13f2   :  { %v7384_v16 = vpop.eup %7383 }
0x13f3   :  { %v2619_v39 = vsel %vm2012_vm9, %v7384_v16, 0.0 }
0x13f4   :  { %2620 = vadd.xlane.f32.xlu1 %v2619_v39  ;;  %2767 = vadd.xlane.f32.xlu0 %v2765_v28  ;;  %v2905_v28 = vld [vmem:[#allocation9 + $0x308] sm:$0xff] }
0x13f5   :  { %v2913_v39 = vld [vmem:[#allocation9 + $0x348] sm:$0xff] }
0x13f6   :  { %v6356_v30 = vcombine.low %v2905_v28, %v2913_v39 }
0x1475   :  { %v2519_v11 = vpop.xlane.xlu0 %2518 }
0x1476   :  { %7385 = vrcp.f32 %v2519_v11  ;;  %v6357_v11 = vcombine.high %v2905_v28, %v2913_v39  ;;  %v2922_v39 = vld [vmem:[#allocation9 + $0x390] sm:$0xff] }
0x1479   :  { %v2776_v51 = vpop.xlane.xlu0 %2775 }
0x147a   :  { %v2779_v13 = vmul.f32 0.25, %v2776_v51  ;;  %v2896_v51 = vld [vmem:[#allocation9 + $0x2c0] sm:$0xff] }
0x147c   :  { %v2781_v46 = vsub.f32 %v8529_v7, %v2779_v13  ;;  %v2889_v13 = vld [vmem:[#allocation9 + $0x288] sm:$0xff] }
0x147d   :  { %v2621_v12 = vpop.xlane.xlu1 %2620 }
0x147e   :  { %7387 = vrcp.f32 %v2621_v12  ;;  %v8543_v29 = vmul.f32 %v7792_v3, %v2781_v46  ;;  %v2897_v46 = vld [vmem:[#allocation9 + $0x2c8] sm:$0xff] }
0x1480   :  { %v2785_v19 = vmul.f32 %v8543_v29, %v8543_v29 }
0x1482   :  { %2787 = vadd.xlane.f32.xlu0 %v2785_v19 }
0x1483   :  { %v7386_v32 = vpop.eup %7385 }
0x1484   :  { %v2521_v55 = vmul.f32 %v7386_v32, %v7382_v44  ;;  %v2912_v44 = vld [vmem:[#allocation9 + $0x340] sm:$0xff]  ;;  %v6341_v32 = vcombine.high %v2889_v13, %v2897_v46 }
0x1486   :  { %v2522_v33 = vpack.c.bf16 %v2521_v55, %v2521_v55  ;;  %v6340_v55 = vcombine.low %v2889_v13, %v2897_v46  ;;  %v2931_v46 = vld [vmem:[#allocation9 + $0x3d8] sm:$0xff] }
0x1488   :  { %6920 = vmatmul.mubr.msk.bf16.vlgmr.msra.gmra.mxu1 %vm2012_vm9, %v2522_v33 }
0x1489   :  { %6930 = vmatpush3.bf16.msra.mxu1 %v2629_v34  ;;  %6931 = vmatprep.mubr.msk.bf16.mxu1 %vm7625_vm4, %v9015_v6 }
0x148a   :  { %6955 = vmatprep.subr.bf16.mxu1 %v9015_v6 }
0x148b   :  { %v7388_v40 = vpop.eup %7387 }
0x148c   :  { %v2623_v63 = vmul.f32 %v7388_v40, %v7384_v16 }
0x148e   :  { %v2624_v52 = vpack.c.bf16 %v2623_v63, %v2623_v63 }
0x1490   :  { %6932 = vmatmul.mubr.msk.bf16.vlgmr.msra.gmra.mxu1 %vm2012_vm9, %v2624_v52 }
0x1491   :  { %6956 = vmatpush3.bf16.msra.mxu1 %v8410_v5  ;;  %6971 = vmatprep.mubr.msk.bf16.mxu1 %vm7625_vm4, %v9015_v6  ;;  %v9024_v5 = vld [vmem:[#allocation31_spill] sm:$0xff] }
0x1492   :  { %6957 = vmatprep.subr.bf16.mxu1 %v9015_v6 }
0x1495   :  { %6958 = vmatpush3.bf16.msra.mxu1 %v8414_v31 }
0x1496   :  { %6959 = vmatprep.subr.bf16.mxu1 %v9015_v6 }
0x1499   :  { %6960 = vmatpush3.bf16.msra.mxu1 %v8420_v47 }
0x149a   :  { %6961 = vmatprep.subr.bf16.mxu1 %v9015_v6 }
0x149d   :  { %6962 = vmatpush3.bf16.msra.mxu1 %v9022_v41  ;;  %v2872_v41 = vld [vmem:[#allocation9 + $0x200] sm:$0xff] }
0x149e   :  { %6963 = vmatprep.subr.bf16.mxu1 %v9015_v6 }
0x14a1   :  { %6964 = vmatpush3.bf16.msra.mxu1 %v9023_v42  ;;  %v2880_v42 = vld [vmem:[#allocation9 + $0x240] sm:$0xff] }
0x14a2   :  { %6965 = vmatprep.subr.bf16.mxu1 %v9015_v6 }
0x14a5   :  { %6966 = vmatpush3.bf16.msra.mxu1 %v9024_v5  ;;  %v2873_v5 = vld [vmem:[#allocation9 + $0x208] sm:$0xff] }
0x14a6   :  { %6967 = vmatprep.subr.bf16.mxu1 %v9015_v6 }
0x14a9   :  { %6968 = vmatpush3.bf16.msra.mxu1 %v9025_v37  ;;  %v6323_v37 = vcombine.high %v2872_v41, %v2880_v42 }
0x14aa   :  { %6969 = vmatprep.subr.bf16.mxu1 %v9015_v6 }
0x14ad   :  { %6970 = vmatpush3.bf16.msra.mxu1 %v8440_v36 }
0x14ae   :  { %3703 = vmatprep.subr.bf16.mxu1 %v6373_v14  ;;  %v6258_v14 = vcombine.low %v2808_v56, %v2816_v35 }
0x1548   :  { %v2563_v31 = vpop.f32.mrf.mxu1 }
0x1549   :  { %v2569_v47 = vpack.c.bf16 %v2563_v31, %v2563_v31  ;;  %v2881_v31 = vld [vmem:[#allocation9 + $0x248] sm:$0xff] }
0x154a   :  { %v6921_v1 = vpop.f32.mrf.mxu1 }
0x154b   :  { %6972 = vmatmul.mubr.bf16.vlgmr.msra.gmra.mxu1 %v2569_v47  ;;  %v6322_v47 = vcombine.low %v2872_v41, %v2880_v42  ;;  %v6324_v1 = vcombine.low %v2873_v5, %v2881_v31 }
0x154c   :  { %v2566_v26 = vpop.f32.mrf.mxu1  ;;  %3735 = vmatprep.mubr.bf16.mxu1 %v9020_v54  ;;  %3704 = vmatpush1.bf16.msra.mxu1 %v6372_v15  ;;  %v2817_v15 = vld [vmem:[#allocation9 + $0x48] sm:$0xff] }
0x154d   :  { %3705 = vmatprep.subr.bf16.mxu1 %v6357_v11  ;;  %v6325_v26 = vcombine.high %v2873_v5, %v2881_v31  ;;  %v2923_v11 = vld [vmem:[#allocation9 + $0x398] sm:$0xff] }
0x154e   :  { %v6922_v20 = vpop.f32.mrf.mxu1 }
0x154f   :  { %v2856_v20 = vld [vmem:[#allocation9 + $0x180] sm:$0xff] }
0x1550   :  { %v2665_v17 = vpop.f32.mrf.mxu1  ;;  %3706 = vmatpush1.bf16.msra.mxu1 %v6356_v30  ;;  %v6377_v30 = vcombine.high %v2923_v11, %v2931_v46 }
0x1551   :  { %v2671_v18 = vpack.c.bf16 %v2665_v17, %v2665_v17  ;;  %3707 = vmatprep.subr.bf16.mxu1 %v6341_v32  ;;  %v2864_v17 = vld [vmem:[#allocation9 + $0x1c0] sm:$0xff] }
0x1552   :  { %v6933_v21 = vpop.f32.mrf.mxu1 }
0x1553   :  { %6952 = vmatmul.mubr.bf16.vlgmr.msra.gmra.mxu0 %v2671_v18  ;;  %v2857_v18 = vld [vmem:[#allocation9 + $0x188] sm:$0xff] }
0x1554   :  { %v2668_v22 = vpop.f32.mrf.mxu1  ;;  %3692 = vmatprep.mubr.bf16.mxu0 %v9020_v54  ;;  %3661 = vmatpush1.bf16.msra.mxu0 %v6370_v23  ;;  %v2865_v21 = vld [vmem:[#allocation9 + $0x1c8] sm:$0xff] }
0x1555   :  { %3708 = vmatpush1.bf16.msra.mxu1 %v6340_v55  ;;  %v6306_v22 = vcombine.low %v2856_v20, %v2864_v17 }
0x1556   :  { %v6934_v24 = vpop.f32.mrf.mxu1  ;;  %3709 = vmatprep.subr.bf16.mxu1 %v6325_v26 }
0x1557   :  { %v6308_v24 = vcombine.low %v2857_v18, %v2865_v21 }
0x1559   :  { %3710 = vmatpush1.bf16.msra.mxu1 %v6324_v1 }
0x160b   :  { %v2746_v48 = vpop.f32.mrf.mxu1 }
0x160d   :  { %v6973_v25 = vpop.f32.mrf.mxu1 }
0x160e   :  { %v2840_v25 = vld [vmem:[#allocation9 + $0x100] sm:$0xff] }
0x160f   :  { %v2749_v27 = vpop.f32.mrf.mxu1 }
0x1610   :  { %v2848_v27 = vld [vmem:[#allocation9 + $0x140] sm:$0xff] }
0x1611   :  { %v6974_v36 = vpop.f32.mrf.mxu1 }
0x1612   :  { %v2841_v36 = vld [vmem:[#allocation9 + $0x108] sm:$0xff] }
0x1613   :  { %v2706_v45 = vpop.f32.mrf.mxu0 }
0x1614   :  { %v2747_v57 = vadd.f32 %v2746_v48, %v2706_v45  ;;  %v6309_v48 = vcombine.high %v2857_v18, %v2865_v21  ;;  %v6291_v45 = vcombine.high %v2840_v25, %v2848_v27  ;;  %v2906_v21 = vld [vmem:[#allocation9 + $0x310] sm:$0xff] }
0x1615   :  { %v6953_v2 = vpop.f32.mrf.mxu0 }
0x1616   :  { %v2753_v61 = vadd.f32 %v2747_v57, %v9026_v53  ;;  %3711 = vmatprep.subr.bf16.mxu1 %v6309_v48  ;;  %v2849_v57 = vld [vmem:[#allocation9 + $0x148] sm:$0xff]  ;;  %v6290_v2 = vcombine.low %v2840_v25, %v2848_v27  ;;  %v2915_v48 = vld [vmem:[#allocation9 + $0x358] sm:$0xff] }
0x1617   :  { %v2709_v60 = vpop.f32.mrf.mxu0  ;;  %3712 = vmatpush1.bf16.msra.mxu1 %v6308_v24  ;;  %v6292_v53 = vcombine.low %v2841_v36, %v2849_v57  ;;  %v2907_v24 = vld [vmem:[#allocation9 + $0x318] sm:$0xff] }
0x1618   :  { %v8576_v62 = vadd.f32 %v8526_v38, %v2753_v61  ;;  %v2904_v38 = vld [vmem:[#allocation9 + $0x300] sm:$0xff]  ;;  %v6293_v61 = vcombine.high %v2841_v36, %v2849_v57  ;;  %v6361_v57 = vcombine.high %v2907_v24, %v2915_v48 }
0x1619   :  { %v6954_v59 = vpop.f32.mrf.mxu0  ;;  %v6355_v16 = vcombine.high %v2904_v38, %v2912_v44  ;;  %v6354_v12 = vcombine.low %v2904_v38, %v2912_v44  ;;  %v2824_v60 = vld [vmem:[#allocation9 + $0x80] sm:$0xff]  ;;  %v2809_v38 = vld [vmem:[#allocation9 + $0x8] sm:$0xff]  ;;  %v6259_v44 = vcombine.high %v2808_v56, %v2816_v35  ;;  %v2858_v35 = vld [vmem:[#allocation9 + $0x190] sm:$0xff] }
0x161a   :  { %9027 = vst [vmem:[#allocation29_spill] sm:$0xff] %v8576_v62  ;;  %v2774_v10 = vmul.f32 %v7792_v3, %v8576_v62  ;;  %v8582_v49 = vmul.f32 %v7803_v8, %v8576_v62  ;;  %v2888_v8 = vld [vmem:[#allocation9 + $0x280] sm:$0xff]  ;;  %3713 = vmatprep.subr.bf16.mxu1 %v6293_v61  ;;  %v6261_v28 = vcombine.high %v2809_v38, %v2817_v15  ;;  %v2899_v61 = vld [vmem:[#allocation9 + $0x2d8] sm:$0xff] }
0x161b   :  { %3662 = vmatprep.subr.bf16.mxu0 %v6355_v16  ;;  %v6339_v19 = vcombine.high %v2888_v8, %v2896_v51  ;;  %v6338_v58 = vcombine.low %v2888_v8, %v2896_v51  ;;  %v2832_v59 = vld [vmem:[#allocation9 + $0xc0] sm:$0xff]  ;;  %3714 = vmatpush1.bf16.msra.mxu1 %v6292_v53  ;;  %v6260_v16 = vcombine.low %v2809_v38, %v2817_v15  ;;  %v2930_v8 = vld [vmem:[#allocation9 + $0x3d0] sm:$0xff]  ;;  %v2867_v15 = vld [vmem:[#allocation9 + $0x1d8] sm:$0xff] }
0x161c   :  { %2777 = vadd.xlane.f32.xlu1 %v2774_v10  ;;  %v2766_v0 = vmul.f32 %v8582_v49, %v8582_v49  ;;  %3663 = vmatpush1.bf16.msra.mxu0 %v6354_v12  ;;  %v2825_v10 = vld [vmem:[#allocation9 + $0x88] sm:$0xff]  ;;  %v6274_v4 = vcombine.low %v2824_v60, %v2832_v59  ;;  %v6374_v51 = vcombine.low %v2922_v39, %v2930_v8  ;;  %v2898_v53 = vld [vmem:[#allocation9 + $0x2d0] sm:$0xff] }
0x161d   :  { %3664 = vmatprep.subr.bf16.mxu0 %v6339_v19  ;;  %v6276_v43 = vcombine.low %v2825_v10, %v2833_v50  ;;  %v6277_v23 = vcombine.high %v2825_v10, %v2833_v50  ;;  %v6375_v13 = vcombine.high %v2922_v39, %v2930_v8  ;;  %v6376_v12 = vcombine.low %v2923_v11, %v2931_v46  ;;  %v2768_v19 = vpop.xlane.xlu0 %2767  ;;  %v2882_v10 = vld [vmem:[#allocation9 + $0x250] sm:$0xff]  ;;  %v2883_v50 = vld [vmem:[#allocation9 + $0x258] sm:$0xff] }
0x161e   :  { %v2866_v38 = vld [vmem:[#allocation9 + $0x1d0] sm:$0xff] }
0x161f   :  { %3715 = vmatprep.subr.bf16.mxu1 %v6277_v23  ;;  %v2842_v8 = vld [vmem:[#allocation9 + $0x110] sm:$0xff]  ;;  %v6310_v46 = vcombine.low %v2858_v35, %v2866_v38 }
0x1620   :  { %2769 = vadd.xlane.f32.xlu1 %v2766_v0  ;;  %3665 = vmatpush1.bf16.msra.mxu0 %v6338_v58  ;;  %v6275_v0 = vcombine.high %v2824_v60, %v2832_v59  ;;  %v2874_v59 = vld [vmem:[#allocation9 + $0x210] sm:$0xff] }
0x1621   :  { %3666 = vmatprep.subr.bf16.mxu0 %v6323_v37  ;;  %3716 = vmatpush1.bf16.msra.mxu1 %v6276_v43  ;;  %v2788_v32 = vpop.xlane.xlu0 %2787  ;;  %v6327_v23 = vcombine.high %v2874_v59, %v2882_v10  ;;  %v2850_v11 = vld [vmem:[#allocation9 + $0x150] sm:$0xff] }
0x1622   :  { %3717 = vmatprep.subr.bf16.mxu1 %v6261_v28  ;;  %v2791_v55 = vmul.f32 0.25, %v2788_v32  ;;  %v6311_v28 = vcombine.high %v2858_v35, %v2866_v38  ;;  %v2826_v32 = vld [vmem:[#allocation9 + $0x90] sm:$0xff]  ;;  %v2885_v35 = vld [vmem:[#allocation9 + $0x268] sm:$0xff] }
0x1624   :  { %3667 = vmatpush1.bf16.msra.mxu0 %v6322_v47 }
0x1625   :  { %3718 = vmatpush1.bf16.msra.mxu1 %v6260_v16 }
0x1626   :  { %3789 = vmatprep.subr.bf16.mxu1 %v6377_v30  ;;  %v6295_v30 = vcombine.high %v2842_v8, %v2850_v11 }
0x16a5   :  { %v2778_v33 = vpop.xlane.xlu1 %2777 }
0x16a6   :  { %v2780_v34 = vmul.f32 0.25, %v2778_v33  ;;  %v2771_v33 = vmul.f32 0.25, %v2768_v19 }
0x16a8   :  { %v2782_v40 = vsub.f32 %v8576_v62, %v2780_v34 }
0x16a9   :  { %v2770_v58 = vpop.xlane.xlu1 %2769 }
0x16aa   :  { %v8588_v63 = vmul.f32 %v7792_v3, %v2782_v40  ;;  %v6307_v3 = vcombine.high %v2856_v20, %v2864_v17  ;;  %v2772_v34 = vmul.f32 0.25, %v2770_v58  ;;  %v2799_v40 = vadd.f32 1e-05, %v2791_v55  ;;  %v2834_v58 = vld [vmem:[#allocation9 + $0xd0] sm:$0xff]  ;;  %v2827_v55 = vld [vmem:[#allocation9 + $0x98] sm:$0xff] }
0x16ac   :  { %v2786_v52 = vmul.f32 %v8588_v63, %v8588_v63  ;;  %3668 = vmatprep.subr.bf16.mxu0 %v6307_v3  ;;  %v2794_v41 = vadd.f32 0.01, %v2772_v34  ;;  %7389 = vrsqrt.f32 %v2799_v40  ;;  %v6294_v34 = vcombine.low %v2842_v8, %v2850_v11  ;;  %v2869_v8 = vld [vmem:[#allocation9 + $0x1e8] sm:$0xff] }
0x16ad   :  { %3669 = vmatpush1.bf16.msra.mxu0 %v6306_v22  ;;  %v2914_v22 = vld [vmem:[#allocation9 + $0x350] sm:$0xff] }
0x16ae   :  { %2789 = vadd.xlane.f32.xlu1 %v2786_v52  ;;  %3670 = vmatprep.subr.bf16.mxu0 %v6291_v45  ;;  %v2793_v52 = vadd.f32 0.01, %v2771_v33  ;;  %v6359_v45 = vcombine.high %v2906_v21, %v2914_v22  ;;  %v2835_v33 = vld [vmem:[#allocation9 + $0xd8] sm:$0xff] }
0x16b0   :  { %7391 = vrsqrt.f32 %v2793_v52  ;;  %v6279_v52 = vcombine.high %v2826_v32, %v2834_v58 }
0x16b1   :  { %3671 = vmatpush1.bf16.msra.mxu0 %v6290_v2  ;;  %7393 = vrsqrt.f32 %v2794_v41  ;;  %v2890_v2 = vld [vmem:[#allocation9 + $0x290] sm:$0xff]  ;;  %v6281_v41 = vcombine.high %v2827_v55, %v2835_v33 }
0x16b2   :  { %3672 = vmatprep.subr.bf16.mxu0 %v6275_v0  ;;  %v2875_v0 = vld [vmem:[#allocation9 + $0x218] sm:$0xff] }
0x16b3   :  { %v6329_v56 = vcombine.high %v2875_v0, %v2883_v50  ;;  %v6328_v16 = vcombine.low %v2875_v0, %v2883_v50 }
0x16b5   :  { %3673 = vmatpush1.bf16.msra.mxu0 %v6274_v4  ;;  %v6342_v4 = vcombine.low %v2890_v2, %v2898_v53 }
0x16b6   :  { %3674 = vmatprep.subr.bf16.mxu0 %v6259_v44  ;;  %v2859_v44 = vld [vmem:[#allocation9 + $0x198] sm:$0xff] }
0x16b7   :  { %v6313_v39 = vcombine.high %v2859_v44, %v2867_v15 }
0x16b9   :  { %3675 = vmatpush1.bf16.msra.mxu0 %v6258_v14  ;;  %v7390_v31 = vpop.eup %7389  ;;  %v6326_v14 = vcombine.low %v2874_v59, %v2882_v10  ;;  %v2901_v59 = vld [vmem:[#allocation9 + $0x2e8] sm:$0xff] }
0x16ba   :  { %3746 = vmatprep.subr.bf16.mxu0 %v6375_v13  ;;  %v2803_v26 = vmul.f32 %v7390_v31, %v8543_v29  ;;  %v2891_v29 = vld [vmem:[#allocation9 + $0x298] sm:$0xff] }
0x16bb   :  { %v6345_v60 = vcombine.high %v2891_v29, %v2899_v61  ;;  %v6344_v43 = vcombine.low %v2891_v29, %v2899_v61  ;;  %v2851_v13 = vld [vmem:[#allocation9 + $0x158] sm:$0xff] }
0x16bc   :  { %v2819_v31 = vld [vmem:[#allocation9 + $0x58] sm:$0xff] }
0x16bd   :  { %v7392_v47 = vpop.eup %7391 }
0x16be   :  { %v7394_v1 = vpop.eup %7393  ;;  %v2797_v17 = vmul.f32 %v7392_v47, %v8536_v9  ;;  %v6358_v9 = vcombine.low %v2906_v21, %v2914_v22  ;;  %v6278_v47 = vcombine.low %v2826_v32, %v2834_v58  ;;  %v2933_v21 = vld [vmem:[#allocation9 + $0x3e8] sm:$0xff] }
0x16bf   :  { %v2798_v18 = vmul.f32 %v7394_v1, %v8582_v49  ;;  %v6360_v49 = vcombine.low %v2907_v24, %v2915_v48  ;;  %v6280_v1 = vcombine.low %v2827_v55, %v2835_v33  ;;  %v2853_v32 = vld [vmem:[#allocation9 + $0x168] sm:$0xff] }
0x16c0   :  { %v2805_v25 = vadd.f32 %v2803_v26, %v2797_v17  ;;  %v2924_v17 = vld [vmem:[#allocation9 + $0x3a0] sm:$0xff] }
0x1737   :  { %v2790_v42 = vpop.xlane.xlu1 %2789 }
0x1738   :  { %v2792_v5 = vmul.f32 0.25, %v2790_v42  ;;  %v2810_v42 = vld [vmem:[#allocation9 + $0x10] sm:$0xff] }
0x173a   :  { %v2800_v37 = vadd.f32 1e-05, %v2792_v5  ;;  %v2818_v5 = vld [vmem:[#allocation9 + $0x50] sm:$0xff] }
0x173b   :  { %v6263_v26 = vcombine.high %v2810_v42, %v2818_v5  ;;  %v6262_v22 = vcombine.low %v2810_v42, %v2818_v5  ;;  %v2837_v42 = vld [vmem:[#allocation9 + $0xe8] sm:$0xff] }
0x173c   :  { %7395 = vrsqrt.f32 %v2800_v37  ;;  %v2811_v37 = vld [vmem:[#allocation9 + $0x18] sm:$0xff] }
0x173d   :  { %v6264_v24 = vcombine.low %v2811_v37, %v2819_v31 }
0x1749   :  { %v7396_v20 = vpop.eup %7395 }
0x174a   :  { %v2804_v3 = vmul.f32 %v7396_v20, %v8588_v63  ;;  %v6343_v63 = vcombine.high %v2890_v2, %v2898_v53  ;;  %v6265_v20 = vcombine.high %v2811_v37, %v2819_v31  ;;  %v2917_v2 = vld [vmem:[#allocation9 + $0x368] sm:$0xff] }
0x174c   :  { %v2806_v27 = vadd.f32 %v2804_v3, %v2798_v18  ;;  %v2932_v18 = vld [vmem:[#allocation9 + $0x3e0] sm:$0xff]  ;;  %v2925_v3 = vld [vmem:[#allocation9 + $0x3a8] sm:$0xff] }
0x174d   :  { %v6379_v48 = vcombine.high %v2924_v17, %v2932_v18  ;;  %v6378_v53 = vcombine.low %v2924_v17, %v2932_v18  ;;  %v6380_v29 = vcombine.low %v2925_v3, %v2933_v21  ;;  %v2821_v17 = vld [vmem:[#allocation9 + $0x68] sm:$0xff] }
0x174e   :  { %v8596_v36 = vpack.c.bf16 %v2806_v27, %v2805_v25  ;;  %v6381_v25 = vcombine.high %v2925_v3, %v2933_v21  ;;  %v2908_v27 = vld [vmem:[#allocation9 + $0x320] sm:$0xff] }
0x1750   :  { %3693 = vmatmul.mubr.bf16.vlgmr.msra.gmra.mxu0 %v8596_v36  ;;  %3736 = vmatmul.mubr.bf16.vlgmr.msra.gmra.mxu1 %v8596_v36 }
0x1751   :  { %3747 = vmatpush1.bf16.msra.mxu0 %v6374_v51  ;;  %3790 = vmatpush1.bf16.msra.mxu1 %v6376_v12  ;;  %v2843_v51 = vld [vmem:[#allocation9 + $0x118] sm:$0xff]  ;;  %v6312_v12 = vcombine.low %v2859_v44, %v2867_v15 }
0x1752   :  { %3748 = vmatprep.subr.bf16.mxu0 %v6359_v45  ;;  %3791 = vmatprep.subr.bf16.mxu1 %v6361_v57  ;;  %v6297_v19 = vcombine.high %v2843_v51, %v2851_v13  ;;  %v6296_v40 = vcombine.low %v2843_v51, %v2851_v13  ;;  %v2916_v45 = vld [vmem:[#allocation9 + $0x360] sm:$0xff]  ;;  %v2909_v57 = vld [vmem:[#allocation9 + $0x328] sm:$0xff] }
0x1753   :  { %3778 = vmatprep.mubr.bf16.mxu0 %v9020_v54  ;;  %3821 = vmatprep.mubr.bf16.mxu1 %v9020_v54  ;;  %v6363_v61 = vcombine.high %v2908_v27, %v2916_v45  ;;  %v6362_v10 = vcombine.low %v2908_v27, %v2916_v45  ;;  %v6364_v0 = vcombine.low %v2909_v57, %v2917_v2  ;;  %v2935_v27 = vld [vmem:[#allocation9 + $0x3f8] sm:$0xff] }
0x1755   :  { %3749 = vmatpush1.bf16.msra.mxu0 %v6358_v9  ;;  %3792 = vmatpush1.bf16.msra.mxu1 %v6360_v49  ;;  %v6365_v9 = vcombine.high %v2909_v57, %v2917_v2  ;;  %v2892_v49 = vld [vmem:[#allocation9 + $0x2a0] sm:$0xff] }
0x1756   :  { %3750 = vmatprep.subr.bf16.mxu0 %v6343_v63  ;;  %3793 = vmatprep.subr.bf16.mxu1 %v6345_v60  ;;  %v2900_v63 = vld [vmem:[#allocation9 + $0x2e0] sm:$0xff]  ;;  %v2893_v60 = vld [vmem:[#allocation9 + $0x2a8] sm:$0xff] }
0x1757   :  { %v6347_v50 = vcombine.high %v2892_v49, %v2900_v63  ;;  %v6346_v38 = vcombine.low %v2892_v49, %v2900_v63  ;;  %v6348_v44 = vcombine.low %v2893_v60, %v2901_v59  ;;  %v2919_v49 = vld [vmem:[#allocation9 + $0x378] sm:$0xff] }
0x1759   :  { %3751 = vmatpush1.bf16.msra.mxu0 %v6342_v4  ;;  %3794 = vmatpush1.bf16.msra.mxu1 %v6344_v43  ;;  %v6349_v4 = vcombine.high %v2893_v60, %v2901_v59  ;;  %v2876_v43 = vld [vmem:[#allocation9 + $0x220] sm:$0xff] }
0x175a   :  { %3752 = vmatprep.subr.bf16.mxu0 %v6327_v23  ;;  %3795 = vmatprep.subr.bf16.mxu1 %v6329_v56  ;;  %v2884_v23 = vld [vmem:[#allocation9 + $0x260] sm:$0xff]  ;;  %v2877_v56 = vld [vmem:[#allocation9 + $0x228] sm:$0xff] }
0x175b   :  { %v6331_v15 = vcombine.high %v2876_v43, %v2884_v23  ;;  %v6330_v11 = vcombine.low %v2876_v43, %v2884_v23  ;;  %v6332_v51 = vcombine.low %v2877_v56, %v2885_v35  ;;  %v2903_v43 = vld [vmem:[#allocation9 + $0x2f8] sm:$0xff] }
0x175d   :  { %3753 = vmatpush1.bf16.msra.mxu0 %v6326_v14  ;;  %3796 = vmatpush1.bf16.msra.mxu1 %v6328_v16  ;;  %v6333_v14 = vcombine.high %v2877_v56, %v2885_v35  ;;  %v2860_v16 = vld [vmem:[#allocation9 + $0x1a0] sm:$0xff] }
0x175e   :  { %3754 = vmatprep.subr.bf16.mxu0 %v6311_v28  ;;  %3797 = vmatprep.subr.bf16.mxu1 %v6313_v39  ;;  %v2868_v28 = vld [vmem:[#allocation9 + $0x1e0] sm:$0xff]  ;;  %v2861_v39 = vld [vmem:[#allocation9 + $0x1a8] sm:$0xff] }
0x175f   :  { %v6315_v13 = vcombine.high %v2860_v16, %v2868_v28  ;;  %v6314_v58 = vcombine.low %v2860_v16, %v2868_v28  ;;  %v6316_v55 = vcombine.low %v2861_v39, %v2869_v8  ;;  %v2887_v16 = vld [vmem:[#allocation9 + $0x278] sm:$0xff] }
0x1761   :  { %3755 = vmatpush1.bf16.msra.mxu0 %v6310_v46  ;;  %3798 = vmatpush1.bf16.msra.mxu1 %v6312_v12  ;;  %v6317_v46 = vcombine.high %v2861_v39, %v2869_v8  ;;  %v2844_v12 = vld [vmem:[#allocation9 + $0x120] sm:$0xff] }
0x1762   :  { %3756 = vmatprep.subr.bf16.mxu0 %v6295_v30  ;;  %3799 = vmatprep.subr.bf16.mxu1 %v6297_v19  ;;  %v2852_v30 = vld [vmem:[#allocation9 + $0x160] sm:$0xff]  ;;  %v2845_v19 = vld [vmem:[#allocation9 + $0x128] sm:$0xff] }
0x1763   :  { %v6299_v33 = vcombine.high %v2844_v12, %v2852_v30  ;;  %v6298_v5 = vcombine.low %v2844_v12, %v2852_v30  ;;  %v6300_v37 = vcombine.low %v2845_v19, %v2853_v32  ;;  %v2871_v12 = vld [vmem:[#allocation9 + $0x1f8] sm:$0xff] }
0x1765   :  { %3757 = vmatpush1.bf16.msra.mxu0 %v6294_v34  ;;  %3800 = vmatpush1.bf16.msra.mxu1 %v6296_v40  ;;  %v6301_v34 = vcombine.high %v2845_v19, %v2853_v32  ;;  %v2828_v40 = vld [vmem:[#allocation9 + $0xa0] sm:$0xff] }
0x1766   :  { %3758 = vmatprep.subr.bf16.mxu0 %v6279_v52  ;;  %3801 = vmatprep.subr.bf16.mxu1 %v6281_v41  ;;  %v2836_v52 = vld [vmem:[#allocation9 + $0xe0] sm:$0xff]  ;;  %v2829_v41 = vld [vmem:[#allocation9 + $0xa8] sm:$0xff] }
0x1767   :  { %v6283_v31 = vcombine.high %v2828_v40, %v2836_v52  ;;  %v6282_v18 = vcombine.low %v2828_v40, %v2836_v52  ;;  %v6284_v3 = vcombine.low %v2829_v41, %v2837_v42  ;;  %v2855_v40 = vld [vmem:[#allocation9 + $0x178] sm:$0xff] }
0x1769   :  { %3759 = vmatpush1.bf16.msra.mxu0 %v6278_v47  ;;  %3802 = vmatpush1.bf16.msra.mxu1 %v6280_v1  ;;  %v6285_v47 = vcombine.high %v2829_v41, %v2837_v42  ;;  %v2812_v1 = vld [vmem:[#allocation9 + $0x20] sm:$0xff] }
0x176a   :  { %3760 = vmatprep.subr.bf16.mxu0 %v6263_v26  ;;  %3803 = vmatprep.subr.bf16.mxu1 %v6265_v20  ;;  %v2820_v26 = vld [vmem:[#allocation9 + $0x60] sm:$0xff]  ;;  %v2813_v20 = vld [vmem:[#allocation9 + $0x28] sm:$0xff] }
0x176b   :  { %v6267_v21 = vcombine.high %v2812_v1, %v2820_v26  ;;  %v6266_v45 = vcombine.low %v2812_v1, %v2820_v26  ;;  %v6268_v57 = vcombine.low %v2813_v20, %v2821_v17  ;;  %v2839_v1 = vld [vmem:[#allocation9 + $0xf8] sm:$0xff] }
0x176d   :  { %3761 = vmatpush1.bf16.msra.mxu0 %v6262_v22  ;;  %3804 = vmatpush1.bf16.msra.mxu1 %v6264_v24  ;;  %v6269_v22 = vcombine.high %v2813_v20, %v2821_v17  ;;  %v2926_v24 = vld [vmem:[#allocation9 + $0x3b0] sm:$0xff] }
0x176e   :  { %3832 = vmatprep.subr.bf16.mxu0 %v6379_v48  ;;  %3875 = vmatprep.subr.bf16.mxu1 %v6381_v25  ;;  %v2934_v48 = vld [vmem:[#allocation9 + $0x3f0] sm:$0xff]  ;;  %v2927_v25 = vld [vmem:[#allocation9 + $0x3b8] sm:$0xff] }
0x176f   :  { %v6383_v2 = vcombine.high %v2926_v24, %v2934_v48  ;;  %v6382_v63 = vcombine.low %v2926_v24, %v2934_v48  ;;  %v6384_v60 = vcombine.low %v2927_v25, %v2935_v27  ;;  %v2823_v24 = vld [vmem:[#allocation9 + $0x78] sm:$0xff] }
0x1770   :  { %3779 = vmatmul.mubr.bf16.vlgmr.msra.gmra.mxu0 %v8596_v36  ;;  %3822 = vmatmul.mubr.bf16.vlgmr.msra.gmra.mxu1 %v8596_v36 }
0x1771   :  { %3833 = vmatpush1.bf16.msra.mxu0 %v6378_v53  ;;  %3876 = vmatpush1.bf16.msra.mxu1 %v6380_v29  ;;  %v6385_v53 = vcombine.high %v2927_v25, %v2935_v27  ;;  %v2910_v29 = vld [vmem:[#allocation9 + $0x330] sm:$0xff] }
0x1772   :  { %3834 = vmatprep.subr.bf16.mxu0 %v6363_v61  ;;  %3877 = vmatprep.subr.bf16.mxu1 %v6365_v9  ;;  %v2918_v61 = vld [vmem:[#allocation9 + $0x370] sm:$0xff]  ;;  %v2911_v9 = vld [vmem:[#allocation9 + $0x338] sm:$0xff] }
0x1773   :  { %3864 = vmatprep.mubr.bf16.mxu0 %v9020_v54  ;;  %3907 = vmatprep.mubr.bf16.mxu1 %v9020_v54  ;;  %v6367_v59 = vcombine.high %v2910_v29, %v2918_v61  ;;  %v6366_v23 = vcombine.low %v2910_v29, %v2918_v61  ;;  %v6368_v56 = vcombine.low %v2911_v9, %v2919_v49  ;;  %v4125_v29 = vld [vmem:[#allocation10 + $0x3c8] sm:$0xff] }
0x1775   :  { %3835 = vmatpush1.bf16.msra.mxu0 %v6362_v10  ;;  %3878 = vmatpush1.bf16.msra.mxu1 %v6364_v0  ;;  %v6369_v10 = vcombine.high %v2911_v9, %v2919_v49  ;;  %v2894_v0 = vld [vmem:[#allocation9 + $0x2b0] sm:$0xff] }
0x1776   :  { %3836 = vmatprep.subr.bf16.mxu0 %v6347_v50  ;;  %3879 = vmatprep.subr.bf16.mxu1 %v6349_v4  ;;  %v2902_v50 = vld [vmem:[#allocation9 + $0x2f0] sm:$0xff]  ;;  %v2895_v4 = vld [vmem:[#allocation9 + $0x2b8] sm:$0xff] }
0x1777   :  { %v6351_v35 = vcombine.high %v2894_v0, %v2902_v50  ;;  %v6350_v28 = vcombine.low %v2894_v0, %v2902_v50  ;;  %v6352_v39 = vcombine.low %v2895_v4, %v2903_v43  ;;  %v4109_v0 = vld [vmem:[#allocation10 + $0x348] sm:$0xff] }
0x1779   :  { %3837 = vmatpush1.bf16.msra.mxu0 %v6346_v38  ;;  %3880 = vmatpush1.bf16.msra.mxu1 %v6348_v44  ;;  %v6353_v38 = vcombine.high %v2895_v4, %v2903_v43  ;;  %v2878_v44 = vld [vmem:[#allocation9 + $0x230] sm:$0xff] }
0x177a   :  { %3838 = vmatprep.subr.bf16.mxu0 %v6331_v15  ;;  %3881 = vmatprep.subr.bf16.mxu1 %v6333_v14  ;;  %v2886_v15 = vld [vmem:[#allocation9 + $0x270] sm:$0xff]  ;;  %v2879_v14 = vld [vmem:[#allocation9 + $0x238] sm:$0xff] }
0x177b   :  { %v6335_v8 = vcombine.high %v2878_v44, %v2886_v15  ;;  %v6334_v30 = vcombine.low %v2878_v44, %v2886_v15  ;;  %v6336_v19 = vcombine.low %v2879_v14, %v2887_v16  ;;  %v4093_v44 = vld [vmem:[#allocation10 + $0x2c8] sm:$0xff] }
0x177d   :  { %3839 = vmatpush1.bf16.msra.mxu0 %v6330_v11  ;;  %3882 = vmatpush1.bf16.msra.mxu1 %v6332_v51  ;;  %v6337_v11 = vcombine.high %v2879_v14, %v2887_v16  ;;  %v2862_v51 = vld [vmem:[#allocation9 + $0x1b0] sm:$0xff] }
0x177e   :  { %3840 = vmatprep.subr.bf16.mxu0 %v6315_v13  ;;  %3883 = vmatprep.subr.bf16.mxu1 %v6317_v46  ;;  %v2870_v13 = vld [vmem:[#allocation9 + $0x1f0] sm:$0xff]  ;;  %v2863_v46 = vld [vmem:[#allocation9 + $0x1b8] sm:$0xff] }
0x177f   :  { %v6319_v32 = vcombine.high %v2862_v51, %v2870_v13  ;;  %v6318_v52 = vcombine.low %v2862_v51, %v2870_v13  ;;  %v6320_v41 = vcombine.low %v2863_v46, %v2871_v12  ;;  %v4077_v51 = vld [vmem:[#allocation10 + $0x248] sm:$0xff] }
0x1781   :  { %3841 = vmatpush1.bf16.msra.mxu0 %v6314_v58  ;;  %3884 = vmatpush1.bf16.msra.mxu1 %v6316_v55  ;;  %v6321_v58 = vcombine.high %v2863_v46, %v2871_v12  ;;  %v2846_v55 = vld [vmem:[#allocation9 + $0x130] sm:$0xff] }
0x1782   :  { %3842 = vmatprep.subr.bf16.mxu0 %v6299_v33  ;;  %3885 = vmatprep.subr.bf16.mxu1 %v6301_v34  ;;  %v2854_v33 = vld [vmem:[#allocation9 + $0x170] sm:$0xff]  ;;  %v2847_v34 = vld [vmem:[#allocation9 + $0x138] sm:$0xff] }
0x1783   :  { %v6303_v42 = vcombine.high %v2846_v55, %v2854_v33  ;;  %v6302_v26 = vcombine.low %v2846_v55, %v2854_v33  ;;  %v6304_v20 = vcombine.low %v2847_v34, %v2855_v40  ;;  %v4061_v55 = vld [vmem:[#allocation10 + $0x1c8] sm:$0xff] }
0x1785   :  { %3843 = vmatpush1.bf16.msra.mxu0 %v6298_v5  ;;  %3886 = vmatpush1.bf16.msra.mxu1 %v6300_v37  ;;  %v6305_v5 = vcombine.high %v2847_v34, %v2855_v40  ;;  %v2830_v37 = vld [vmem:[#allocation9 + $0xb0] sm:$0xff] }
0x1786   :  { %3844 = vmatprep.subr.bf16.mxu0 %v6283_v31  ;;  %3887 = vmatprep.subr.bf16.mxu1 %v6285_v47  ;;  %v2838_v31 = vld [vmem:[#allocation9 + $0xf0] sm:$0xff]  ;;  %v2831_v47 = vld [vmem:[#allocation9 + $0xb8] sm:$0xff] }
0x1787   :  { %v6287_v17 = vcombine.high %v2830_v37, %v2838_v31  ;;  %v6286_v48 = vcombine.low %v2830_v37, %v2838_v31  ;;  %v6288_v25 = vcombine.low %v2831_v47, %v2839_v1  ;;  %v4045_v37 = vld [vmem:[#allocation10 + $0x148] sm:$0xff] }
0x1789   :  { %3845 = vmatpush1.bf16.msra.mxu0 %v6282_v18  ;;  %3888 = vmatpush1.bf16.msra.mxu1 %v6284_v3  ;;  %v6289_v18 = vcombine.high %v2831_v47, %v2839_v1  ;;  %v2814_v3 = vld [vmem:[#allocation9 + $0x30] sm:$0xff] }
0x178a   :  { %3846 = vmatprep.subr.bf16.mxu0 %v6267_v21  ;;  %3889 = vmatprep.subr.bf16.mxu1 %v6269_v22  ;;  %v2822_v21 = vld [vmem:[#allocation9 + $0x70] sm:$0xff]  ;;  %v2815_v22 = vld [vmem:[#allocation9 + $0x38] sm:$0xff] }
0x178b   :  { %v6271_v27 = vcombine.high %v2814_v3, %v2822_v21  ;;  %v6270_v61 = vcombine.low %v2814_v3, %v2822_v21  ;;  %v6272_v9 = vcombine.low %v2815_v22, %v2823_v24  ;;  %v4029_v3 = vld [vmem:[#allocation10 + $0xc8] sm:$0xff] }
0x178d   :  { %3847 = vmatpush1.bf16.msra.mxu0 %v6266_v45  ;;  %3890 = vmatpush1.bf16.msra.mxu1 %v6268_v57  ;;  %v6273_v45 = vcombine.high %v2815_v22, %v2823_v24  ;;  %v4116_v57 = vld [vmem:[#allocation10 + $0x380] sm:$0xff] }
0x178e   :  { %3918 = vmatprep.subr.bf16.mxu0 %v6383_v2  ;;  %3961 = vmatprep.subr.bf16.mxu1 %v6385_v53  ;;  %v4124_v2 = vld [vmem:[#allocation10 + $0x3c0] sm:$0xff]  ;;  %v4117_v53 = vld [vmem:[#allocation10 + $0x388] sm:$0xff] }
0x178f   :  { %v6499_v49 = vcombine.high %v4116_v57, %v4124_v2  ;;  %v6498_v50 = vcombine.low %v4116_v57, %v4124_v2  ;;  %v6500_v4 = vcombine.low %v4117_v53, %v4125_v29  ;;  %v4013_v57 = vld [vmem:[#allocation10 + $0x48] sm:$0xff] }
0x1790   :  { %3865 = vmatmul.mubr.bf16.vlgmr.msra.gmra.mxu0 %v8596_v36  ;;  %3908 = vmatmul.mubr.bf16.vlgmr.msra.gmra.mxu1 %v8596_v36 }
0x1791   :  { %3919 = vmatpush1.bf16.msra.mxu0 %v6382_v63  ;;  %3962 = vmatpush1.bf16.msra.mxu1 %v6384_v60  ;;  %v6501_v63 = vcombine.high %v4117_v53, %v4125_v29  ;;  %v4100_v60 = vld [vmem:[#allocation10 + $0x300] sm:$0xff] }
0x1792   :  { %3920 = vmatprep.subr.bf16.mxu0 %v6367_v59  ;;  %3963 = vmatprep.subr.bf16.mxu1 %v6369_v10  ;;  %v4108_v59 = vld [vmem:[#allocation10 + $0x340] sm:$0xff]  ;;  %v4101_v10 = vld [vmem:[#allocation10 + $0x308] sm:$0xff] }
0x1793   :  { %3950 = vmatprep.mubr.bf16.mxu0 %v9020_v54  ;;  %3993 = vmatprep.mubr.bf16.mxu1 %v9020_v54  ;;  %v6483_v43 = vcombine.high %v4100_v60, %v4108_v59  ;;  %v6482_v15 = vcombine.low %v4100_v60, %v4108_v59  ;;  %v6484_v14 = vcombine.low %v4101_v10, %v4109_v0  ;;  %v4127_v60 = vld [vmem:[#allocation10 + $0x3d8] sm:$0xff] }
0x1795   :  { %3921 = vmatpush1.bf16.msra.mxu0 %v6366_v23  ;;  %3964 = vmatpush1.bf16.msra.mxu1 %v6368_v56  ;;  %v6485_v23 = vcombine.high %v4101_v10, %v4109_v0  ;;  %v4084_v56 = vld [vmem:[#allocation10 + $0x280] sm:$0xff] }
0x1796   :  { %3922 = vmatprep.subr.bf16.mxu0 %v6351_v35  ;;  %3965 = vmatprep.subr.bf16.mxu1 %v6353_v38  ;;  %v4092_v35 = vld [vmem:[#allocation10 + $0x2c0] sm:$0xff]  ;;  %v4085_v38 = vld [vmem:[#allocation10 + $0x288] sm:$0xff] }
0x1797   :  { %v6467_v16 = vcombine.high %v4084_v56, %v4092_v35  ;;  %v6466_v13 = vcombine.low %v4084_v56, %v4092_v35  ;;  %v6468_v46 = vcombine.low %v4085_v38, %v4093_v44  ;;  %v4111_v56 = vld [vmem:[#allocation10 + $0x358] sm:$0xff] }
0x1799   :  { %3923 = vmatpush1.bf16.msra.mxu0 %v6350_v28  ;;  %3966 = vmatpush1.bf16.msra.mxu1 %v6352_v39  ;;  %v6469_v28 = vcombine.high %v4085_v38, %v4093_v44  ;;  %v4068_v39 = vld [vmem:[#allocation10 + $0x200] sm:$0xff] }
0x179a   :  { %3924 = vmatprep.subr.bf16.mxu0 %v6335_v8  ;;  %3967 = vmatprep.subr.bf16.mxu1 %v6337_v11  ;;  %v4076_v8 = vld [vmem:[#allocation10 + $0x240] sm:$0xff]  ;;  %v4069_v11 = vld [vmem:[#allocation10 + $0x208] sm:$0xff] }
0x179b   :  { %v6451_v12 = vcombine.high %v4068_v39, %v4076_v8  ;;  %v6450_v33 = vcombine.low %v4068_v39, %v4076_v8  ;;  %v6452_v34 = vcombine.low %v4069_v11, %v4077_v51  ;;  %v4095_v39 = vld [vmem:[#allocation10 + $0x2d8] sm:$0xff] }
0x179d   :  { %3925 = vmatpush1.bf16.msra.mxu0 %v6334_v30  ;;  %3968 = vmatpush1.bf16.msra.mxu1 %v6336_v19  ;;  %v6453_v30 = vcombine.high %v4069_v11, %v4077_v51  ;;  %v4052_v19 = vld [vmem:[#allocation10 + $0x180] sm:$0xff] }
0x179e   :  { %3926 = vmatprep.subr.bf16.mxu0 %v6319_v32  ;;  %3969 = vmatprep.subr.bf16.mxu1 %v6321_v58  ;;  %v4060_v32 = vld [vmem:[#allocation10 + $0x1c0] sm:$0xff]  ;;  %v4053_v58 = vld [vmem:[#allocation10 + $0x188] sm:$0xff] }
0x179f   :  { %v6435_v40 = vcombine.high %v4052_v19, %v4060_v32  ;;  %v6434_v31 = vcombine.low %v4052_v19, %v4060_v32  ;;  %v6436_v47 = vcombine.low %v4053_v58, %v4061_v55  ;;  %v4079_v19 = vld [vmem:[#allocation10 + $0x258] sm:$0xff] }
0x17a1   :  { %3927 = vmatpush1.bf16.msra.mxu0 %v6318_v52  ;;  %3970 = vmatpush1.bf16.msra.mxu1 %v6320_v41  ;;  %v6437_v52 = vcombine.high %v4053_v58, %v4061_v55  ;;  %v4036_v41 = vld [vmem:[#allocation10 + $0x100] sm:$0xff] }
0x17a2   :  { %3928 = vmatprep.subr.bf16.mxu0 %v6303_v42  ;;  %3971 = vmatprep.subr.bf16.mxu1 %v6305_v5  ;;  %v4044_v42 = vld [vmem:[#allocation10 + $0x140] sm:$0xff]  ;;  %v4037_v5 = vld [vmem:[#allocation10 + $0x108] sm:$0xff] }
0x17a3   :  { %v6419_v1 = vcombine.high %v4036_v41, %v4044_v42  ;;  %v6418_v21 = vcombine.low %v4036_v41, %v4044_v42  ;;  %v6420_v22 = vcombine.low %v4037_v5, %v4045_v37  ;;  %v4063_v41 = vld [vmem:[#allocation10 + $0x1d8] sm:$0xff] }
0x17a5   :  { %3929 = vmatpush1.bf16.msra.mxu0 %v6302_v26  ;;  %3972 = vmatpush1.bf16.msra.mxu1 %v6304_v20  ;;  %v6421_v26 = vcombine.high %v4037_v5, %v4045_v37  ;;  %v4020_v20 = vld [vmem:[#allocation10 + $0x80] sm:$0xff] }
0x17a6   :  { %3930 = vmatprep.subr.bf16.mxu0 %v6287_v17  ;;  %3973 = vmatprep.subr.bf16.mxu1 %v6289_v18  ;;  %v4028_v17 = vld [vmem:[#allocation10 + $0xc0] sm:$0xff]  ;;  %v4021_v18 = vld [vmem:[#allocation10 + $0x88] sm:$0xff] }
0x17a7   :  { %v6403_v24 = vcombine.high %v4020_v20, %v4028_v17  ;;  %v6402_v2 = vcombine.low %v4020_v20, %v4028_v17  ;;  %v6404_v53 = vcombine.low %v4021_v18, %v4029_v3  ;;  %v4047_v20 = vld [vmem:[#allocation10 + $0x158] sm:$0xff] }
0x17a9   :  { %3931 = vmatpush1.bf16.msra.mxu0 %v6286_v48  ;;  %3974 = vmatpush1.bf16.msra.mxu1 %v6288_v25  ;;  %v6405_v48 = vcombine.high %v4021_v18, %v4029_v3  ;;  %v4004_v25 = vld [vmem:[#allocation10] sm:$0xff] }
0x17aa   :  { %3932 = vmatprep.subr.bf16.mxu0 %v6271_v27  ;;  %3975 = vmatprep.subr.bf16.mxu1 %v6273_v45  ;;  %v4012_v27 = vld [vmem:[#allocation10 + $0x40] sm:$0xff]  ;;  %v4005_v45 = vld [vmem:[#allocation10 + $0x8] sm:$0xff] }
0x17ab   :  { %v6387_v29 = vcombine.high %v4004_v25, %v4012_v27  ;;  %v6386_v59 = vcombine.low %v4004_v25, %v4012_v27  ;;  %v6388_v10 = vcombine.low %v4005_v45, %v4013_v57  ;;  %v4031_v25 = vld [vmem:[#allocation10 + $0xd8] sm:$0xff] }
0x17ad   :  { %3933 = vmatpush1.bf16.msra.mxu0 %v6270_v61  ;;  %3976 = vmatpush1.bf16.msra.mxu1 %v6272_v9  ;;  %v6389_v61 = vcombine.high %v4005_v45, %v4013_v57  ;;  %v4118_v9 = vld [vmem:[#allocation10 + $0x390] sm:$0xff] }
0x17ae   :  { %4856 = vmatprep.subr.bf16.mxu0 %v6499_v49  ;;  %4899 = vmatprep.subr.bf16.mxu1 %v6501_v63  ;;  %v4126_v49 = vld [vmem:[#allocation10 + $0x3d0] sm:$0xff]  ;;  %v4119_v63 = vld [vmem:[#allocation10 + $0x398] sm:$0xff] }
0x17af   :  { %v6503_v0 = vcombine.high %v4118_v9, %v4126_v49  ;;  %v6502_v35 = vcombine.low %v4118_v9, %v4126_v49  ;;  %v6504_v38 = vcombine.low %v4119_v63, %v4127_v60  ;;  %v4015_v9 = vld [vmem:[#allocation10 + $0x58] sm:$0xff] }
0x17b0   :  { %3951 = vmatmul.mubr.bf16.vlgmr.msra.gmra.mxu0 %v8596_v36  ;;  %3994 = vmatmul.mubr.bf16.vlgmr.msra.gmra.mxu1 %v8596_v36 }
0x17b1   :  { %4857 = vmatpush1.bf16.msra.mxu0 %v6498_v50  ;;  %4900 = vmatpush1.bf16.msra.mxu1 %v6500_v4  ;;  %v6505_v50 = vcombine.high %v4119_v63, %v4127_v60  ;;  %v4102_v4 = vld [vmem:[#allocation10 + $0x310] sm:$0xff] }
0x17b2   :  { %4858 = vmatprep.subr.bf16.mxu0 %v6483_v43  ;;  %4901 = vmatprep.subr.bf16.mxu1 %v6485_v23  ;;  %v4110_v43 = vld [vmem:[#allocation10 + $0x350] sm:$0xff]  ;;  %v4103_v23 = vld [vmem:[#allocation10 + $0x318] sm:$0xff] }
0x17b3   :  { %4888 = vmatprep.mubr.bf16.mxu0 %v9020_v54  ;;  %4931 = vmatprep.mubr.bf16.mxu1 %v9020_v54  ;;  %v6487_v44 = vcombine.high %v4102_v4, %v4110_v43  ;;  %v6486_v8 = vcombine.low %v4102_v4, %v4110_v43  ;;  %v6488_v11 = vcombine.low %v4103_v23, %v4111_v56  ;;  %v4129_v4 = vld [vmem:[#allocation10 + $0x3e8] sm:$0xff] }
0x17b5   :  { %4859 = vmatpush1.bf16.msra.mxu0 %v6482_v15  ;;  %4902 = vmatpush1.bf16.msra.mxu1 %v6484_v14  ;;  %v6489_v15 = vcombine.high %v4103_v23, %v4111_v56  ;;  %v4086_v14 = vld [vmem:[#allocation10 + $0x290] sm:$0xff] }
0x17b6   :  { %4860 = vmatprep.subr.bf16.mxu0 %v6467_v16  ;;  %4903 = vmatprep.subr.bf16.mxu1 %v6469_v28  ;;  %v4094_v16 = vld [vmem:[#allocation10 + $0x2d0] sm:$0xff]  ;;  %v4087_v28 = vld [vmem:[#allocation10 + $0x298] sm:$0xff] }
0x17b7   :  { %v6471_v51 = vcombine.high %v4086_v14, %v4094_v16  ;;  %v6470_v32 = vcombine.low %v4086_v14, %v4094_v16  ;;  %v6472_v58 = vcombine.low %v4087_v28, %v4095_v39  ;;  %v4113_v14 = vld [vmem:[#allocation10 + $0x368] sm:$0xff] }
0x17b9   :  { %4861 = vmatpush1.bf16.msra.mxu0 %v6466_v13  ;;  %4904 = vmatpush1.bf16.msra.mxu1 %v6468_v46  ;;  %v6473_v13 = vcombine.high %v4087_v28, %v4095_v39  ;;  %v4070_v46 = vld [vmem:[#allocation10 + $0x210] sm:$0xff] }
0x17ba   :  { %4862 = vmatprep.subr.bf16.mxu0 %v6451_v12  ;;  %4905 = vmatprep.subr.bf16.mxu1 %v6453_v30  ;;  %v4078_v12 = vld [vmem:[#allocation10 + $0x250] sm:$0xff]  ;;  %v4071_v30 = vld [vmem:[#allocation10 + $0x218] sm:$0xff] }
0x17bb   :  { %v6455_v55 = vcombine.high %v4070_v46, %v4078_v12  ;;  %v6454_v42 = vcombine.low %v4070_v46, %v4078_v12  ;;  %v6456_v5 = vcombine.low %v4071_v30, %v4079_v19  ;;  %v4097_v46 = vld [vmem:[#allocation10 + $0x2e8] sm:$0xff] }
0x17bd   :  { %4863 = vmatpush1.bf16.msra.mxu0 %v6450_v33  ;;  %4906 = vmatpush1.bf16.msra.mxu1 %v6452_v34  ;;  %v6457_v33 = vcombine.high %v4071_v30, %v4079_v19  ;;  %v4054_v34 = vld [vmem:[#allocation10 + $0x190] sm:$0xff] }
0x17be   :  { %4864 = vmatprep.subr.bf16.mxu0 %v6435_v40  ;;  %4907 = vmatprep.subr.bf16.mxu1 %v6437_v52  ;;  %v4062_v40 = vld [vmem:[#allocation10 + $0x1d0] sm:$0xff]  ;;  %v4055_v52 = vld [vmem:[#allocation10 + $0x198] sm:$0xff] }
0x17bf   :  { %v6439_v37 = vcombine.high %v4054_v34, %v4062_v40  ;;  %v6438_v17 = vcombine.low %v4054_v34, %v4062_v40  ;;  %v6440_v18 = vcombine.low %v4055_v52, %v4063_v41  ;;  %v4081_v34 = vld [vmem:[#allocation10 + $0x268] sm:$0xff] }
0x17c1   :  { %4865 = vmatpush1.bf16.msra.mxu0 %v6434_v31  ;;  %4908 = vmatpush1.bf16.msra.mxu1 %v6436_v47  ;;  %v6441_v31 = vcombine.high %v4055_v52, %v4063_v41  ;;  %v4038_v47 = vld [vmem:[#allocation10 + $0x110] sm:$0xff] }
0x17c2   :  { %4866 = vmatprep.subr.bf16.mxu0 %v6419_v1  ;;  %4909 = vmatprep.subr.bf16.mxu1 %v6421_v26  ;;  %v4046_v1 = vld [vmem:[#allocation10 + $0x150] sm:$0xff]  ;;  %v4039_v26 = vld [vmem:[#allocation10 + $0x118] sm:$0xff] }
0x17c3   :  { %v6423_v3 = vcombine.high %v4038_v47, %v4046_v1  ;;  %v6422_v27 = vcombine.low %v4038_v47, %v4046_v1  ;;  %v6424_v45 = vcombine.low %v4039_v26, %v4047_v20  ;;  %v4065_v47 = vld [vmem:[#allocation10 + $0x1e8] sm:$0xff] }
0x17c5   :  { %4867 = vmatpush1.bf16.msra.mxu0 %v6418_v21  ;;  %4910 = vmatpush1.bf16.msra.mxu1 %v6420_v22  ;;  %v6425_v21 = vcombine.high %v4039_v26, %v4047_v20  ;;  %v4022_v22 = vld [vmem:[#allocation10 + $0x90] sm:$0xff] }
0x17c6   :  { %4868 = vmatprep.subr.bf16.mxu0 %v6403_v24  ;;  %4911 = vmatprep.subr.bf16.mxu1 %v6405_v48  ;;  %v4030_v24 = vld [vmem:[#allocation10 + $0xd0] sm:$0xff]  ;;  %v4023_v48 = vld [vmem:[#allocation10 + $0x98] sm:$0xff] }
0x17c7   :  { %v6407_v57 = vcombine.high %v4022_v22, %v4030_v24  ;;  %v6406_v49 = vcombine.low %v4022_v22, %v4030_v24  ;;  %v6408_v63 = vcombine.low %v4023_v48, %v4031_v25  ;;  %v4049_v22 = vld [vmem:[#allocation10 + $0x168] sm:$0xff] }
0x17c9   :  { %4869 = vmatpush1.bf16.msra.mxu0 %v6402_v2  ;;  %4912 = vmatpush1.bf16.msra.mxu1 %v6404_v53  ;;  %v6409_v2 = vcombine.high %v4023_v48, %v4031_v25  ;;  %v4006_v53 = vld [vmem:[#allocation10 + $0x10] sm:$0xff] }
0x17ca   :  { %4870 = vmatprep.subr.bf16.mxu0 %v6387_v29  ;;  %4913 = vmatprep.subr.bf16.mxu1 %v6389_v61  ;;  %v4014_v29 = vld [vmem:[#allocation10 + $0x50] sm:$0xff]  ;;  %v4007_v61 = vld [vmem:[#allocation10 + $0x18] sm:$0xff] }
0x17cb   :  { %v6391_v60 = vcombine.high %v4006_v53, %v4014_v29  ;;  %v6390_v43 = vcombine.low %v4006_v53, %v4014_v29  ;;  %v6392_v23 = vcombine.low %v4007_v61, %v4015_v9  ;;  %v4033_v53 = vld [vmem:[#allocation10 + $0xe8] sm:$0xff] }
0x17cd   :  { %4871 = vmatpush1.bf16.msra.mxu0 %v6386_v59  ;;  %4914 = vmatpush1.bf16.msra.mxu1 %v6388_v10  ;;  %v6393_v59 = vcombine.high %v4007_v61, %v4015_v9  ;;  %v4120_v10 = vld [vmem:[#allocation10 + $0x3a0] sm:$0xff] }
0x17ce   :  { %4942 = vmatprep.subr.bf16.mxu0 %v6503_v0  ;;  %4985 = vmatprep.subr.bf16.mxu1 %v6505_v50  ;;  %v4128_v0 = vld [vmem:[#allocation10 + $0x3e0] sm:$0xff]  ;;  %v4121_v50 = vld [vmem:[#allocation10 + $0x3a8] sm:$0xff] }
0x17cf   :  { %v6507_v56 = vcombine.high %v4120_v10, %v4128_v0  ;;  %v6506_v16 = vcombine.low %v4120_v10, %v4128_v0  ;;  %v6508_v28 = vcombine.low %v4121_v50, %v4129_v4  ;;  %v4017_v10 = vld [vmem:[#allocation10 + $0x68] sm:$0xff] }
0x17d0   :  { %4889 = vmatmul.mubr.bf16.vlgmr.msra.gmra.mxu0 %v8596_v36  ;;  %4932 = vmatmul.mubr.bf16.vlgmr.msra.gmra.mxu1 %v8596_v36 }
0x17d1   :  { %4943 = vmatpush1.bf16.msra.mxu0 %v6502_v35  ;;  %4986 = vmatpush1.bf16.msra.mxu1 %v6504_v38  ;;  %v6509_v35 = vcombine.high %v4121_v50, %v4129_v4  ;;  %v4104_v38 = vld [vmem:[#allocation10 + $0x320] sm:$0xff] }
0x17d2   :  { %4944 = vmatprep.subr.bf16.mxu0 %v6487_v44  ;;  %4987 = vmatprep.subr.bf16.mxu1 %v6489_v15  ;;  %v4112_v44 = vld [vmem:[#allocation10 + $0x360] sm:$0xff]  ;;  %v4105_v15 = vld [vmem:[#allocation10 + $0x328] sm:$0xff] }
0x17d3   :  { %4974 = vmatprep.mubr.bf16.mxu0 %v9020_v54  ;;  %5017 = vmatprep.mubr.bf16.mxu1 %v9020_v54  ;;  %v6491_v39 = vcombine.high %v4104_v38, %v4112_v44  ;;  %v6490_v12 = vcombine.low %v4104_v38, %v4112_v44  ;;  %v6492_v30 = vcombine.low %v4105_v15, %v4113_v14  ;;  %v4131_v38 = vld [vmem:[#allocation10 + $0x3f8] sm:$0xff] }
0x17d5   :  { %4945 = vmatpush1.bf16.msra.mxu0 %v6486_v8  ;;  %4988 = vmatpush1.bf16.msra.mxu1 %v6488_v11  ;;  %v6493_v8 = vcombine.high %v4105_v15, %v4113_v14  ;;  %v4088_v11 = vld [vmem:[#allocation10 + $0x2a0] sm:$0xff] }
0x17d6   :  { %4946 = vmatprep.subr.bf16.mxu0 %v6471_v51  ;;  %4989 = vmatprep.subr.bf16.mxu1 %v6473_v13  ;;  %v4096_v51 = vld [vmem:[#allocation10 + $0x2e0] sm:$0xff]  ;;  %v4089_v13 = vld [vmem:[#allocation10 + $0x2a8] sm:$0xff] }
0x17d7   :  { %v6475_v19 = vcombine.high %v4088_v11, %v4096_v51  ;;  %v6474_v40 = vcombine.low %v4088_v11, %v4096_v51  ;;  %v6476_v52 = vcombine.low %v4089_v13, %v4097_v46  ;;  %v4115_v11 = vld [vmem:[#allocation10 + $0x378] sm:$0xff] }
0x17d9   :  { %4947 = vmatpush1.bf16.msra.mxu0 %v6470_v32  ;;  %4990 = vmatpush1.bf16.msra.mxu1 %v6472_v58  ;;  %v6477_v32 = vcombine.high %v4089_v13, %v4097_v46  ;;  %v4072_v58 = vld [vmem:[#allocation10 + $0x220] sm:$0xff] }
0x17da   :  { %4948 = vmatprep.subr.bf16.mxu0 %v6455_v55  ;;  %4991 = vmatprep.subr.bf16.mxu1 %v6457_v33  ;;  %v4080_v55 = vld [vmem:[#allocation10 + $0x260] sm:$0xff]  ;;  %v4073_v33 = vld [vmem:[#allocation10 + $0x228] sm:$0xff] }
0x17db   :  { %v6459_v41 = vcombine.high %v4072_v58, %v4080_v55  ;;  %v6458_v1 = vcombine.low %v4072_v58, %v4080_v55  ;;  %v6460_v26 = vcombine.low %v4073_v33, %v4081_v34  ;;  %v4099_v58 = vld [vmem:[#allocation10 + $0x2f8] sm:$0xff] }
0x17dd   :  { %4949 = vmatpush1.bf16.msra.mxu0 %v6454_v42  ;;  %4992 = vmatpush1.bf16.msra.mxu1 %v6456_v5  ;;  %v6461_v42 = vcombine.high %v4073_v33, %v4081_v34  ;;  %v4056_v5 = vld [vmem:[#allocation10 + $0x1a0] sm:$0xff] }
0x17de   :  { %4950 = vmatprep.subr.bf16.mxu0 %v6439_v37  ;;  %4993 = vmatprep.subr.bf16.mxu1 %v6441_v31  ;;  %v4064_v37 = vld [vmem:[#allocation10 + $0x1e0] sm:$0xff]  ;;  %v4057_v31 = vld [vmem:[#allocation10 + $0x1a8] sm:$0xff] }
0x17df   :  { %v6443_v20 = vcombine.high %v4056_v5, %v4064_v37  ;;  %v6442_v24 = vcombine.low %v4056_v5, %v4064_v37  ;;  %v6444_v48 = vcombine.low %v4057_v31, %v4065_v47  ;;  %v4083_v5 = vld [vmem:[#allocation10 + $0x278] sm:$0xff] }
0x17e1   :  { %4951 = vmatpush1.bf16.msra.mxu0 %v6438_v17  ;;  %4994 = vmatpush1.bf16.msra.mxu1 %v6440_v18  ;;  %v6445_v17 = vcombine.high %v4057_v31, %v4065_v47  ;;  %v4040_v18 = vld [vmem:[#allocation10 + $0x120] sm:$0xff] }
0x17e2   :  { %4952 = vmatprep.subr.bf16.mxu0 %v6423_v3  ;;  %4995 = vmatprep.subr.bf16.mxu1 %v6425_v21  ;;  %v4048_v3 = vld [vmem:[#allocation10 + $0x160] sm:$0xff]  ;;  %v4041_v21 = vld [vmem:[#allocation10 + $0x128] sm:$0xff] }
0x17e3   :  { %v6427_v25 = vcombine.high %v4040_v18, %v4048_v3  ;;  %v6426_v29 = vcombine.low %v4040_v18, %v4048_v3  ;;  %v6428_v61 = vcombine.low %v4041_v21, %v4049_v22  ;;  %v4067_v18 = vld [vmem:[#allocation10 + $0x1f8] sm:$0xff] }
0x17e5   :  { %4953 = vmatpush1.bf16.msra.mxu0 %v6422_v27  ;;  %4996 = vmatpush1.bf16.msra.mxu1 %v6424_v45  ;;  %v6429_v27 = vcombine.high %v4041_v21, %v4049_v22  ;;  %v4024_v45 = vld [vmem:[#allocation10 + $0xa0] sm:$0xff] }
0x17e6   :  { %4954 = vmatprep.subr.bf16.mxu0 %v6407_v57  ;;  %4997 = vmatprep.subr.bf16.mxu1 %v6409_v2  ;;  %v4032_v57 = vld [vmem:[#allocation10 + $0xe0] sm:$0xff]  ;;  %v4025_v2 = vld [vmem:[#allocation10 + $0xa8] sm:$0xff] }
0x17e7   :  { %v6411_v9 = vcombine.high %v4024_v45, %v4032_v57  ;;  %v6410_v0 = vcombine.low %v4024_v45, %v4032_v57  ;;  %v6412_v50 = vcombine.low %v4025_v2, %v4033_v53  ;;  %v4051_v45 = vld [vmem:[#allocation10 + $0x178] sm:$0xff] }
0x17e9   :  { %4955 = vmatpush1.bf16.msra.mxu0 %v6406_v49  ;;  %4998 = vmatpush1.bf16.msra.mxu1 %v6408_v63  ;;  %v6413_v49 = vcombine.high %v4025_v2, %v4033_v53  ;;  %v4008_v63 = vld [vmem:[#allocation10 + $0x20] sm:$0xff] }
0x17ea   :  { %4956 = vmatprep.subr.bf16.mxu0 %v6391_v60  ;;  %4999 = vmatprep.subr.bf16.mxu1 %v6393_v59  ;;  %v4016_v60 = vld [vmem:[#allocation10 + $0x60] sm:$0xff]  ;;  %v4009_v59 = vld [vmem:[#allocation10 + $0x28] sm:$0xff] }
0x17eb   :  { %v6395_v4 = vcombine.high %v4008_v63, %v4016_v60  ;;  %v6394_v44 = vcombine.low %v4008_v63, %v4016_v60  ;;  %v6396_v15 = vcombine.low %v4009_v59, %v4017_v10  ;;  %v4035_v63 = vld [vmem:[#allocation10 + $0xf8] sm:$0xff] }
0x17ed   :  { %4957 = vmatpush1.bf16.msra.mxu0 %v6390_v43  ;;  %5000 = vmatpush1.bf16.msra.mxu1 %v6392_v23  ;;  %v6397_v43 = vcombine.high %v4009_v59, %v4017_v10  ;;  %v4122_v23 = vld [vmem:[#allocation10 + $0x3b0] sm:$0xff] }
0x17ee   :  { %5028 = vmatprep.subr.bf16.mxu0 %v6507_v56  ;;  %5071 = vmatprep.subr.bf16.mxu1 %v6509_v35  ;;  %v4130_v56 = vld [vmem:[#allocation10 + $0x3f0] sm:$0xff]  ;;  %v4123_v35 = vld [vmem:[#allocation10 + $0x3b8] sm:$0xff] }
0x17ef   :  { %v6511_v14 = vcombine.high %v4122_v23, %v4130_v56  ;;  %v6510_v51 = vcombine.low %v4122_v23, %v4130_v56  ;;  %v6512_v13 = vcombine.low %v4123_v35, %v4131_v38  ;;  %v4019_v23 = vld [vmem:[#allocation10 + $0x78] sm:$0xff] }
0x17f0   :  { %4975 = vmatmul.mubr.bf16.vlgmr.msra.gmra.mxu0 %v8596_v36  ;;  %5018 = vmatmul.mubr.bf16.vlgmr.msra.gmra.mxu1 %v8596_v36 }
0x17f1   :  { %5029 = vmatpush1.bf16.msra.mxu0 %v6506_v16  ;;  %5072 = vmatpush1.bf16.msra.mxu1 %v6508_v28  ;;  %v6513_v16 = vcombine.high %v4123_v35, %v4131_v38  ;;  %v4106_v28 = vld [vmem:[#allocation10 + $0x330] sm:$0xff] }
0x17f2   :  { %5030 = vmatprep.subr.bf16.mxu0 %v6491_v39  ;;  %5073 = vmatprep.subr.bf16.mxu1 %v6493_v8  ;;  %v4114_v39 = vld [vmem:[#allocation10 + $0x370] sm:$0xff]  ;;  %v4107_v8 = vld [vmem:[#allocation10 + $0x338] sm:$0xff] }
0x17f3   :  { %5060 = vmatprep.mubr.bf16.mxu0 %v9020_v54  ;;  %5103 = vmatprep.mubr.bf16.mxu1 %v9020_v54  ;;  %v6495_v46 = vcombine.high %v4106_v28, %v4114_v39  ;;  %v6494_v55 = vcombine.low %v4106_v28, %v4114_v39  ;;  %v6496_v33 = vcombine.low %v4107_v8, %v4115_v11  ;;  %v7253_v28 = vld [vmem:[#allocation13 + $0xa8] ss:$12 sps:$4 sm:$0xff]   ;;  %v7256_v39 = vld [vmem:[#allocation13 + $0xb0] ss:$12 sps:$4 sm:$0xff]  }
0x17f5   :  { %5031 = vmatpush1.bf16.msra.mxu0 %v6490_v12  ;;  %5074 = vmatpush1.bf16.msra.mxu1 %v6492_v30  ;;  %v6497_v12 = vcombine.high %v4107_v8, %v4115_v11  ;;  %v4090_v30 = vld [vmem:[#allocation10 + $0x2b0] sm:$0xff] }
0x17f6   :  { %5032 = vmatprep.subr.bf16.mxu0 %v6475_v19  ;;  %5075 = vmatprep.subr.bf16.mxu1 %v6477_v32  ;;  %v4098_v19 = vld [vmem:[#allocation10 + $0x2f0] sm:$0xff]  ;;  %v4091_v32 = vld [vmem:[#allocation10 + $0x2b8] sm:$0xff] }
0x17f7   :  { %v6479_v34 = vcombine.high %v4090_v30, %v4098_v19  ;;  %v6478_v37 = vcombine.low %v4090_v30, %v4098_v19  ;;  %v6480_v31 = vcombine.low %v4091_v32, %v4099_v58  ;;  %v7259_v8 = vld [vmem:[#allocation13 + $0x94] ss:$12 sps:$4 sm:$0xff]   ;;  %v7257_v11 = vld [vmem:[#allocation13 + $0x90] ss:$12 sps:$4 sm:$0xff]  }
0x17f8   :  { %v7267_v30 = vld [vmem:[#allocation13 + $0x64] ss:$12 sps:$4 sm:$0xff]   ;;  %v7265_v19 = vld [vmem:[#allocation13 + $0x60] ss:$12 sps:$4 sm:$0xff]  }
0x17f9   :  { %5033 = vmatpush1.bf16.msra.mxu0 %v6474_v40  ;;  %5076 = vmatpush1.bf16.msra.mxu1 %v6476_v52  ;;  %v6481_v40 = vcombine.high %v4091_v32, %v4099_v58  ;;  %v4074_v52 = vld [vmem:[#allocation10 + $0x230] sm:$0xff]  ;;  %v7271_v58 = vld [vmem:[#allocation13 + $0x4c] ss:$12 sps:$4 sm:$0xff]  }
0x17fa   :  { %5034 = vmatprep.subr.bf16.mxu0 %v6459_v41  ;;  %5077 = vmatprep.subr.bf16.mxu1 %v6461_v42  ;;  %v4082_v41 = vld [vmem:[#allocation10 + $0x270] sm:$0xff]  ;;  %v4075_v42 = vld [vmem:[#allocation10 + $0x238] sm:$0xff] }
0x17fb   :  { %v6463_v47 = vcombine.high %v4074_v52, %v4082_v41  ;;  %v6462_v3 = vcombine.low %v4074_v52, %v4082_v41  ;;  %v6464_v21 = vcombine.low %v4075_v42, %v4083_v5  ;;  %v7268_v32 = vld [vmem:[#allocation13 + $0x68] ss:$12 sps:$4 sm:$0xff]   ;;  %v7276_v52 = vld [vmem:[#allocation13 + $0x38] ss:$12 sps:$4 sm:$0xff]  }
0x17fc   :  { %v7279_v41 = vld [vmem:[#allocation13 + $0x1c] ss:$12 sps:$4 sm:$0xff]  }
0x17fd   :  { %5035 = vmatpush1.bf16.msra.mxu0 %v6458_v1  ;;  %5078 = vmatpush1.bf16.msra.mxu1 %v6460_v26  ;;  %v6465_v1 = vcombine.high %v4075_v42, %v4083_v5  ;;  %v4058_v26 = vld [vmem:[#allocation10 + $0x1b0] sm:$0xff]  ;;  %v7277_v42 = vld [vmem:[#allocation13 + $0x18] ss:$12 sps:$4 sm:$0xff]   ;;  %v7280_v5 = vld [vmem:[#allocation13 + $0x20] ss:$12 sps:$4 sm:$0xff]  }
0x17fe   :  { %5036 = vmatprep.subr.bf16.mxu0 %v6443_v20  ;;  %5079 = vmatprep.subr.bf16.mxu1 %v6445_v17  ;;  %v4066_v20 = vld [vmem:[#allocation10 + $0x1f0] sm:$0xff]  ;;  %v4059_v17 = vld [vmem:[#allocation10 + $0x1b8] sm:$0xff] }
0x17ff   :  { %v6447_v22 = vcombine.high %v4058_v26, %v4066_v20  ;;  %v6446_v57 = vcombine.low %v4058_v26, %v4066_v20  ;;  %v6448_v2 = vcombine.low %v4059_v17, %v4067_v18  ;;  %v7287_v26 = vld [vmem:[#allocation12 + $0xac] ss:$12 sps:$4 sm:$0xff]   ;;  %v7288_v20 = vld [vmem:[#allocation12 + $0xb0] ss:$12 sps:$4 sm:$0xff]  }
0x1801   :  { %5037 = vmatpush1.bf16.msra.mxu0 %v6442_v24  ;;  %5080 = vmatpush1.bf16.msra.mxu1 %v6444_v48  ;;  %v6449_v24 = vcombine.high %v4059_v17, %v4067_v18  ;;  %v4042_v48 = vld [vmem:[#allocation10 + $0x130] sm:$0xff]  ;;  %v7292_v18 = vld [vmem:[#allocation12 + $0x98] ss:$12 sps:$4 sm:$0xff]  }
0x1802   :  { %5038 = vmatprep.subr.bf16.mxu0 %v6427_v25  ;;  %5081 = vmatprep.subr.bf16.mxu1 %v6429_v27  ;;  %v4050_v25 = vld [vmem:[#allocation10 + $0x170] sm:$0xff]  ;;  %v4043_v27 = vld [vmem:[#allocation10 + $0x138] sm:$0xff] }
0x1803   :  { %v6431_v53 = vcombine.high %v4042_v48, %v4050_v25  ;;  %v6430_v60 = vcombine.low %v4042_v48, %v4050_v25  ;;  %v6432_v59 = vcombine.low %v4043_v27, %v4051_v45  ;;  %v7291_v17 = vld [vmem:[#allocation12 + $0x94] ss:$12 sps:$4 sm:$0xff]   ;;  %v7303_v25 = vld [vmem:[#allocation12 + $0x4c] ss:$12 sps:$4 sm:$0xff]  }
0x1804   :  { %v7300_v48 = vld [vmem:[#allocation12 + $0x68] ss:$12 sps:$4 sm:$0xff]  }
0x1805   :  { %5039 = vmatpush1.bf16.msra.mxu0 %v6426_v29  ;;  %5082 = vmatpush1.bf16.msra.mxu1 %v6428_v61  ;;  %v6433_v29 = vcombine.high %v4043_v27, %v4051_v45  ;;  %v4026_v61 = vld [vmem:[#allocation10 + $0xb0] sm:$0xff] }
0x1806   :  { %5040 = vmatprep.subr.bf16.mxu0 %v6411_v9  ;;  %5083 = vmatprep.subr.bf16.mxu1 %v6413_v49  ;;  %v4034_v9 = vld [vmem:[#allocation10 + $0xf0] sm:$0xff]  ;;  %v4027_v49 = vld [vmem:[#allocation10 + $0xb8] sm:$0xff] }
0x1807   :  { %v6415_v10 = vcombine.high %v4026_v61, %v4034_v9  ;;  %v6414_v56 = vcombine.low %v4026_v61, %v4034_v9  ;;  %v6416_v35 = vcombine.low %v4027_v49, %v4035_v63  ;;  %v7301_v27 = vld [vmem:[#allocation12 + $0x48] ss:$12 sps:$4 sm:$0xff]   ;;  %v7304_v45 = vld [vmem:[#allocation12 + $0x50] ss:$12 sps:$4 sm:$0xff]   ;;  %v7309_v61 = vld [vmem:[#allocation12 + $0x18] ss:$12 sps:$4 sm:$0xff]  }
0x1808   :  { %v7312_v9 = vld [vmem:[#allocation12 + $0x20] ss:$12 sps:$4 sm:$0xff]  }
0x1809   :  { %5041 = vmatpush1.bf16.msra.mxu0 %v6410_v0  ;;  %5084 = vmatpush1.bf16.msra.mxu1 %v6412_v50  ;;  %v6417_v0 = vcombine.high %v4027_v49, %v4035_v63  ;;  %v4010_v50 = vld [vmem:[#allocation10 + $0x30] sm:$0xff]  ;;  %v7313_v63 = vld [vmem:[#allocation12] ss:$12 sps:$4 sm:$0xff]  }
0x180a   :  { %5042 = vmatprep.subr.bf16.mxu0 %v6395_v4  ;;  %5085 = vmatprep.subr.bf16.mxu1 %v6397_v43  ;;  %v4018_v4 = vld [vmem:[#allocation10 + $0x70] sm:$0xff]  ;;  %v4011_v43 = vld [vmem:[#allocation10 + $0x38] sm:$0xff] }
0x180b   :  { %v6399_v38 = vcombine.high %v4010_v50, %v4018_v4  ;;  %v7315_v49 = vld [vmem:[#allocation12 + $0x4] ss:$12 sps:$4 sm:$0xff]  }
0x180d   :  { %5043 = vmatpush1.bf16.msra.mxu0 %v6394_v44  ;;  %5086 = vmatpush1.bf16.msra.mxu1 %v6396_v15  ;;  %v6401_v44 = vcombine.high %v4011_v43, %v4019_v23  ;;  %v6398_v15 = vcombine.low %v4010_v50, %v4018_v4 }
0x180e   :  { %5114 = vmatprep.subr.bf16.mxu0 %v6511_v14  ;;  %5157 = vmatprep.subr.bf16.mxu1 %v6513_v16  ;;  %v6400_v14 = vcombine.low %v4011_v43, %v4019_v23  ;;  %v7255_v16 = vld [vmem:[#allocation13 + $0xac] ss:$12 sps:$4 sm:$0xff]  }
0x1810   :  { %5061 = vmatmul.mubr.bf16.vlgmr.msra.gmra.mxu0 %v8596_v36  ;;  %5104 = vmatmul.mubr.bf16.vlgmr.msra.gmra.mxu1 %v8596_v36  ;;  %v3737_v50 = vpop.f32.mrf.mxu1 }
0x1811   :  { %5115 = vmatpush1.bf16.msra.mxu0 %v6510_v51  ;;  %5158 = vmatpush1.bf16.msra.mxu1 %v6512_v13  ;;  %v7260_v51 = vld [vmem:[#allocation13 + $0x98] ss:$12 sps:$4 sm:$0xff]   ;;  %v7263_v13 = vld [vmem:[#allocation13 + $0x7c] ss:$12 sps:$4 sm:$0xff]  }
0x1812   :  { %5116 = vmatprep.subr.bf16.mxu0 %v6495_v46  ;;  %5159 = vmatprep.subr.bf16.mxu1 %v6497_v12  ;;  %v7261_v46 = vld [vmem:[#allocation13 + $0x78] ss:$12 sps:$4 sm:$0xff]   ;;  %v7264_v12 = vld [vmem:[#allocation13 + $0x80] ss:$12 sps:$4 sm:$0xff]   ;;  %v8654_v43 = vpop.f32.mrf.mxu1 }
0x1813   :  { %5146 = vmatprep.mubr.bf16.mxu0 %v9020_v54  ;;  %5189 = vmatprep.mubr.bf16.mxu1 %v9020_v54 }
0x1815   :  { %5117 = vmatpush1.bf16.msra.mxu0 %v6494_v55  ;;  %5160 = vmatpush1.bf16.msra.mxu1 %v6496_v33  ;;  %v7269_v55 = vld [vmem:[#allocation13 + $0x48] ss:$12 sps:$4 sm:$0xff]   ;;  %v7272_v33 = vld [vmem:[#allocation13 + $0x50] ss:$12 sps:$4 sm:$0xff]  }
0x1816   :  { %5118 = vmatprep.subr.bf16.mxu0 %v6479_v34  ;;  %5161 = vmatprep.subr.bf16.mxu1 %v6481_v40  ;;  %v7275_v34 = vld [vmem:[#allocation13 + $0x34] ss:$12 sps:$4 sm:$0xff]   ;;  %v7273_v40 = vld [vmem:[#allocation13 + $0x30] ss:$12 sps:$4 sm:$0xff]  }
0x1819   :  { %5119 = vmatpush1.bf16.msra.mxu0 %v6478_v37  ;;  %5162 = vmatpush1.bf16.msra.mxu1 %v6480_v31  ;;  %v7283_v37 = vld [vmem:[#allocation13 + $0x4] ss:$12 sps:$4 sm:$0xff]   ;;  %v7281_v31 = vld [vmem:[#allocation13] ss:$12 sps:$4 sm:$0xff]  }
0x181a   :  { %5120 = vmatprep.subr.bf16.mxu0 %v6463_v47  ;;  %5163 = vmatprep.subr.bf16.mxu1 %v6465_v1  ;;  %v7284_v47 = vld [vmem:[#allocation13 + $0x8] ss:$12 sps:$4 sm:$0xff]  }
0x181b   :  { %v7285_v1 = vld [vmem:[#allocation12 + $0xa8] ss:$12 sps:$4 sm:$0xff]  }
0x181d   :  { %5121 = vmatpush1.bf16.msra.mxu0 %v6462_v3  ;;  %5164 = vmatpush1.bf16.msra.mxu1 %v6464_v21  ;;  %v7289_v3 = vld [vmem:[#allocation12 + $0x90] ss:$12 sps:$4 sm:$0xff]  }
0x181e   :  { %5122 = vmatprep.subr.bf16.mxu0 %v6447_v22  ;;  %5165 = vmatprep.subr.bf16.mxu1 %v6449_v24  ;;  %v7295_v21 = vld [vmem:[#allocation12 + $0x7c] ss:$12 sps:$4 sm:$0xff]   ;;  %v7299_v22 = vld [vmem:[#allocation12 + $0x64] ss:$12 sps:$4 sm:$0xff]   ;;  %v7297_v24 = vld [vmem:[#allocation12 + $0x60] ss:$12 sps:$4 sm:$0xff]  }
0x1821   :  { %5123 = vmatpush1.bf16.msra.mxu0 %v6446_v57  ;;  %5166 = vmatpush1.bf16.msra.mxu1 %v6448_v2  ;;  %v7307_v57 = vld [vmem:[#allocation12 + $0x34] ss:$12 sps:$4 sm:$0xff]   ;;  %v7305_v2 = vld [vmem:[#allocation12 + $0x30] ss:$12 sps:$4 sm:$0xff]  }
0x1822   :  { %5124 = vmatprep.subr.bf16.mxu0 %v6431_v53  ;;  %5167 = vmatprep.subr.bf16.mxu1 %v6433_v29  ;;  %v7308_v53 = vld [vmem:[#allocation12 + $0x38] ss:$12 sps:$4 sm:$0xff]   ;;  %v7311_v29 = vld [vmem:[#allocation12 + $0x1c] ss:$12 sps:$4 sm:$0xff]  }
0x1825   :  { %5125 = vmatpush1.bf16.msra.mxu0 %v6430_v60  ;;  %5168 = vmatpush1.bf16.msra.mxu1 %v6432_v59  ;;  %v7316_v60 = vld [vmem:[#allocation12 + $0x8] ss:$12 sps:$4 sm:$0xff]   ;;  %v3694_v59 = vpop.f32.mrf.mxu0 }
0x1826   :  { %5126 = vmatprep.subr.bf16.mxu0 %v6415_v10  ;;  %5169 = vmatprep.subr.bf16.mxu1 %v6417_v0 }
0x1827   :  { %v3696_v10 = vpop.f32.mrf.mxu0 }
0x1829   :  { %5127 = vmatpush1.bf16.msra.mxu0 %v6414_v56  ;;  %5170 = vmatpush1.bf16.msra.mxu1 %v6416_v35  ;;  %v3698_v0 = vpop.f32.mrf.mxu0  ;;  %v8658_v56 = vpop.f32.mrf.mxu1 }
0x182a   :  { %5128 = vmatprep.subr.bf16.mxu0 %v6399_v38  ;;  %5171 = vmatprep.subr.bf16.mxu1 %v6401_v44 }
0x182b   :  { %v3700_v4 = vpop.f32.mrf.mxu0  ;;  %v8662_v38 = vpop.f32.mrf.mxu1 }
0x182d   :  { %5129 = vmatpush1.bf16.msra.mxu0 %v6398_v15  ;;  %5172 = vmatpush1.bf16.msra.mxu1 %v6400_v14 }
0x182e   :  { %5455 = vmatprep.subr.bf16.mxu0 %v7255_v16  ;;  %6975 = vmatprep.subr.bf16.mxu1 %v9015_v6 }
0x1830   :  { %5147 = vmatmul.mubr.bf16.vlgmr.msra.gmra.mxu0 %v8596_v36  ;;  %5190 = vmatmul.mubr.bf16.vlgmr.msra.gmra.mxu1 %v8596_v36  ;;  %v8656_v23 = vpop.f32.mrf.mxu0  ;;  %v8666_v15 = vpop.f32.mrf.mxu1 }
0x1831   :  { %5456 = vmatpush1.bf16.msra.mxu0 %v7253_v28  ;;  %6976 = vmatpush3.bf16.msra.mxu1 %v7256_v39 }
0x1832   :  { %5457 = vmatprep.subr.bf16.mxu0 %v7259_v8  ;;  %6977 = vmatprep.subr.bf16.mxu1 %v9015_v6  ;;  %v8660_v35 = vpop.f32.mrf.mxu0  ;;  %v8670_v16 = vpop.f32.mrf.mxu1 }
0x1833   :  { %5487 = vmatprep.mubr.bf16.mxu0 %v9020_v54  ;;  %6991 = vmatprep.mubr.msk.bf16.mxu1 %vm7625_vm4, %v9015_v6 }
0x1834   :  { %v8664_v44 = vpop.f32.mrf.mxu0  ;;  %v8674_v39 = vpop.f32.mrf.mxu1 }
0x1835   :  { %5458 = vmatpush1.bf16.msra.mxu0 %v7257_v11  ;;  %6978 = vmatpush3.bf16.msra.mxu1 %v7260_v51 }
0x1836   :  { %5459 = vmatprep.subr.bf16.mxu0 %v7263_v13  ;;  %6979 = vmatprep.subr.bf16.mxu1 %v9015_v6  ;;  %v8668_v14 = vpop.f32.mrf.mxu0  ;;  %v8678_v11 = vpop.f32.mrf.mxu1 }
0x1839   :  { %5460 = vmatpush1.bf16.msra.mxu0 %v7261_v46  ;;  %6980 = vmatpush3.bf16.msra.mxu1 %v7264_v12 }
0x183a   :  { %5461 = vmatprep.subr.bf16.mxu0 %v7267_v30  ;;  %6981 = vmatprep.subr.bf16.mxu1 %v9015_v6 }
0x183d   :  { %5462 = vmatpush1.bf16.msra.mxu0 %v7265_v19  ;;  %6982 = vmatpush3.bf16.msra.mxu1 %v7268_v32 }
0x183e   :  { %5463 = vmatprep.subr.bf16.mxu0 %v7271_v58  ;;  %6983 = vmatprep.subr.bf16.mxu1 %v9015_v6 }
0x1841   :  { %5464 = vmatpush1.bf16.msra.mxu0 %v7269_v55  ;;  %6984 = vmatpush3.bf16.msra.mxu1 %v7272_v33 }
0x1842   :  { %5465 = vmatprep.subr.bf16.mxu0 %v7275_v34  ;;  %6985 = vmatprep.subr.bf16.mxu1 %v9015_v6 }
0x1845   :  { %5466 = vmatpush1.bf16.msra.mxu0 %v7273_v40  ;;  %6986 = vmatpush3.bf16.msra.mxu1 %v7276_v52 }
0x1846   :  { %5467 = vmatprep.subr.bf16.mxu0 %v7279_v41  ;;  %6987 = vmatprep.subr.bf16.mxu1 %v9015_v6 }
0x1849   :  { %5468 = vmatpush1.bf16.msra.mxu0 %v7277_v42  ;;  %6988 = vmatpush3.bf16.msra.mxu1 %v7280_v5  ;;  %v8709_v5 = vld [vmem:[%s8951_s15] sm:$0xff] }
0x184a   :  { %5469 = vmatprep.subr.bf16.mxu0 %v7283_v37  ;;  %6989 = vmatprep.subr.bf16.mxu1 %v9015_v6 }
0x184d   :  { %5470 = vmatpush1.bf16.msra.mxu0 %v7281_v31  ;;  %6990 = vmatpush3.bf16.msra.mxu1 %v7284_v47  ;;  %v9030_v31 = vld [vmem:[#allocation23_spill] sm:$0xff] }
0x184e   :  { %6995 = vmatprep.subr.bf16.mxu1 %v9015_v6  ;;  %5667 = vmatprep.subr.bf16.mxu0 %v7287_v26  ;;  %v4143_v47 = vrot.slane %v8709_v5, %v9030_v31  ;;  %v8718_v26 = vld [vmem:[%s8949_s13] sm:$0xff] }
0x1850   :  { %5488 = vmatmul.mubr.bf16.vlgmr.msra.gmra.mxu0 %v8596_v36  ;;  %6992 = vmatmul.mubr.bf16.vlgmr.msra.gmra.mxu1 %v8596_v36  ;;  %v7296_v36 = vld [vmem:[#allocation12 + $0x80] ss:$12 sps:$4 sm:$0xff]   ;;  %v8672_v28 = vpop.f32.mrf.mxu0  ;;  %v8682_v13 = vpop.f32.mrf.mxu1 }
0x1851   :  { %5699 = vmatprep.mubr.bf16.mxu0 %v9020_v54  ;;  %7011 = vmatprep.mubr.msk.bf16.mxu1 %vm7625_vm4, %v9015_v6  ;;  %v7293_v54 = vld [vmem:[#allocation12 + $0x78] ss:$12 sps:$4 sm:$0xff]  }
0x1852   :  { %6996 = vmatpush3.bf16.msra.mxu1 %v7288_v20  ;;  %5668 = vmatpush1.bf16.msra.mxu0 %v7285_v1  ;;  %v8676_v8 = vpop.f32.mrf.mxu0  ;;  %v8686_v12 = vpop.f32.mrf.mxu1  ;;  %v2947_v20 = vrot.slane %v8718_v26, %v9030_v31 }
0x1853   :  { %6997 = vmatprep.subr.bf16.mxu1 %v9015_v6  ;;  %5669 = vmatprep.subr.bf16.mxu0 %v7291_v17  ;;  %v9031_v17 = vld [vmem:[#allocation24_spill] sm:$0xff] }
0x1854   :  { %v8680_v51 = vpop.f32.mrf.mxu0  ;;  %v8690_v19 = vpop.f32.mrf.mxu1 }
0x1856   :  { %6998 = vmatpush3.bf16.msra.mxu1 %v7292_v18  ;;  %5670 = vmatpush1.bf16.msra.mxu0 %v7289_v3  ;;  %v8684_v46 = vpop.f32.mrf.mxu0  ;;  %v8694_v58 = vpop.f32.mrf.mxu1  ;;  %v4139_v18 = vrot.slane %v8709_v5, %v9031_v17 }
0x1857   :  { %6999 = vmatprep.subr.bf16.mxu1 %v9015_v6  ;;  %5671 = vmatprep.subr.bf16.mxu0 %v7295_v21  ;;  %v2943_v21 = vrot.slane %v8718_v26, %v9031_v17 }
0x185a   :  { %7000 = vmatpush3.bf16.msra.mxu1 %v7296_v36  ;;  %5672 = vmatpush1.bf16.msra.mxu0 %v7293_v54 }
0x185b   :  { %7001 = vmatprep.subr.bf16.mxu1 %v9015_v6  ;;  %5673 = vmatprep.subr.bf16.mxu0 %v7299_v22  ;;  %v3697_v22 = vadd.f32 %v3696_v10, %v2947_v20 }
0x185e   :  { %5674 = vmatpush1.bf16.msra.mxu0 %v7297_v24  ;;  %7002 = vmatpush3.bf16.msra.mxu1 %v7300_v48  ;;  %v9032_v48 = vld [vmem:[#allocation22_spill] sm:$0xff] }
0x185f   :  { %7003 = vmatprep.subr.bf16.mxu1 %v9015_v6  ;;  %5675 = vmatprep.subr.bf16.mxu0 %v7303_v25  ;;  %v4147_v25 = vrot.slane %v8709_v5, %v9032_v48 }
0x1862   :  { %5676 = vmatpush1.bf16.msra.mxu0 %v7301_v27  ;;  %7004 = vmatpush3.bf16.msra.mxu1 %v7304_v45 }
0x1863   :  { %7005 = vmatprep.subr.bf16.mxu1 %v9015_v6  ;;  %5677 = vmatprep.subr.bf16.mxu0 %v7307_v57 }
0x1866   :  { %5678 = vmatpush1.bf16.msra.mxu0 %v7305_v2  ;;  %7006 = vmatpush3.bf16.msra.mxu1 %v7308_v53  ;;  %v3695_v2 = vadd.f32 %v3694_v59, %v2943_v21  ;;  %v2951_v53 = vrot.slane %v8718_v26, %v9032_v48 }
0x1867   :  { %7007 = vmatprep.subr.bf16.mxu1 %v9015_v6  ;;  %5679 = vmatprep.subr.bf16.mxu0 %v7311_v29 }
0x186a   :  { %5680 = vmatpush1.bf16.msra.mxu0 %v7309_v61  ;;  %7008 = vmatpush3.bf16.msra.mxu1 %v7312_v9  ;;  %v3701_v61 = vadd.f32 %v3700_v4, %v2947_v20 }
0x186b   :  { %7009 = vmatprep.subr.bf16.mxu1 %v9015_v6  ;;  %5681 = vmatprep.subr.bf16.mxu0 %v7315_v49 }
0x186e   :  { %5682 = vmatpush1.bf16.msra.mxu0 %v7313_v63  ;;  %7010 = vmatpush3.bf16.msra.mxu1 %v7316_v60  ;;  %v9033_v60 = vld [vmem:[#allocation27_spill] sm:$0xff] }
0x186f   :  { %7015 = vmatprep.subr.bf16.mxu0 %v9015_v6  ;;  %7035 = vmatprep.subr.bf16.mxu1 %v9015_v6  ;;  %v3699_v6 = vadd.f32 %v3698_v0, %v2943_v21  ;;  %v2955_v59 = vrot.slane %v8718_v26, %v9033_v60  ;;  %v3742_v0 = vadd.f32 %v8658_v56, %v2951_v53 }
0x1870   :  { %v8688_v30 = vpop.f32.mrf.mxu0  ;;  %v8698_v33 = vpop.f32.mrf.mxu1 }
0x1871   :  { %v3740_v21 = vadd.f32 %v8654_v43, %v2955_v59 }
0x1872   :  { %v8692_v32 = vpop.f32.mrf.mxu0  ;;  %v8702_v40 = vpop.f32.mrf.mxu1 }
0x1873   :  { %9028 = vst [vmem:[#allocation30_spill] sm:$0xff] %v8702_v40 }
0x1874   :  { %v8696_v55 = vpop.f32.mrf.mxu0  ;;  %v8704_v41 = vpop.f32.mrf.mxu1 }
0x1876   :  { %v8700_v34 = vpop.f32.mrf.mxu0  ;;  %v8711_v37 = vpop.f32.mrf.mxu1 }
0x1877   :  { %9029 = vst [vmem:[#allocation31_spill] sm:$0xff] %v8711_v37 }
0x1890   :  { %v4890_v52 = vpop.f32.mrf.mxu0  ;;  %v4933_v3 = vpop.f32.mrf.mxu1 }
0x1891   :  { %v4891_v24 = vadd.f32 %v4890_v52, %v4139_v18  ;;  %v4934_v63 = vadd.f32 %v4933_v3, %v4147_v25  ;;  %v9034_v52 = vld [vmem:[#allocation25_spill] sm:$0xff] }
0x1892   :  { %v4892_v42 = vpop.f32.mrf.mxu0  ;;  %v4935_v27 = vpop.f32.mrf.mxu1  ;;  %v4155_v62 = vrot.slane %v8709_v5, %v9034_v52  ;;  %v2959_v4 = vrot.slane %v8718_v26, %v9034_v52 }
0x1893   :  { %v4893_v36 = vadd.f32 %v4892_v42, %v4143_v47  ;;  %v5200_v49 = vmul.f32 %v4891_v24, %v3695_v2  ;;  %v4151_v42 = vrot.slane %v8709_v5, %v9033_v60  ;;  %v9035_v24 = vld [vmem:[#allocation26_spill] sm:$0xff] }
0x1894   :  { %v4894_v1 = vpop.f32.mrf.mxu0  ;;  %v4937_v10 = vpop.f32.mrf.mxu1  ;;  %v4159_v2 = vrot.slane %v8709_v5, %v9035_v24  ;;  %v3785_v43 = vadd.f32 %v8664_v44, %v2959_v4 }
0x1895   :  { %v5202_v29 = vmul.f32 %v4893_v36, %v3697_v22  ;;  %v4895_v9 = vadd.f32 %v4894_v1, %v4139_v18  ;;  %v4938_v18 = vadd.f32 %v4937_v10, %v4147_v25  ;;  %v4936_v36 = vadd.f32 %v4935_v27, %v4151_v42 }
0x1896   :  { %v4896_v54 = vpop.f32.mrf.mxu0 }
0x1897   :  { %v4897_v57 = vadd.f32 %v4896_v54, %v4143_v47  ;;  %v3738_v47 = vadd.f32 %v3737_v50, %v2951_v53  ;;  %v5204_v1 = vadd.f32 %v5202_v29, %v5200_v49  ;;  %v5201_v20 = vmul.f32 %v4895_v9, %v3699_v6  ;;  %v4939_v54 = vpop.f32.mrf.mxu1 }
0x1898   :  { %v2963_v29 = vrot.slane %v8718_v26, %v9035_v24  ;;  %v4940_v27 = vadd.f32 %v4939_v54, %v4151_v42 }
0x1899   :  { %v5203_v37 = vmul.f32 %v4897_v57, %v3701_v61  ;;  %v5206_v3 = vmul.f32 %v4934_v63, %v3738_v47  ;;  %v3781_v57 = vadd.f32 %v8656_v23, %v2959_v4  ;;  %v5207_v61 = vmul.f32 %v4938_v18, %v3742_v0 }
0x189a   :  { %v5210_v63 = vmul.f32 %v4936_v36, %v3740_v21  ;;  %v3783_v53 = vadd.f32 %v8660_v35, %v2963_v29  ;;  %v3787_v4 = vadd.f32 %v8668_v14, %v2963_v29  ;;  %v8767_v36 = vld [vmem:[%s8949_s13 + $0x8] sm:$0xff] }
0x189b   :  { %v5205_v50 = vadd.f32 %v5203_v37, %v5201_v20  ;;  %v5208_v6 = vadd.f32 %v5206_v3, %v5204_v1  ;;  %v3744_v37 = vadd.f32 %v8662_v38, %v2955_v59  ;;  %v2975_v29 = vrot.slane %v8767_v36, %v9031_v17 }
0x189d   :  { %v5209_v23 = vadd.f32 %v5207_v61, %v5205_v50  ;;  %v5212_v20 = vadd.f32 %v5210_v63, %v5208_v6 }
0x18b0   :  { %v4976_v45 = vpop.f32.mrf.mxu0  ;;  %v5019_v25 = vpop.f32.mrf.mxu1 }
0x18b1   :  { %v4977_v22 = vadd.f32 %v4976_v45, %v4155_v62  ;;  %v9036_v45 = vld [vmem:[#allocation21_spill] sm:$0xff] }
0x18b2   :  { %v4978_v7 = vpop.f32.mrf.mxu0  ;;  %v8746_v49 = vsub.s32 6, %v9036_v45  ;;  %v5021_v42 = vpop.f32.mrf.mxu1  ;;  %v8761_v44 = vsub.s32 7, %v9036_v45 }
0x18b3   :  { %v5214_v10 = vmul.f32 %v4977_v22, %v3781_v57  ;;  %v4979_v47 = vadd.f32 %v4978_v7, %v4159_v2  ;;  %v8756_v7 = vld [vmem:[%s8951_s15 + $0x8] sm:$0xff] }
0x18b4   :  { %v4980_v40 = vpop.f32.mrf.mxu0  ;;  %v4163_v1 = vrot.slane %v8709_v5, %v8746_v49  ;;  %v2967_v38 = vrot.slane %v8718_v26, %v8746_v49  ;;  %v5023_v0 = vpop.f32.mrf.mxu1  ;;  %v4171_v50 = vrot.slane %v8756_v7, %v9031_v17  ;;  %v2971_v14 = vrot.slane %v8718_v26, %v8761_v44 }
0x18b5   :  { %v4981_v9 = vadd.f32 %v4980_v40, %v4155_v62  ;;  %v5211_v40 = vmul.f32 %v4940_v27, %v3744_v37  ;;  %v5216_v35 = vadd.f32 %v5214_v10, %v5212_v20  ;;  %v5218_v59 = vmul.f32 %v4979_v47, %v3783_v53 }
0x18b6   :  { %v4982_v56 = vpop.f32.mrf.mxu0  ;;  %v5020_v22 = vadd.f32 %v5019_v25, %v4163_v1  ;;  %v3824_v61 = vadd.f32 %v8666_v15, %v2967_v38  ;;  %v5024_v25 = vadd.f32 %v5023_v0, %v4163_v1  ;;  %v4175_v10 = vrot.slane %v8756_v7, %v9030_v31 }
0x18b7   :  { %v5215_v18 = vmul.f32 %v4981_v9, %v3785_v43  ;;  %v4983_v3 = vadd.f32 %v4982_v56, %v4159_v2  ;;  %v5213_v54 = vadd.f32 %v5211_v40, %v5209_v23  ;;  %v4167_v2 = vrot.slane %v8709_v5, %v8761_v44  ;;  %v5025_v5 = vpop.f32.mrf.mxu1 }
0x18b8   :  { %v5220_v27 = vadd.f32 %v5218_v59, %v5216_v35  ;;  %v5222_v9 = vmul.f32 %v5020_v22, %v3824_v61  ;;  %v3828_v56 = vadd.f32 %v8674_v39, %v2967_v38  ;;  %v3826_v15 = vadd.f32 %v8670_v16, %v2971_v14 }
0x18b9   :  { %v5217_v57 = vadd.f32 %v5215_v18, %v5213_v54  ;;  %v5219_v6 = vmul.f32 %v4983_v3, %v3787_v4  ;;  %v5022_v45 = vadd.f32 %v5021_v42, %v4167_v2  ;;  %v3867_v26 = vadd.f32 %v8672_v28, %v2975_v29 }
0x18ba   :  { %v2979_v43 = vrot.slane %v8767_v36, %v9030_v31  ;;  %v5224_v23 = vadd.f32 %v5222_v9, %v5220_v27  ;;  %v5223_v20 = vmul.f32 %v5024_v25, %v3828_v56  ;;  %v5026_v1 = vadd.f32 %v5025_v5, %v4167_v2 }
0x18bb   :  { %v5221_v37 = vadd.f32 %v5219_v6, %v5217_v57  ;;  %v3830_v35 = vadd.f32 %v8678_v11, %v2971_v14  ;;  %v3871_v39 = vadd.f32 %v8680_v51, %v2975_v29  ;;  %v4179_v59 = vrot.slane %v8756_v7, %v9032_v48 }
0x18bc   :  { %v3869_v16 = vadd.f32 %v8676_v8, %v2979_v43  ;;  %v2983_v0 = vrot.slane %v8767_v36, %v9032_v48  ;;  %v3873_v11 = vadd.f32 %v8684_v46, %v2979_v43  ;;  %v4183_v8 = vrot.slane %v8756_v7, %v9033_v60 }
0x18bd   :  { %v5225_v38 = vadd.f32 %v5223_v20, %v5221_v37  ;;  %v5227_v54 = vmul.f32 %v5026_v1, %v3830_v35  ;;  %v2987_v27 = vrot.slane %v8767_v36, %v9033_v60 }
0x18be   :  { %v3910_v29 = vadd.f32 %v8682_v13, %v2983_v0  ;;  %v2995_v13 = vrot.slane %v8767_v36, %v9035_v24 }
0x18bf   :  { %v5229_v57 = vadd.f32 %v5227_v54, %v5225_v38  ;;  %v3912_v37 = vadd.f32 %v8686_v12, %v2987_v27  ;;  %v3916_v12 = vadd.f32 %v8694_v58, %v2987_v27 }
0x18d0   :  { %v5062_v62 = vpop.f32.mrf.mxu0  ;;  %v5105_v53 = vpop.f32.mrf.mxu1 }
0x18d1   :  { %v5063_v63 = vadd.f32 %v5062_v62, %v4171_v50  ;;  %v5226_v62 = vmul.f32 %v5022_v45, %v3826_v15  ;;  %v5106_v51 = vadd.f32 %v5105_v53, %v4179_v59  ;;  %v2991_v45 = vrot.slane %v8767_v36, %v9034_v52 }
0x18d2   :  { %v5064_v21 = vpop.f32.mrf.mxu0  ;;  %v5107_v4 = vpop.f32.mrf.mxu1  ;;  %v4191_v15 = vrot.slane %v8756_v7, %v9035_v24  ;;  %v4195_v53 = vrot.slane %v8756_v7, %v8746_v49  ;;  %v3955_v24 = vadd.f32 %v8692_v32, %v2995_v13  ;;  %v3003_v32 = vrot.slane %v8767_v36, %v8761_v44 }
0x18d3   :  { %v5230_v40 = vmul.f32 %v5063_v63, %v3867_v26  ;;  %v5065_v18 = vadd.f32 %v5064_v21, %v4175_v10  ;;  %v5228_v28 = vadd.f32 %v5226_v62, %v5224_v23  ;;  %v5238_v5 = vmul.f32 %v5106_v51, %v3910_v29 }
0x18d4   :  { %v5066_v47 = vpop.f32.mrf.mxu0  ;;  %v5109_v6 = vpop.f32.mrf.mxu1  ;;  %v5108_v46 = vadd.f32 %v5107_v4, %v4183_v8  ;;  %v3957_v58 = vadd.f32 %v8696_v55, %v2991_v45 }
0x18d5   :  { %v5067_v42 = vadd.f32 %v5066_v47, %v4171_v50  ;;  %v5232_v50 = vadd.f32 %v5230_v40, %v5228_v28  ;;  %v5234_v21 = vmul.f32 %v5065_v18, %v3869_v16  ;;  %v5110_v9 = vadd.f32 %v5109_v6, %v4179_v59 }
0x18d6   :  { %v5068_v3 = vpop.f32.mrf.mxu0  ;;  %v5111_v63 = vpop.f32.mrf.mxu1  ;;  %v3914_v47 = vadd.f32 %v8690_v19, %v2983_v0  ;;  %v5242_v19 = vmul.f32 %v5108_v46, %v3912_v37 }
0x18d7   :  { %v5231_v22 = vmul.f32 %v5067_v42, %v3871_v39  ;;  %v5069_v2 = vadd.f32 %v5068_v3, %v4175_v10  ;;  %v5236_v25 = vadd.f32 %v5234_v21, %v5232_v50  ;;  %v4187_v10 = vrot.slane %v8756_v7, %v9034_v52 }
0x18d8   :  { %v5239_v26 = vmul.f32 %v5110_v9, %v3914_v47  ;;  %v5112_v43 = vadd.f32 %v5111_v63, %v4183_v8  ;;  %v3953_v52 = vadd.f32 %v8688_v30, %v2991_v45  ;;  %v2999_v42 = vrot.slane %v8767_v36, %v8746_v49 }
0x18d9   :  { %v5233_v61 = vadd.f32 %v5231_v22, %v5229_v57  ;;  %v5235_v14 = vmul.f32 %v5069_v2, %v3873_v11  ;;  %v5240_v60 = vadd.f32 %v5238_v5, %v5236_v25  ;;  %v4199_v30 = vrot.slane %v8756_v7, %v8761_v44  ;;  %v9038_v25 = vld [vmem:[#allocation31_spill] sm:$0xff] }
0x18da   :  { %v5243_v38 = vmul.f32 %v5112_v43, %v3916_v12  ;;  %v3996_v22 = vadd.f32 %v8698_v33, %v2999_v42  ;;  %v3959_v2 = vadd.f32 %v8700_v34, %v2995_v13  ;;  %v4000_v8 = vadd.f32 %v8704_v41, %v2999_v42  ;;  %v9037_v33 = vld [vmem:[#allocation30_spill] sm:$0xff]  ;;  %v7319_v43 = vld [vmem:[%s8956_s20 + $0x30] sm:$0xff]   ;;  %v7326_v12 = vld [vmem:[#allocation15 + $0x18] sm:$0xff]  }
0x18db   :  { %v5237_v56 = vadd.f32 %v5235_v14, %v5233_v61  ;;  %v5244_v3 = vadd.f32 %v5242_v19, %v5240_v60  ;;  %v3998_v27 = vadd.f32 %v9037_v33, %v3003_v32  ;;  %v4002_v44 = vadd.f32 %v9038_v25, %v3003_v32  ;;  %v7324_v19 = vld [vmem:[#allocation15 + $0x20] sm:$0xff]   ;;  %v7327_v42 = vld [vmem:[%s8956_s20 + $0x10] sm:$0xff]  }
0x18dc   :  { %v9039_v41 = vmov 0.0  }
0x18dd   :  { %v5241_v62 = vadd.f32 %v5239_v26, %v5237_v56  ;;  %v7318_v26 = vld [vmem:[#allocation15 + $0x38] sm:$0xff]  }
0x18df   :  { %v5245_v0 = vadd.f32 %v5243_v38, %v5241_v62  ;;  %v7328_v62 = vld [vmem:[#allocation15 + $0x10] sm:$0xff]  }
0x18f0   :  { %v5148_v23 = vpop.f32.mrf.mxu0  ;;  %v5191_v20 = vpop.f32.mrf.mxu1 }
0x18f1   :  { %v5149_v1 = vadd.f32 %v5148_v23, %v4187_v10  ;;  %v5192_v16 = vadd.f32 %v5191_v20, %v4195_v53  ;;  %v7320_v23 = vld [vmem:[#allocation15 + $0x30] sm:$0xff]   ;;  %v7322_v20 = vld [vmem:[#allocation15 + $0x28] sm:$0xff]  }
0x18f2   :  { %v5150_v40 = vpop.f32.mrf.mxu0  ;;  %v5193_v18 = vpop.f32.mrf.mxu1 }
0x18f3   :  { %v5246_v35 = vmul.f32 %v5149_v1, %v3953_v52  ;;  %v5151_v39 = vadd.f32 %v5150_v40, %v4191_v15  ;;  %v5254_v55 = vmul.f32 %v5192_v16, %v3996_v22  ;;  %v5194_v6 = vadd.f32 %v5193_v18, %v4199_v30  ;;  %v7323_v52 = vld [vmem:[%s8956_s20 + $0x20] sm:$0xff]   ;;  %v7325_v1 = vld [vmem:[%s8956_s20 + $0x18] sm:$0xff]   ;;  %v7329_v40 = vld [vmem:[%s8956_s20 + $0x8] sm:$0xff]  }
0x18f4   :  { %v5152_v28 = vpop.f32.mrf.mxu0  ;;  %v5195_v59 = vpop.f32.mrf.mxu1  ;;  %v7330_v18 = vld [vmem:[#allocation15 + $0x8] sm:$0xff]   ;;  %v8876_v16 = vld [vmem:[%s8954_s18] sm:$0x7] }
0x18f5   :  { %v5248_v4 = vadd.f32 %v5246_v35, %v5244_v3  ;;  %v5250_v54 = vmul.f32 %v5151_v39, %v3955_v24  ;;  %v5153_v49 = vadd.f32 %v5152_v28, %v4187_v10  ;;  %v5196_v7 = vadd.f32 %v5195_v59, %v4195_v53  ;;  %v7321_v53 = vld [vmem:[%s8956_s20 + $0x28] sm:$0xff]   ;;  %v7331_v24 = vld [vmem:[%s8956_s20] sm:$0xff]  }
0x18f6   :  { %v5154_v50 = vpop.f32.mrf.mxu0  ;;  %v5197_v21 = vpop.f32.mrf.mxu1  ;;  %v5258_v45 = vmul.f32 %v5194_v6, %v3998_v27  ;;  %v7332_v3 = vld [vmem:[#allocation15] sm:$0xff]   ;;  %v5764_v28 = vrot.slane %v8876_v16, %v9032_v48 }
0x18f7   :  { %v5252_v11 = vadd.f32 %v5250_v54, %v5248_v4  ;;  %v5247_v57 = vmul.f32 %v5153_v49, %v3957_v58  ;;  %v5155_v51 = vadd.f32 %v5154_v50, %v4191_v15  ;;  %v5198_v29 = vadd.f32 %v5197_v21, %v4199_v30  ;;  %v7317_v15 = vld [vmem:[%s8956_s20 + $0x38] sm:$0xff]  }
0x18f8   :  { %v5255_v34 = vmul.f32 %v5196_v7, %v4000_v8  ;;  %v5760_v54 = vrot.slane %v8876_v16, %v9030_v31 }
0x18f9   :  { %v5249_v61 = vadd.f32 %v5247_v57, %v5245_v0  ;;  %v5251_v14 = vmul.f32 %v5155_v51, %v3959_v2  ;;  %v5256_v36 = vadd.f32 %v5254_v55, %v5252_v11  ;;  %v5259_v46 = vmul.f32 %v5198_v29, %v4002_v44 }
0x18fb   :  { %v5253_v9 = vadd.f32 %v5251_v14, %v5249_v61  ;;  %v5260_v63 = vadd.f32 %v5258_v45, %v5256_v36 }
0x18fd   :  { %v5257_v5 = vadd.f32 %v5255_v34, %v5253_v9 }
0x18ff   :  { %v5261_v10 = vadd.f32 %v5259_v46, %v5257_v5 }
0x1901   :  { %v5262_v47 = vpack.c.bf16 %v5261_v10, %v5260_v63 }
0x1903   :  { %5700 = vmatmul.mubr.bf16.vlgmr.msra.gmra.mxu0 %v5262_v47  ;;  %7012 = vmatmul.mubr.bf16.vlgmr.msra.gmra.mxu1 %v5262_v47 }
0x1904   :  { %7031 = vmatprep.mubr.msk.bf16.mxu0 %vm7625_vm4, %v9039_v41  ;;  %7051 = vmatprep.mubr.msk.bf16.mxu1 %vm7625_vm4, %v9039_v41 }
0x1905   :  { %7016 = vmatpush3.bf16.msra.mxu0 %v7317_v15  ;;  %7036 = vmatpush3.bf16.msra.mxu1 %v7318_v26 }
0x1906   :  { %7017 = vmatprep.subr.bf16.mxu0 %v9039_v41  ;;  %7037 = vmatprep.subr.bf16.mxu1 %v9039_v41 }
0x1909   :  { %7018 = vmatpush3.bf16.msra.mxu0 %v7319_v43  ;;  %7038 = vmatpush3.bf16.msra.mxu1 %v7320_v23 }
0x190a   :  { %7019 = vmatprep.subr.bf16.mxu0 %v9039_v41  ;;  %7039 = vmatprep.subr.bf16.mxu1 %v9039_v41 }
0x190d   :  { %7020 = vmatpush3.bf16.msra.mxu0 %v7321_v53  ;;  %7040 = vmatpush3.bf16.msra.mxu1 %v7322_v20 }
0x190e   :  { %7021 = vmatprep.subr.bf16.mxu0 %v9039_v41  ;;  %7041 = vmatprep.subr.bf16.mxu1 %v9039_v41 }
0x1910   :  { %v5532_v56 = vpop.f32.mrf.mxu1  ;;  %v8869_v35 = vpop.f32.mrf.mxu0 }
0x1911   :  { %7022 = vmatpush3.bf16.msra.mxu0 %v7323_v52  ;;  %7042 = vmatpush3.bf16.msra.mxu1 %v7324_v19 }
0x1912   :  { %v6993_v37 = vpop.f32.mrf.mxu1  ;;  %7023 = vmatprep.subr.bf16.mxu0 %v9039_v41  ;;  %7043 = vmatprep.subr.bf16.mxu1 %v9039_v41  ;;  %v5491_v39 = vpop.f32.mrf.mxu0 }
0x1914   :  { %v8829_v13 = vpop.f32.mrf.mxu1  ;;  %v8871_v38 = vpop.f32.mrf.mxu0 }
0x1915   :  { %7024 = vmatpush3.bf16.msra.mxu0 %v7325_v1  ;;  %7044 = vmatpush3.bf16.msra.mxu1 %v7326_v12 }
0x1916   :  { %v6994_v60 = vpop.f32.mrf.mxu1  ;;  %7025 = vmatprep.subr.bf16.mxu0 %v9039_v41  ;;  %7045 = vmatprep.subr.bf16.mxu1 %v9039_v41  ;;  %v5495_v30 = vpop.f32.mrf.mxu0 }
0x1919   :  { %7026 = vmatpush3.bf16.msra.mxu0 %v7327_v42  ;;  %7046 = vmatpush3.bf16.msra.mxu1 %v7328_v62 }
0x191a   :  { %7027 = vmatprep.subr.bf16.mxu0 %v9039_v41  ;;  %7047 = vmatprep.subr.bf16.mxu1 %v9039_v41 }
0x191d   :  { %7028 = vmatpush3.bf16.msra.mxu0 %v7329_v40  ;;  %7048 = vmatpush3.bf16.msra.mxu1 %v7330_v18 }
0x191e   :  { %7029 = vmatprep.subr.bf16.mxu0 %v9039_v41  ;;  %7049 = vmatprep.subr.bf16.mxu1 %v9039_v41 }
0x1921   :  { %7030 = vmatpush3.bf16.msra.mxu0 %v7331_v24  ;;  %7050 = vmatpush3.bf16.msra.mxu1 %v7332_v3 }
0x19c3   :  { %v8880_v59 = vpop.f32.mrf.mxu0  ;;  %v5744_v58 = vpop.f32.mrf.mxu1 }
0x19c4   :  { %v5745_v4 = vadd.f32 %v5744_v58, %v5532_v56 }
0x19c5   :  { %v5703_v49 = vpop.f32.mrf.mxu0  ;;  %v7013_v22 = vpop.f32.mrf.mxu1 }
0x19c6   :  { %v8884_v32 = vadd.f32 %v5764_v28, %v5745_v4  ;;  %v5704_v2 = vadd.f32 %v5703_v49, %v5491_v39 }
0x19c7   :  { %v8886_v0 = vpop.f32.mrf.mxu0  ;;  %v5747_v50 = vpop.f32.mrf.mxu1 }
0x19c8   :  { %v8889_v21 = vmul.f32 0.70710677, %v8884_v32  ;;  %v8891_v11 = vadd.f32 %v5760_v54, %v5704_v2  ;;  %v5748_v48 = vadd.f32 %v5747_v50, %v8829_v13 }
0x19c9   :  { %v5707_v57 = vpop.f32.mrf.mxu0  ;;  %v7014_v7 = vpop.f32.mrf.mxu1 }
0x19ca   :  { %v5782_v51 = vand.u32 2147483647, %v8889_v21  ;;  %v8896_v31 = vmul.f32 0.70710677, %v8891_v11  ;;  %v8898_v8 = vadd.f32 %v5764_v28, %v5748_v48  ;;  %v5708_v55 = vadd.f32 %v5707_v57, %v5495_v30 }
0x19cb   :  { %vm5778_vm10 = vcmp.lt.f32.partialorder %v8889_v21, 0.0 }
0x19cc   :  { %v5784_v6 = vmul.f32 0.3275911, %v5782_v51  ;;  %v5838_v61 = vand.u32 2147483647, %v8896_v31  ;;  %v8902_v14 = vmul.f32 0.70710677, %v8898_v8  ;;  %v8904_v29 = vadd.f32 %v5760_v54, %v5708_v55 }
0x19cd   :  { %v5810_v46 = vsub.f32 0.0, %v5782_v51  ;;  %vm5834_vm11 = vcmp.lt.f32.partialorder %v8896_v31, 0.0  ;;  %v5702_v31 = vadd.f32 %v8880_v59, %v8869_v35 }
0x19ce   :  { %v5786_v33 = vadd.f32 1.0, %v5784_v6  ;;  %v5840_v27 = vmul.f32 0.3275911, %v5838_v61  ;;  %v5783_v25 = vand.u32 2147483647, %v8902_v14  ;;  %v5866_v10 = vsub.f32 0.0, %v5838_v61 }
0x19cf   :  { %v8908_v44 = vmul.f32 0.70710677, %v8904_v29  ;;  %v5812_v47 = vmul.f32 %v5810_v46, %v5782_v51  ;;  %vm5779_vm12 = vcmp.lt.f32.partialorder %v8902_v14, 0.0  ;;  %v5706_v14 = vadd.f32 %v8886_v0, %v8871_v38 }
0x19d0   :  { %7397 = vrcp.f32 %v5786_v33  ;;  %v5842_v36 = vadd.f32 1.0, %v5840_v27  ;;  %v5785_v34 = vmul.f32 0.3275911, %v5783_v25  ;;  %v5811_v41 = vsub.f32 0.0, %v5783_v25 }
0x19d1   :  { %v5839_v9 = vand.u32 2147483647, %v8908_v44  ;;  %v5868_v37 = vmul.f32 %v5866_v10, %v5838_v61  ;;  %v5814_v60 = vmul.f32 1.442695, %v5812_v47  ;;  %vm5835_vm13 = vcmp.lt.f32.partialorder %v8908_v44, 0.0 }
0x19d2   :  { %7399 = vrcp.f32 %v5842_v36  ;;  %v5787_v45 = vadd.f32 1.0, %v5785_v34  ;;  %v5813_v26 = vmul.f32 %v5811_v41, %v5783_v25  ;;  %v7626_v41 = vmov 1.0  }
0x19d3   :  { %v5841_v5 = vmul.f32 0.3275911, %v5839_v9  ;;  %v5867_v15 = vsub.f32 0.0, %v5839_v9  ;;  %v5870_v20 = vmul.f32 1.442695, %v5868_v37  ;;  %v5780_v37 = vsel %vm5778_vm10, -1.0, %v7626_v41 }
0x19d4   :  { %7401 = vrcp.f32 %v5787_v45  ;;  %v5816_v62 = vmul.f32 1.442695, %v5813_v26  ;;  %v5831_v35 = vmul.f32 0.5, %v8904_v29 }
0x19d5   :  { %v5843_v63 = vadd.f32 1.0, %v5841_v5  ;;  %v5869_v1 = vmul.f32 %v5867_v15, %v5839_v9 }
0x19d7   :  { %7403 = vrcp.f32 %v5843_v63  ;;  %v5872_v28 = vmul.f32 1.442695, %v5869_v1  ;;  %v5836_v1 = vsel %vm5834_vm11, -1.0, %v7626_v41 }
0x19d8   :  { %7405 = vpow2.f32 %v5814_v60 }
0x19d9   :  { %7407 = vpow2.f32 %v5870_v20 }
0x19da   :  { %7409 = vpow2.f32 %v5816_v62  ;;  %v5781_v62 = vsel %vm5779_vm12, -1.0, %v7626_v41 }
0x19db   :  { %7411 = vpow2.f32 %v5872_v28 }
0x19dd   :  { %v7398_v56 = vpop.eup %7397 }
0x19de   :  { %v5792_v13 = vmul.f32 1.0614054, %v7398_v56 }
0x19df   :  { %v7400_v43 = vpop.eup %7399 }
0x19e0   :  { %v5794_v23 = vadd.f32 -1.4531521, %v5792_v13  ;;  %v5848_v53 = vmul.f32 1.0614054, %v7400_v43 }
0x19e1   :  { %v7402_v52 = vpop.eup %7401 }
0x19e2   :  { %v5796_v19 = vmul.f32 %v7398_v56, %v5794_v23  ;;  %v5850_v12 = vadd.f32 -1.4531521, %v5848_v53  ;;  %v5793_v42 = vmul.f32 1.0614054, %v7402_v52 }
0x19e4   :  { %v5798_v40 = vadd.f32 1.4214138, %v5796_v19  ;;  %v7404_v18 = vpop.eup %7403  ;;  %v5852_v24 = vmul.f32 %v7400_v43, %v5850_v12  ;;  %v5795_v3 = vadd.f32 -1.4531521, %v5793_v42 }
0x19e5   :  { %v5849_v30 = vmul.f32 1.0614054, %v7404_v18  ;;  %v7406_v25 = vpop.eup %7405 }
0x19e6   :  { %v5800_v39 = vmul.f32 %v7398_v56, %v5798_v40  ;;  %v5854_v58 = vadd.f32 1.4214138, %v5852_v24  ;;  %v5797_v4 = vmul.f32 %v7402_v52, %v5795_v3  ;;  %v7408_v63 = vpop.eup %7407  ;;  %v5774_v40 = vmul.f32 0.5, %v8884_v32 }
0x19e7   :  { %v5851_v49 = vadd.f32 -1.4531521, %v5849_v30  ;;  %v7410_v15 = vpop.eup %7409 }
0x19e8   :  { %v5802_v54 = vadd.f32 -0.28449672, %v5800_v39  ;;  %v5856_v22 = vmul.f32 %v7400_v43, %v5854_v58  ;;  %v5799_v2 = vadd.f32 1.4214138, %v5797_v4  ;;  %v7412_v20 = vpop.eup %7411  ;;  %v5837_v39 = vsel %vm5835_vm13, -1.0, %v7626_v41 }
0x19e9   :  { %v5853_v48 = vmul.f32 %v7404_v18, %v5851_v49 }
0x19ea   :  { %v5804_v50 = vmul.f32 %v7398_v56, %v5802_v54  ;;  %v5858_v57 = vadd.f32 -0.28449672, %v5856_v22  ;;  %v5801_v7 = vmul.f32 %v7402_v52, %v5799_v2  ;;  %v5830_v54 = vmul.f32 0.5, %v8891_v11 }
0x19eb   :  { %v5855_v55 = vadd.f32 1.4214138, %v5853_v48  ;;  %v6578_v48 = vld [vmem:[%s8957_s21] ss:$0 sm:$0xff] }
0x19ec   :  { %v5806_v51 = vadd.f32 0.2548296, %v5804_v50  ;;  %v5860_v6 = vmul.f32 %v7400_v43, %v5858_v57  ;;  %v5803_v61 = vadd.f32 -0.28449672, %v5801_v7 }
0x19ed   :  { %v5857_v27 = vmul.f32 %v7404_v18, %v5855_v55 }
0x19ee   :  { %v5808_v33 = vmul.f32 %v7398_v56, %v5806_v51  ;;  %v5862_v36 = vadd.f32 0.2548296, %v5860_v6  ;;  %v5805_v34 = vmul.f32 %v7402_v52, %v5803_v61  ;;  %v9040_v6 = vld [vmem:[#allocation33_spill] sm:$0xff] }
0x19ef   :  { %v5859_v45 = vadd.f32 -0.28449672, %v5857_v27 }
0x19f0   :  { %v5818_v9 = vmul.f32 %v7406_v25, %v5808_v33  ;;  %v5864_v5 = vmul.f32 %v7400_v43, %v5862_v36  ;;  %v5807_v46 = vadd.f32 0.2548296, %v5805_v34  ;;  %v5756_v43 = vrot.slane %v8876_v16, %v9031_v17  ;;  %v9041_v34 = vld [vmem:[#allocation29_spill] sm:$0xff] }
0x19f1   :  { %v5861_v47 = vmul.f32 %v7404_v18, %v5859_v45  ;;  %v5775_v17 = vmul.f32 0.5, %v8898_v8 }
0x19f2   :  { %v5820_v10 = vsub.f32 1.0, %v5818_v9  ;;  %v5874_v13 = vmul.f32 %v7408_v63, %v5864_v5  ;;  %v5809_v60 = vmul.f32 %v7402_v52, %v5807_v46  ;;  %v5768_v58 = vadd.f32 %v5756_v43, %v5702_v31 }
0x19f3   :  { %v5863_v56 = vadd.f32 0.2548296, %v5861_v47  ;;  %v5771_v44 = vadd.f32 %v5756_v43, %v5706_v14 }
0x19f4   :  { %v5822_v26 = vmul.f32 %v5820_v10, %v5780_v37  ;;  %v5876_v23 = vsub.f32 1.0, %v5874_v13  ;;  %v5819_v21 = vmul.f32 %v7410_v15, %v5809_v60 }
0x19f5   :  { %v5865_v53 = vmul.f32 %v7404_v18, %v5863_v56 }
0x19f6   :  { %v5824_v19 = vadd.f32 1.0, %v5822_v26  ;;  %v5821_v12 = vsub.f32 1.0, %v5819_v21  ;;  %v5878_v42 = vmul.f32 %v5876_v23, %v5836_v1 }
0x19f7   :  { %v5875_v52 = vmul.f32 %v7412_v20, %v5865_v53 }
0x19f8   :  { %v5823_v18 = vmul.f32 %v5821_v12, %v5781_v62  ;;  %v5826_v3 = vmul.f32 %v5824_v19, %v5774_v40  ;;  %v5880_v30 = vadd.f32 1.0, %v5878_v42 }
0x19f9   :  { %v5877_v24 = vsub.f32 1.0, %v5875_v52 }
0x19fa   :  { %v5825_v16 = vadd.f32 1.0, %v5823_v18  ;;  %v5828_v32 = vmul.f32 %v5826_v3, %v5768_v58  ;;  %v5882_v38 = vmul.f32 %v5880_v30, %v5830_v54 }
0x19fb   :  { %v5879_v28 = vmul.f32 %v5877_v24, %v5837_v39 }
0x19fc   :  { %v5827_v4 = vmul.f32 %v5825_v16, %v5775_v17 }
0x19fd   :  { %v5881_v59 = vadd.f32 1.0, %v5879_v28 }
0x19fe   :  { %v5829_v49 = vmul.f32 %v5827_v4, %v5771_v44 }
0x19ff   :  { %v5883_v0 = vmul.f32 %v5881_v59, %v5831_v35 }
0x1a00   :  { %v5884_v22 = vpack.c.bf16 %v5829_v49, %v5828_v32 }
0x1a01   :  { %v5901_v2 = vpack.c.bf16 %v5883_v0, %v5882_v38 }
0x1a02   :  { %7052 = vmatmul.mubr.bf16.vlgmr.msra.gmra.mxu1 %v5884_v22 }
0x1a03   :  { %7032 = vmatmul.mubr.bf16.vlgmr.msra.gmra.mxu0 %v5901_v2 }
0x1ac2   :  { %v6089_v8 = vpop.f32.mrf.mxu1 }
0x1ac3   :  { %v6000_v50 = vpop.f32.mrf.mxu0 }
0x1ac4   :  { %v6090_v57 = vadd.f32 %v6089_v8, %v6000_v50  ;;  %v7053_v7 = vpop.f32.mrf.mxu1 }
0x1ac5   :  { %v7033_v11 = vpop.f32.mrf.mxu0 }
0x1ac6   :  { %v6103_v51 = vadd.f32 %v6578_v48, %v6090_v57  ;;  %v6092_v29 = vpop.f32.mrf.mxu1 }
0x1ac7   :  { %v6003_v55 = vpop.f32.mrf.mxu0 }
0x1ac8   :  { %v6105_v61 = vadd.f32 %v6103_v51, %v9040_v6  ;;  %v6093_v33 = vadd.f32 %v6092_v29, %v6003_v55  ;;  %v7054_v27 = vpop.f32.mrf.mxu1 }
0x1ac9   :  { %v7034_v25 = vpop.f32.mrf.mxu0 }
0x1aca   :  { %6107 = vst [vmem:[%s8958_s22] sm:$0xff] %v6105_v61  ;;  %v6104_v36 = vadd.f32 %v6578_v48, %v6093_v33 }
0x1acc   :  { %v6106_v9 = vadd.f32 %v6104_v36, %v9041_v34 }
0x1ace   :  { %6108 = vst [vmem:[%s8958_s22 + $0x8] sm:$0xff] %v6106_v9 }
0x1acf   :  { %6113 = vsyncpa [#allocation3], 1 }
0x1ad0   :  { %6114 = vsyncpa [#allocation5], 1 }
0x1ad1   :  { %6115 = vsyncpa [#allocation8], 1 }
0x1ad2   :  { %6116 = vsyncpa [#allocation11], 1 }
0x1ad3   :  { %6117 = vsyncpa [#allocation14], 1 }

</bundles_post_ra>
